<compile_context>
chip_gen: v6e
topology: v6e:2x2x1
jax: 0.10.0
libtpu: 0.0.40
codegen_flags: <defaults>
</compile_context>

<pallas_src>
import functools

import jax
import jax.numpy as jnp
import numpy as np
from jax import lax
from jax.experimental import pallas as pl
from jax.experimental.pallas import tpu as pltpu

N_STEPS = 39   # for t in range(1, 40)
LANE = 128


# ----------------------------------------------------------------------------------
# helpers
# ----------------------------------------------------------------------------------
def _round_up(n, m):
    return ((n + m - 1) // m) * m


def _pad_axis(x, axis, target):
    pad = target - x.shape[axis]
    if pad == 0:
        return x
    widths = [(0, 0)] * x.ndim
    widths[axis] = (0, pad)
    return jnp.pad(x, widths)


def _pad_last(x, target):
    return _pad_axis(x, -1, target)


def _pad_gates(w, H, Hp):
    """Pad a [..., 3H] GRU weight/bias per gate so gate k starts at lane k*Hp."""
    parts = [_pad_axis(w[..., k * H:(k + 1) * H], -1, Hp) for k in range(3)]
    return jnp.concatenate(parts, axis=-1)


def _vmem_limit_bytes():
    """Per-generation VMEM budget: headroom on 64 MiB parts (v7x-class), more
    residency allowed on 128 MiB parts (v5e/v6e)."""
    default = 64 * 1024 * 1024
    try:
        cap = int(pltpu.get_tpu_info().vmem_capacity_bytes)
    except Exception:
        return default
    if cap <= 64 * 1024 * 1024:
        return max(cap - 8 * 1024 * 1024, 32 * 1024 * 1024)
    return min(cap - 16 * 1024 * 1024, 110 * 1024 * 1024)


# ----------------------------------------------------------------------------------
# kernel
# ----------------------------------------------------------------------------------
def _decoder_kernel(teacher_forcing, n_pre_poses, Hp,
                    pose_pre_ref, e_enc_ref, enc_ref,
                    wa_h_ref, v_a_ref,
                    wp_x_ref, wp_c_ref, b_pre_ref,
                    wih1_ref, whh1_ref, bih1_ref, bhh1_ref,
                    wih2_ref, whh2_ref, bih2_ref, bhh2_ref,
                    w_o_ref, b_o_ref,
                    out_ref):
    """Whole 39-step autoregressive decode for one batch tile, in one invocation."""
    block_b = enc_ref.shape[0]
    Pp = out_ref.shape[-1]
    cdt = wa_h_ref.dtype        # matmul-operand dtype (bf16 production / f32 check)

    # Grid-invariant operands: loaded once, VMEM-resident for all 39 steps.
    enc = enc_ref[...]          # [bb, T, Hp]  (cdt)
    e_enc = e_enc_ref[...]      # [bb, T, Hp]  (cdt) = enc @ wa_e + b_a   (hoisted)
    wa_h = wa_h_ref[...]        # [Hp, Hp]     (cdt)
    v_a = v_a_ref[...]          # [1, Hp]      (f32, VPU-only)
    wp_x = wp_x_ref[...]        # [Pp, Hp]     (cdt)  - used only when TF=False
    wp_c = wp_c_ref[...]        # [Hp, Hp]     (cdt)
    b_pre = b_pre_ref[...]      # [1, Hp]      (f32, BatchNorm folded in)
    wih1 = wih1_ref[...]; whh1 = whh1_ref[...]
    bih1 = bih1_ref[...]; bhh1 = bhh1_ref[...]
    wih2 = wih2_ref[...]; whh2 = whh2_ref[...]
    bih2 = bih2_ref[...]; bhh2 = bhh2_ref[...]
    w_o = w_o_ref[...]; b_o = b_o_ref[...]

    def gru_cell(x, h, w_ih, w_hh, b_ih, b_hh):
        # PyTorch nn.GRU semantics (gate order r, z, n); ih/hh matmuls cannot be
        # K-fused because the n gate needs gh separately.  Gate slices are 128-lane
        # aligned since each gate block was padded to Hp.
        gi = jnp.dot(x.astype(cdt), w_ih, preferred_element_type=jnp.float32) + b_ih
        gh = jnp.dot(h.astype(cdt), w_hh, preferred_element_type=jnp.float32) + b_hh
        r = jax.nn.sigmoid(gi[:, 0:Hp] + gh[:, 0:Hp])
        z = jax.nn.sigmoid(gi[:, Hp:2 * Hp] + gh[:, Hp:2 * Hp])
        n = jnp.tanh(gi[:, 2 * Hp:3 * Hp] + r * gh[:, 2 * Hp:3 * Hp])
        return (1.0 - z) * n + z * h

    def step(s, carry):
        h1, h2, prev = carry                      # [bb,Hp], [bb,Hp], [bb,Pp] (all f32)

        # ---- decoder input, already projected through the pose half of pre_linear.
        if teacher_forcing:
            dec_pre = pose_pre_ref[s]                                   # [bb, Hp] f32
        else:
            use_pose = jnp.logical_or(s == 0, s < n_pre_poses)
            prev_pre = jnp.dot(prev.astype(cdt), wp_x,
                               preferred_element_type=jnp.float32)      # [bb, Hp]
            dec_pre = jnp.where(use_pose, pose_pre_ref[s], prev_pre)

        # ---- Bahdanau attention (encoder projection precomputed once) -------------
        e_hid = jnp.dot(h2.astype(cdt), wa_h, preferred_element_type=jnp.float32)
        energy = jnp.tanh(e_enc + e_hid[:, None, :])                    # [bb, T, Hp] f32
        scores = jnp.sum(energy * v_a[None], axis=-1)                   # [bb, T]
        scores = scores - jnp.max(scores, axis=-1, keepdims=True)
        w = jnp.exp(scores)
        inv = pl.reciprocal(jnp.sum(w, axis=-1, keepdims=True), approx=True)
        attn = w * inv                                                  # softmax over T
        context = jnp.sum(attn[:, :, None] * enc, axis=1)               # [bb, Hp] f32

        # ---- pre_linear (context half; pose half hoisted) + folded BN + ReLU -------
        x_rnn = jnp.maximum(
            dec_pre
            + jnp.dot(context.astype(cdt), wp_c, preferred_element_type=jnp.float32)
            + b_pre, 0.0)

        # ---- 2-layer GRU ------------------------------------------------------------
        h1n = gru_cell(x_rnn, h1, wih1, whh1, bih1, bhh1)
        h2n = gru_cell(h1n, h2, wih2, whh2, bih2, bhh2)

        # ---- output projection ------------------------------------------------------
        out = jnp.dot(h2n.astype(cdt), w_o, preferred_element_type=jnp.float32) + b_o
        out_ref[s] = out
        return (h1n, h2n, out)

    zeros_h = jnp.zeros((block_b, Hp), jnp.float32)   # decoder_hidden = zeros([2,B,H])
    zeros_p = jnp.zeros((block_b, Pp), jnp.float32)   # fed-back pose (unused at s=0)
    lax.fori_loop(0, N_STEPS, step, (zeros_h, zeros_h, zeros_p))


# ----------------------------------------------------------------------------------
# wrapper
# ----------------------------------------------------------------------------------
def pose_decoder2_forward(x, encoder_outputs, params, *, n_pre_poses,
                          teacher_forcing=True, batch_block=None,
                          weights_dtype=jnp.bfloat16):
    """x: [B, S, P] (S >= 40), encoder_outputs: [B, T, H] (T >= 40). Returns [B, 39, P]."""
    B, S, P = x.shape
    _, T, H = encoder_outputs.shape
    assert S >= 40 and T >= 40
    p = params
    cdt = weights_dtype

    Hp = _round_up(H, LANE)      # lane-dense hidden (1026 -> 1152 in production)
    Pp = _round_up(P, LANE)      # lane-dense pose dim

    poses = jnp.transpose(x, (1, 0, 2))[:40].astype(jnp.float32)     # [40, B, P] time-major
    enc_f32 = encoder_outputs.astype(jnp.float32)                    # [B, T, H]

    # Hoisted, grid-invariant encoder projection (+ attention bias folded in).
    e_enc = jnp.einsum('bth,hk->btk', enc_f32, p['wa_e']) + p['b_a'][None]   # [B, T, H]

    # Fold eval-mode BatchNorm into pre_linear; keep pose / context halves separate.
    wp_x_f = p['wp_x'] * p['bn_s']                                    # [P, H]
    wp_c_f = p['wp_c'] * p['bn_s']                                    # [H, H]
    b_pre = p['b_p'] * p['bn_s'] + p['bn_b']                          # [1, H]

    # Hoist the pose half of pre_linear out of the 39-step loop (one batched matmul).
    pose_pre = jnp.einsum('sbp,ph->sbh', poses, wp_x_f)               # [40, B, H] f32

    # ---- zero-pad to lane-dense shapes (exact: padded lanes stay zero end-to-end) --
    enc_p = _pad_last(enc_f32, Hp).astype(cdt)
    e_enc_p = _pad_last(e_enc, Hp).astype(cdt)
    pose_pre_p = _pad_last(pose_pre, Hp)                              # stays f32
    wa_h_p = _pad_axis(_pad_last(p['wa_h'], Hp), 0, Hp).astype(cdt)
    v_a_p = _pad_last(p['v_a'], Hp)                                   # f32 (VPU-only)
    wp_x_p = _pad_axis(_pad_last(wp_x_f, Hp), 0, Pp).astype(cdt)
    wp_c_p = _pad_axis(_pad_last(wp_c_f, Hp), 0, Hp).astype(cdt)
    b_pre_p = _pad_last(b_pre, Hp)                                    # f32

    def pad_gru(w_ih, w_hh, b_ih, b_hh):
        w_ih = _pad_axis(_pad_gates(w_ih, H, Hp), 0, Hp).astype(cdt)
        w_hh = _pad_axis(_pad_gates(w_hh, H, Hp), 0, Hp).astype(cdt)
        return (w_ih, w_hh, _pad_gates(b_ih, H, Hp), _pad_gates(b_hh, H, Hp))

    wih1_p, whh1_p, bih1_p, bhh1_p = pad_gru(p['wih1'], p['whh1'], p['bih1'], p['bhh1'])
    wih2_p, whh2_p, bih2_p, bhh2_p = pad_gru(p['wih2'], p['whh2'], p['bih2'], p['bhh2'])
    w_o_p = _pad_axis(_pad_last(p['w_o'], Pp), 0, Hp).astype(cdt)
    b_o_p = _pad_last(p['b_o'], Pp)                                   # f32

    inputs = [pose_pre_p, e_enc_p, enc_p,
              wa_h_p, v_a_p, wp_x_p, wp_c_p, b_pre_p,
              wih1_p, whh1_p, bih1_p, bhh1_p,
              wih2_p, whh2_p, bih2_p, bhh2_p,
              w_o_p, b_o_p]

    # Batch tiling: block_b must equal B or be a multiple of 8 (TPU sublane rule).
    # For v7x megacore pass batch_block=B//2 (pad B to a multiple of 16 if needed).
    block_b = B if batch_block is None else batch_block
    assert B % block_b == 0 and (block_b == B or block_b % 8 == 0)
    n_btiles = B // block_b
    single_grid = (n_btiles == 1)

    def _spec(shape, index_map, single_buffer):
        if single_buffer:
            try:
                # Constant operands: no double-buffering -> halves their VMEM footprint.
                return pl.BlockSpec(shape, index_map, pipeline_mode=pl.Buffered(1))
            except TypeError:
                pass   # older jax without pipeline_mode: fall back to default buffering
        return pl.BlockSpec(shape, index_map)

    def _inv_spec(a):
        nd = a.ndim
        return _spec(a.shape, lambda i, _n=nd: (0,) * _n, True)

    in_specs = (
        [_spec((40, block_b, Hp), lambda i: (0, i, 0), single_grid),   # pose_pre
         _spec((block_b, T, Hp), lambda i: (i, 0, 0), single_grid),    # e_enc (hoisted)
         _spec((block_b, T, Hp), lambda i: (i, 0, 0), single_grid)]    # enc
        + [_inv_spec(w) for w in inputs[3:]]                           # weights / biases
    )

    kernel = functools.partial(_decoder_kernel, bool(teacher_forcing),
                               int(n_pre_poses), Hp)

    out = pl.pallas_call(
        kernel,
        out_shape=jax.ShapeDtypeStruct((N_STEPS, B, Pp), jnp.float32),
        grid=(n_btiles,),
        in_specs=in_specs,
        # Lane-dense output slab, resident per batch tile, written back once.
        out_specs=pl.BlockSpec((N_STEPS, block_b, Pp), lambda i: (0, i, 0)),
        compiler_params=pltpu.CompilerParams(
            dimension_semantics=("parallel",),        # batch tiles -> v7x megacore
            vmem_limit_bytes=_vmem_limit_bytes(),
        ),
    )(*inputs)

    return jnp.transpose(out[..., :P], (1, 0, 2))     # [B, 39, P]


# ----------------------------------------------------------------------------------
# pure-JAX reference (mirrors the PyTorch forward, unoptimized, f32)
# ----------------------------------------------------------------------------------
def _gru_cell_ref(x, h, w_ih, w_hh, b_ih, b_hh, H):
    gi = x @ w_ih + b_ih
    gh = h @ w_hh + b_hh
    r = jax.nn.sigmoid(gi[:, 0:H] + gh[:, 0:H])
    z = jax.nn.sigmoid(gi[:, H:2 * H] + gh[:, H:2 * H])
    n = jnp.tanh(gi[:, 2 * H:3 * H] + r * gh[:, 2 * H:3 * H])
    return (1.0 - z) * n + z * h


def reference_forward(x, encoder_outputs, params, *, n_pre_poses, teacher_forcing=True):
    p = params
    poses = jnp.transpose(x, (1, 0, 2)).astype(jnp.float32)
    enc = encoder_outputs.astype(jnp.float32)
    B, T, H = enc.shape
    hidden = jnp.zeros((2, B, H), jnp.float32)
    dec_in = poses[0]
    outs = []
    for t in range(1, 40):
        h_top = hidden[1]
        e_enc = jnp.einsum('bth,hk->btk', enc, p['wa_e'])
        e_hid = h_top @ p['wa_h']
        energy = jnp.tanh(e_enc + e_hid[:, None, :] + p['b_a'][None])
        scores = jnp.sum(energy * p['v_a'][None], axis=-1)
        attn = jax.nn.softmax(scores, axis=-1)
        context = jnp.einsum('bt,bth->bh', attn, enc)
        x_pre = dec_in @ p['wp_x'] + context @ p['wp_c'] + p['b_p']
        x_rnn = jnp.maximum(x_pre * p['bn_s'] + p['bn_b'], 0.0)
        h1 = _gru_cell_ref(x_rnn, hidden[0], p['wih1'], p['whh1'], p['bih1'], p['bhh1'], H)
        h2 = _gru_cell_ref(h1, hidden[1], p['wih2'], p['whh2'], p['bih2'], p['bhh2'], H)
        hidden = jnp.stack([h1, h2], axis=0)
        out = h2 @ p['w_o'] + p['b_o']
        outs.append(out)
        if teacher_forcing or t < n_pre_poses:
            dec_in = poses[t]
        else:
            dec_in = out
    return jnp.transpose(jnp.stack(outs, axis=0), (1, 0, 2))


def init_params(key, pose_dim, hidden, bn_eps=1e-5):
    """Deterministic synthetic weights with the shapes the decoder implies."""
    H, P = hidden, pose_dim
    ks = jax.random.split(key, 16)

    def mat(k, shape, fan_in):
        return jax.random.normal(k, shape, jnp.float32) / np.sqrt(float(fan_in))

    return dict(
        wa_h=mat(ks[0], (H, H), 2 * H),
        wa_e=mat(ks[1], (H, H), 2 * H),
        b_a=jnp.zeros((1, H), jnp.float32),
        v_a=mat(ks[2], (1, H), H),
        wp_x=mat(ks[3], (P, H), P + H),
        wp_c=mat(ks[4], (H, H), P + H),
        b_p=mat(ks[5], (1, H), P + H),
        bn_s=jnp.full((1, H), 1.0 / np.sqrt(1.0 + bn_eps), jnp.float32),
        bn_b=jnp.zeros((1, H), jnp.float32),
        wih1=mat(ks[6], (H, 3 * H), H), whh1=mat(ks[7], (H, 3 * H), H),
        bih1=mat(ks[8], (1, 3 * H), H), bhh1=mat(ks[9], (1, 3 * H), H),
        wih2=mat(ks[10], (H, 3 * H), H), whh2=mat(ks[11], (H, 3 * H), H),
        bih2=mat(ks[12], (1, 3 * H), H), bhh2=mat(ks[13], (1, 3 * H), H),
        w_o=mat(ks[14], (H, P), H),
        b_o=mat(ks[15], (1, P), H),
    )


if __name__ == "__main__":
    key = jax.random.PRNGKey(0)
    # Small shapes consistent with the forward: decoder needs >= 40 frames
    # (slices encoder_outputs[-40:-38] and reads poses[t] for t < 40).
    B, S, P = 2, 40, 16      # batch, pose-sequence length, pose_dim
    T, H = 40, 32            # encoder length, decoder hidden size (stand-in for 1026)
    n_pre_poses = 4

    kx, ke, kp = jax.random.split(key, 3)
    x = jax.random.normal(kx, (B, S, P), jnp.float32)
    encoder_outputs = jax.random.normal(ke, (B, T, H), jnp.float32)
    params = init_params(kp, P, H)

    ref_tf = reference_forward(x, encoder_outputs, params,
                               n_pre_poses=n_pre_poses, teacher_forcing=True)
    ref_ar = reference_forward(x, encoder_outputs, params,
                               n_pre_poses=n_pre_poses, teacher_forcing=False)

    # f32-weight path: tight structural check (approx-reciprocal is the only
    # non-reassociation delta vs the reference).
    out_f32 = pose_decoder2_forward(x, encoder_outputs, params, n_pre_poses=n_pre_poses,
                                    teacher_forcing=True, weights_dtype=jnp.float32)
    out_f32 = jax.block_until_ready(out_f32)
    assert out_f32.shape == (B, N_STEPS, P), out_f32.shape
    np.testing.assert_allclose(np.asarray(out_f32), np.asarray(ref_tf), rtol=5e-3, atol=5e-3)

    # bf16-weight production path (f32 accumulation / gate math): looser tolerance
    # against the full-f32 reference due to bf16 operand rounding over 39 recurrent steps.
    for tf, ref in ((True, ref_tf), (False, ref_ar)):
        out = pose_decoder2_forward(x, encoder_outputs, params, n_pre_poses=n_pre_poses,
                                    teacher_forcing=tf, weights_dtype=jnp.bfloat16)
        out = jax.block_until_ready(out)
        assert out.shape == (B, N_STEPS, P), out.shape
        np.testing.assert_allclose(np.asarray(out), np.asarray(ref), rtol=6e-2, atol=6e-2)

    print("KERNEL_OK")
</pallas_src>

<mosaic_0001>
module attributes {stable_mosaic.version = 11 : i64} {
  func.func @_decoder_kernel(%arg0: i32, %arg1: memref<40x2x128xf32, #tpu.memory_space<vmem>>, %arg2: memref<2x40x128xf32, #tpu.memory_space<vmem>>, %arg3: memref<2x40x128xf32, #tpu.memory_space<vmem>>, %arg4: memref<128x128xf32, #tpu.memory_space<vmem>>, %arg5: memref<1x128xf32, #tpu.memory_space<vmem>>, %arg6: memref<128x128xf32, #tpu.memory_space<vmem>>, %arg7: memref<128x128xf32, #tpu.memory_space<vmem>>, %arg8: memref<1x128xf32, #tpu.memory_space<vmem>>, %arg9: memref<128x384xf32, #tpu.memory_space<vmem>>, %arg10: memref<128x384xf32, #tpu.memory_space<vmem>>, %arg11: memref<1x384xf32, #tpu.memory_space<vmem>>, %arg12: memref<1x384xf32, #tpu.memory_space<vmem>>, %arg13: memref<128x384xf32, #tpu.memory_space<vmem>>, %arg14: memref<128x384xf32, #tpu.memory_space<vmem>>, %arg15: memref<1x384xf32, #tpu.memory_space<vmem>>, %arg16: memref<1x384xf32, #tpu.memory_space<vmem>>, %arg17: memref<128x128xf32, #tpu.memory_space<vmem>>, %arg18: memref<1x128xf32, #tpu.memory_space<vmem>>, %arg19: memref<39x2x128xf32, #tpu.memory_space<vmem>>) attributes {dimension_semantics = [#tpu.dimension_semantics<parallel>], iteration_bounds = array<i64: 1>, scalar_prefetch = 0 : i64, scratch_operands = 0 : i64, tpu.core_type = #tpu.core_type<tc>, window_params = [{pipeline_mode = #tpu.pipeline_mode<synchronous>, transform_indices = @transform_0, window_bounds = array<i64: 40, 2, 128>}, {pipeline_mode = #tpu.pipeline_mode<synchronous>, transform_indices = @transform_1, window_bounds = array<i64: 2, 40, 128>}, {pipeline_mode = #tpu.pipeline_mode<synchronous>, transform_indices = @transform_2, window_bounds = array<i64: 2, 40, 128>}, {pipeline_mode = #tpu.pipeline_mode<synchronous>, transform_indices = @transform_3, window_bounds = array<i64: 128, 128>}, {pipeline_mode = #tpu.pipeline_mode<synchronous>, transform_indices = @transform_4, window_bounds = array<i64: 1, 128>}, {pipeline_mode = #tpu.pipeline_mode<synchronous>, transform_indices = @transform_5, window_bounds = array<i64: 128, 128>}, {pipeline_mode = #tpu.pipeline_mode<synchronous>, transform_indices = @transform_6, window_bounds = array<i64: 128, 128>}, {pipeline_mode = #tpu.pipeline_mode<synchronous>, transform_indices = @transform_7, window_bounds = array<i64: 1, 128>}, {pipeline_mode = #tpu.pipeline_mode<synchronous>, transform_indices = @transform_8, window_bounds = array<i64: 128, 384>}, {pipeline_mode = #tpu.pipeline_mode<synchronous>, transform_indices = @transform_9, window_bounds = array<i64: 128, 384>}, {pipeline_mode = #tpu.pipeline_mode<synchronous>, transform_indices = @transform_10, window_bounds = array<i64: 1, 384>}, {pipeline_mode = #tpu.pipeline_mode<synchronous>, transform_indices = @transform_11, window_bounds = array<i64: 1, 384>}, {pipeline_mode = #tpu.pipeline_mode<synchronous>, transform_indices = @transform_12, window_bounds = array<i64: 128, 384>}, {pipeline_mode = #tpu.pipeline_mode<synchronous>, transform_indices = @transform_13, window_bounds = array<i64: 128, 384>}, {pipeline_mode = #tpu.pipeline_mode<synchronous>, transform_indices = @transform_14, window_bounds = array<i64: 1, 384>}, {pipeline_mode = #tpu.pipeline_mode<synchronous>, transform_indices = @transform_15, window_bounds = array<i64: 1, 384>}, {pipeline_mode = #tpu.pipeline_mode<synchronous>, transform_indices = @transform_16, window_bounds = array<i64: 128, 128>}, {pipeline_mode = #tpu.pipeline_mode<synchronous>, transform_indices = @transform_17, window_bounds = array<i64: 1, 128>}, {transform_indices = @transform_18, window_bounds = array<i64: 39, 2, 128>}]} {
    %c0 = arith.constant 0 : index
    %c0_0 = arith.constant 0 : index
    %c0_1 = arith.constant 0 : index
    %0 = vector.load %arg3[%c0, %c0_0, %c0_1] : memref<2x40x128xf32, #tpu.memory_space<vmem>>, vector<2x40x128xf32>
    %c0_2 = arith.constant 0 : index
    %c0_3 = arith.constant 0 : index
    %c0_4 = arith.constant 0 : index
    %1 = vector.load %arg2[%c0_2, %c0_3, %c0_4] : memref<2x40x128xf32, #tpu.memory_space<vmem>>, vector<2x40x128xf32>
    %c0_5 = arith.constant 0 : index
    %c0_6 = arith.constant 0 : index
    %2 = vector.load %arg4[%c0_5, %c0_6] : memref<128x128xf32, #tpu.memory_space<vmem>>, vector<128x128xf32>
    %c0_7 = arith.constant 0 : index
    %c0_8 = arith.constant 0 : index
    %3 = vector.load %arg5[%c0_7, %c0_8] : memref<1x128xf32, #tpu.memory_space<vmem>>, vector<1x128xf32>
    %c0_9 = arith.constant 0 : index
    %c0_10 = arith.constant 0 : index
    %4 = vector.load %arg7[%c0_9, %c0_10] : memref<128x128xf32, #tpu.memory_space<vmem>>, vector<128x128xf32>
    %c0_11 = arith.constant 0 : index
    %c0_12 = arith.constant 0 : index
    %5 = vector.load %arg8[%c0_11, %c0_12] : memref<1x128xf32, #tpu.memory_space<vmem>>, vector<1x128xf32>
    %c0_13 = arith.constant 0 : index
    %c0_14 = arith.constant 0 : index
    %6 = vector.load %arg9[%c0_13, %c0_14] : memref<128x384xf32, #tpu.memory_space<vmem>>, vector<128x384xf32>
    %c0_15 = arith.constant 0 : index
    %c0_16 = arith.constant 0 : index
    %7 = vector.load %arg10[%c0_15, %c0_16] : memref<128x384xf32, #tpu.memory_space<vmem>>, vector<128x384xf32>
    %c0_17 = arith.constant 0 : index
    %c0_18 = arith.constant 0 : index
    %8 = vector.load %arg11[%c0_17, %c0_18] : memref<1x384xf32, #tpu.memory_space<vmem>>, vector<1x384xf32>
    %c0_19 = arith.constant 0 : index
    %c0_20 = arith.constant 0 : index
    %9 = vector.load %arg12[%c0_19, %c0_20] : memref<1x384xf32, #tpu.memory_space<vmem>>, vector<1x384xf32>
    %c0_21 = arith.constant 0 : index
    %c0_22 = arith.constant 0 : index
    %10 = vector.load %arg13[%c0_21, %c0_22] : memref<128x384xf32, #tpu.memory_space<vmem>>, vector<128x384xf32>
    %c0_23 = arith.constant 0 : index
    %c0_24 = arith.constant 0 : index
    %11 = vector.load %arg14[%c0_23, %c0_24] : memref<128x384xf32, #tpu.memory_space<vmem>>, vector<128x384xf32>
    %c0_25 = arith.constant 0 : index
    %c0_26 = arith.constant 0 : index
    %12 = vector.load %arg15[%c0_25, %c0_26] : memref<1x384xf32, #tpu.memory_space<vmem>>, vector<1x384xf32>
    %c0_27 = arith.constant 0 : index
    %c0_28 = arith.constant 0 : index
    %13 = vector.load %arg16[%c0_27, %c0_28] : memref<1x384xf32, #tpu.memory_space<vmem>>, vector<1x384xf32>
    %c0_29 = arith.constant 0 : index
    %c0_30 = arith.constant 0 : index
    %14 = vector.load %arg17[%c0_29, %c0_30] : memref<128x128xf32, #tpu.memory_space<vmem>>, vector<128x128xf32>
    %c0_31 = arith.constant 0 : index
    %c0_32 = arith.constant 0 : index
    %15 = vector.load %arg18[%c0_31, %c0_32] : memref<1x128xf32, #tpu.memory_space<vmem>>, vector<1x128xf32>
    %cst = arith.constant 0.000000e+00 : f32
    %16 = vector.broadcast %cst : f32 to vector<2x128xf32>
    %c0_i32 = arith.constant 0 : i32
    %c39_i32 = arith.constant 39 : i32
    %17 = arith.addi %c0_i32, %c39_i32 : i32
    %c1_i32 = arith.constant 1 : i32
    %18:2 = scf.for %arg20 = %c0_i32 to %17 step %c1_i32 iter_args(%arg21 = %16, %arg22 = %16) -> (vector<2x128xf32>, vector<2x128xf32>)  : i32 {
      %19 = arith.index_cast %arg20 : i32 to index
      %c0_34 = arith.constant 0 : index
      %c0_35 = arith.constant 0 : index
      %20 = vector.load %arg1[%19, %c0_34, %c0_35] : memref<40x2x128xf32, #tpu.memory_space<vmem>>, vector<1x2x128xf32>
      %21 = vector.shape_cast %20 : vector<1x2x128xf32> to vector<2x128xf32>
      %cst_36 = arith.constant dense<0.000000e+00> : vector<2x128xf32>
      %22 = tpu.matmul %arg22, %2, %cst_36 {dimension_numbers = #tpu.dot_dimension_numbers<[1], [0], [0], [1], [0, 0, 1, 1], [], []>} : vector<2x128xf32>, vector<128x128xf32>, vector<2x128xf32> -> vector<2x128xf32>
      %23 = vector.shape_cast %22 : vector<2x128xf32> to vector<2x1x128xf32>
      %24 = vector.broadcast %23 : vector<2x1x128xf32> to vector<2x40x128xf32>
      %25 = arith.addf %1, %24 : vector<2x40x128xf32>
      %26 = math.tanh %25 : vector<2x40x128xf32>
      %27 = vector.shape_cast %3 : vector<1x128xf32> to vector<1x1x128xf32>
      %28 = vector.broadcast %27 : vector<1x1x128xf32> to vector<2x40x128xf32>
      %29 = arith.mulf %26, %28 : vector<2x40x128xf32>
      %cst_37 = arith.constant dense<0.000000e+00> : vector<2x40xf32>
      %30 = vector.multi_reduction <add>, %29, %cst_37 [2] : vector<2x40x128xf32> to vector<2x40xf32>
      %cst_38 = arith.constant dense<0xFF800000> : vector<2xf32>
      %31 = vector.multi_reduction <maximumf>, %30, %cst_38 [1] : vector<2x40xf32> to vector<2xf32>
      %32 = vector.shape_cast %31 : vector<2xf32> to vector<2x1xf32>
      %33 = vector.broadcast %32 : vector<2x1xf32> to vector<2x40xf32>
      %34 = arith.subf %30, %33 : vector<2x40xf32>
      %35 = math.exp %34 : vector<2x40xf32>
      %cst_39 = arith.constant dense<0.000000e+00> : vector<2xf32>
      %36 = vector.multi_reduction <add>, %35, %cst_39 [1] : vector<2x40xf32> to vector<2xf32>
      %37 = vector.shape_cast %36 : vector<2xf32> to vector<2x1xf32>
      %38 = tpu.reciprocal %37 {approx = true} : vector<2x1xf32> -> vector<2x1xf32>
      %39 = vector.broadcast %38 : vector<2x1xf32> to vector<2x40xf32>
      %40 = arith.mulf %35, %39 : vector<2x40xf32>
      %41 = vector.shape_cast %40 : vector<2x40xf32> to vector<2x40x1xf32>
      %42 = vector.broadcast %41 : vector<2x40x1xf32> to vector<2x40x128xf32>
      %43 = arith.mulf %42, %0 : vector<2x40x128xf32>
      %cst_40 = arith.constant dense<0.000000e+00> : vector<2x128xf32>
      %44 = vector.multi_reduction <add>, %43, %cst_40 [1] : vector<2x40x128xf32> to vector<2x128xf32>
      %cst_41 = arith.constant dense<0.000000e+00> : vector<2x128xf32>
      %45 = tpu.matmul %44, %4, %cst_41 {dimension_numbers = #tpu.dot_dimension_numbers<[1], [0], [0], [1], [0, 0, 1, 1], [], []>} : vector<2x128xf32>, vector<128x128xf32>, vector<2x128xf32> -> vector<2x128xf32>
      %46 = arith.addf %21, %45 : vector<2x128xf32>
      %47 = vector.broadcast %5 : vector<1x128xf32> to vector<2x128xf32>
      %48 = arith.addf %46, %47 : vector<2x128xf32>
      %cst_42 = arith.constant 0.000000e+00 : f32
      %49 = vector.broadcast %cst_42 : f32 to vector<2x128xf32>
      %50 = arith.maximumf %48, %49 : vector<2x128xf32>
      %cst_43 = arith.constant dense<0.000000e+00> : vector<2x384xf32>
      %51 = tpu.matmul %50, %6, %cst_43 {dimension_numbers = #tpu.dot_dimension_numbers<[1], [0], [0], [1], [0, 0, 1, 1], [], []>} : vector<2x128xf32>, vector<128x384xf32>, vector<2x384xf32> -> vector<2x384xf32>
      %52 = vector.broadcast %8 : vector<1x384xf32> to vector<2x384xf32>
      %53 = arith.addf %51, %52 : vector<2x384xf32>
      %cst_44 = arith.constant dense<0.000000e+00> : vector<2x384xf32>
      %54 = tpu.matmul %arg21, %7, %cst_44 {dimension_numbers = #tpu.dot_dimension_numbers<[1], [0], [0], [1], [0, 0, 1, 1], [], []>} : vector<2x128xf32>, vector<128x384xf32>, vector<2x384xf32> -> vector<2x384xf32>
      %55 = vector.broadcast %9 : vector<1x384xf32> to vector<2x384xf32>
      %56 = arith.addf %54, %55 : vector<2x384xf32>
      %57 = vector.extract_strided_slice %53 {offsets = [0, 0], sizes = [2, 128], strides = [1, 1]} : vector<2x384xf32> to vector<2x128xf32>
      %58 = vector.extract_strided_slice %56 {offsets = [0, 0], sizes = [2, 128], strides = [1, 1]} : vector<2x384xf32> to vector<2x128xf32>
      %59 = arith.addf %57, %58 : vector<2x128xf32>
      %60 = arith.negf %59 : vector<2x128xf32>
      %61 = math.exp %60 : vector<2x128xf32>
      %cst_45 = arith.constant 1.000000e+00 : f32
      %62 = vector.broadcast %cst_45 : f32 to vector<2x128xf32>
      %63 = arith.addf %62, %61 : vector<2x128xf32>
      %64 = arith.divf %62, %63 : vector<2x128xf32>
      %65 = vector.extract_strided_slice %53 {offsets = [0, 128], sizes = [2, 128], strides = [1, 1]} : vector<2x384xf32> to vector<2x128xf32>
      %66 = vector.extract_strided_slice %56 {offsets = [0, 128], sizes = [2, 128], strides = [1, 1]} : vector<2x384xf32> to vector<2x128xf32>
      %67 = arith.addf %65, %66 : vector<2x128xf32>
      %68 = arith.negf %67 : vector<2x128xf32>
      %69 = math.exp %68 : vector<2x128xf32>
      %cst_46 = arith.constant 1.000000e+00 : f32
      %70 = vector.broadcast %cst_46 : f32 to vector<2x128xf32>
      %71 = arith.addf %70, %69 : vector<2x128xf32>
      %72 = arith.divf %70, %71 : vector<2x128xf32>
      %73 = vector.extract_strided_slice %53 {offsets = [0, 256], sizes = [2, 128], strides = [1, 1]} : vector<2x384xf32> to vector<2x128xf32>
      %74 = vector.extract_strided_slice %56 {offsets = [0, 256], sizes = [2, 128], strides = [1, 1]} : vector<2x384xf32> to vector<2x128xf32>
      %75 = arith.mulf %64, %74 : vector<2x128xf32>
      %76 = arith.addf %73, %75 : vector<2x128xf32>
      %77 = math.tanh %76 : vector<2x128xf32>
      %cst_47 = arith.constant 1.000000e+00 : f32
      %78 = vector.broadcast %cst_47 : f32 to vector<2x128xf32>
      %79 = arith.subf %78, %72 : vector<2x128xf32>
      %80 = arith.mulf %79, %77 : vector<2x128xf32>
      %81 = arith.mulf %72, %arg21 : vector<2x128xf32>
      %82 = arith.addf %80, %81 : vector<2x128xf32>
      %cst_48 = arith.constant dense<0.000000e+00> : vector<2x384xf32>
      %83 = tpu.matmul %82, %10, %cst_48 {dimension_numbers = #tpu.dot_dimension_numbers<[1], [0], [0], [1], [0, 0, 1, 1], [], []>} : vector<2x128xf32>, vector<128x384xf32>, vector<2x384xf32> -> vector<2x384xf32>
      %84 = vector.broadcast %12 : vector<1x384xf32> to vector<2x384xf32>
      %85 = arith.addf %83, %84 : vector<2x384xf32>
      %cst_49 = arith.constant dense<0.000000e+00> : vector<2x384xf32>
      %86 = tpu.matmul %arg22, %11, %cst_49 {dimension_numbers = #tpu.dot_dimension_numbers<[1], [0], [0], [1], [0, 0, 1, 1], [], []>} : vector<2x128xf32>, vector<128x384xf32>, vector<2x384xf32> -> vector<2x384xf32>
      %87 = vector.broadcast %13 : vector<1x384xf32> to vector<2x384xf32>
      %88 = arith.addf %86, %87 : vector<2x384xf32>
      %89 = vector.extract_strided_slice %85 {offsets = [0, 0], sizes = [2, 128], strides = [1, 1]} : vector<2x384xf32> to vector<2x128xf32>
      %90 = vector.extract_strided_slice %88 {offsets = [0, 0], sizes = [2, 128], strides = [1, 1]} : vector<2x384xf32> to vector<2x128xf32>
      %91 = arith.addf %89, %90 : vector<2x128xf32>
      %92 = arith.negf %91 : vector<2x128xf32>
      %93 = math.exp %92 : vector<2x128xf32>
      %cst_50 = arith.constant 1.000000e+00 : f32
      %94 = vector.broadcast %cst_50 : f32 to vector<2x128xf32>
      %95 = arith.addf %94, %93 : vector<2x128xf32>
      %96 = arith.divf %94, %95 : vector<2x128xf32>
      %97 = vector.extract_strided_slice %85 {offsets = [0, 128], sizes = [2, 128], strides = [1, 1]} : vector<2x384xf32> to vector<2x128xf32>
      %98 = vector.extract_strided_slice %88 {offsets = [0, 128], sizes = [2, 128], strides = [1, 1]} : vector<2x384xf32> to vector<2x128xf32>
      %99 = arith.addf %97, %98 : vector<2x128xf32>
      %100 = arith.negf %99 : vector<2x128xf32>
      %101 = math.exp %100 : vector<2x128xf32>
      %cst_51 = arith.constant 1.000000e+00 : f32
      %102 = vector.broadcast %cst_51 : f32 to vector<2x128xf32>
      %103 = arith.addf %102, %101 : vector<2x128xf32>
      %104 = arith.divf %102, %103 : vector<2x128xf32>
      %105 = vector.extract_strided_slice %85 {offsets = [0, 256], sizes = [2, 128], strides = [1, 1]} : vector<2x384xf32> to vector<2x128xf32>
      %106 = vector.extract_strided_slice %88 {offsets = [0, 256], sizes = [2, 128], strides = [1, 1]} : vector<2x384xf32> to vector<2x128xf32>
      %107 = arith.mulf %96, %106 : vector<2x128xf32>
      %108 = arith.addf %105, %107 : vector<2x128xf32>
      %109 = math.tanh %108 : vector<2x128xf32>
      %cst_52 = arith.constant 1.000000e+00 : f32
      %110 = vector.broadcast %cst_52 : f32 to vector<2x128xf32>
      %111 = arith.subf %110, %104 : vector<2x128xf32>
      %112 = arith.mulf %111, %109 : vector<2x128xf32>
      %113 = arith.mulf %104, %arg22 : vector<2x128xf32>
      %114 = arith.addf %112, %113 : vector<2x128xf32>
      %cst_53 = arith.constant dense<0.000000e+00> : vector<2x128xf32>
      %115 = tpu.matmul %114, %14, %cst_53 {dimension_numbers = #tpu.dot_dimension_numbers<[1], [0], [0], [1], [0, 0, 1, 1], [], []>} : vector<2x128xf32>, vector<128x128xf32>, vector<2x128xf32> -> vector<2x128xf32>
      %116 = vector.broadcast %15 : vector<1x128xf32> to vector<2x128xf32>
      %117 = arith.addf %115, %116 : vector<2x128xf32>
      %118 = arith.index_cast %arg20 : i32 to index
      %c0_54 = arith.constant 0 : index
      %c0_55 = arith.constant 0 : index
      %119 = vector.load %arg19[%118, %c0_54, %c0_55] : memref<39x2x128xf32, #tpu.memory_space<vmem>>, vector<1x2x128xf32>
      %120 = vector.shape_cast %119 : vector<1x2x128xf32> to vector<2x128xf32>
      %121 = vector.shape_cast %117 : vector<2x128xf32> to vector<1x2x128xf32>
      tpu.vector_store %arg19[%118, %c0_54, %c0_55], %121 {strides = array<i32>} : memref<39x2x128xf32, #tpu.memory_space<vmem>>, vector<1x2x128xf32>,
      scf.yield %82, %114 : vector<2x128xf32>, vector<2x128xf32>
    }
    %c39_i32_33 = arith.constant 39 : i32
    return
  }
  func.func @transform_0(%arg0: i32) -> (i32, i32, i32) {
    %c0_i32 = arith.constant 0 : i32
    %c0_i32_0 = arith.constant 0 : i32
    %c0_i32_1 = arith.constant 0 : i32
    return %c0_i32, %arg0, %c0_i32_0 : i32, i32, i32
  }
  func.func @transform_1(%arg0: i32) -> (i32, i32, i32) {
    %c0_i32 = arith.constant 0 : i32
    %c0_i32_0 = arith.constant 0 : i32
    %c0_i32_1 = arith.constant 0 : i32
    return %arg0, %c0_i32, %c0_i32_0 : i32, i32, i32
  }
  func.func @transform_2(%arg0: i32) -> (i32, i32, i32) {
    %c0_i32 = arith.constant 0 : i32
    %c0_i32_0 = arith.constant 0 : i32
    %c0_i32_1 = arith.constant 0 : i32
    return %arg0, %c0_i32, %c0_i32_0 : i32, i32, i32
  }
  func.func @transform_3(%arg0: i32) -> (i32, i32) {
    %c0_i32 = arith.constant 0 : i32
    %c0_i32_0 = arith.constant 0 : i32
    %c0_i32_1 = arith.constant 0 : i32
    return %c0_i32, %c0_i32_0 : i32, i32
  }
  func.func @transform_4(%arg0: i32) -> (i32, i32) {
    %c0_i32 = arith.constant 0 : i32
    %c0_i32_0 = arith.constant 0 : i32
    %c0_i32_1 = arith.constant 0 : i32
    return %c0_i32, %c0_i32_0 : i32, i32
  }
  func.func @transform_5(%arg0: i32) -> (i32, i32) {
    %c0_i32 = arith.constant 0 : i32
    %c0_i32_0 = arith.constant 0 : i32
    %c0_i32_1 = arith.constant 0 : i32
    return %c0_i32, %c0_i32_0 : i32, i32
  }
  func.func @transform_6(%arg0: i32) -> (i32, i32) {
    %c0_i32 = arith.constant 0 : i32
    %c0_i32_0 = arith.constant 0 : i32
    %c0_i32_1 = arith.constant 0 : i32
    return %c0_i32, %c0_i32_0 : i32, i32
  }
  func.func @transform_7(%arg0: i32) -> (i32, i32) {
    %c0_i32 = arith.constant 0 : i32
    %c0_i32_0 = arith.constant 0 : i32
    %c0_i32_1 = arith.constant 0 : i32
    return %c0_i32, %c0_i32_0 : i32, i32
  }
  func.func @transform_8(%arg0: i32) -> (i32, i32) {
    %c0_i32 = arith.constant 0 : i32
    %c0_i32_0 = arith.constant 0 : i32
    %c0_i32_1 = arith.constant 0 : i32
    return %c0_i32, %c0_i32_0 : i32, i32
  }
  func.func @transform_9(%arg0: i32) -> (i32, i32) {
    %c0_i32 = arith.constant 0 : i32
    %c0_i32_0 = arith.constant 0 : i32
    %c0_i32_1 = arith.constant 0 : i32
    return %c0_i32, %c0_i32_0 : i32, i32
  }
  func.func @transform_10(%arg0: i32) -> (i32, i32) {
    %c0_i32 = arith.constant 0 : i32
    %c0_i32_0 = arith.constant 0 : i32
    %c0_i32_1 = arith.constant 0 : i32
    return %c0_i32, %c0_i32_0 : i32, i32
  }
  func.func @transform_11(%arg0: i32) -> (i32, i32) {
    %c0_i32 = arith.constant 0 : i32
    %c0_i32_0 = arith.constant 0 : i32
    %c0_i32_1 = arith.constant 0 : i32
    return %c0_i32, %c0_i32_0 : i32, i32
  }
  func.func @transform_12(%arg0: i32) -> (i32, i32) {
    %c0_i32 = arith.constant 0 : i32
    %c0_i32_0 = arith.constant 0 : i32
    %c0_i32_1 = arith.constant 0 : i32
    return %c0_i32, %c0_i32_0 : i32, i32
  }
  func.func @transform_13(%arg0: i32) -> (i32, i32) {
    %c0_i32 = arith.constant 0 : i32
    %c0_i32_0 = arith.constant 0 : i32
    %c0_i32_1 = arith.constant 0 : i32
    return %c0_i32, %c0_i32_0 : i32, i32
  }
  func.func @transform_14(%arg0: i32) -> (i32, i32) {
    %c0_i32 = arith.constant 0 : i32
    %c0_i32_0 = arith.constant 0 : i32
    %c0_i32_1 = arith.constant 0 : i32
    return %c0_i32, %c0_i32_0 : i32, i32
  }
  func.func @transform_15(%arg0: i32) -> (i32, i32) {
    %c0_i32 = arith.constant 0 : i32
    %c0_i32_0 = arith.constant 0 : i32
    %c0_i32_1 = arith.constant 0 : i32
    return %c0_i32, %c0_i32_0 : i32, i32
  }
  func.func @transform_16(%arg0: i32) -> (i32, i32) {
    %c0_i32 = arith.constant 0 : i32
    %c0_i32_0 = arith.constant 0 : i32
    %c0_i32_1 = arith.constant 0 : i32
    return %c0_i32, %c0_i32_0 : i32, i32
  }
  func.func @transform_17(%arg0: i32) -> (i32, i32) {
    %c0_i32 = arith.constant 0 : i32
    %c0_i32_0 = arith.constant 0 : i32
    %c0_i32_1 = arith.constant 0 : i32
    return %c0_i32, %c0_i32_0 : i32, i32
  }
  func.func @transform_18(%arg0: i32) -> (i32, i32, i32) {
    %c0_i32 = arith.constant 0 : i32
    %c0_i32_0 = arith.constant 0 : i32
    %c0_i32_1 = arith.constant 0 : i32
    return %c0_i32, %arg0, %c0_i32_0 : i32, i32, i32
  }
}

</mosaic_0001>

<bundles_post_ra>
// kernel: tpu_custom_call.1
= control target key start
LH: loop header
LB: loop body
LE: loop exit
PB: predicated region body
PF: predicated region fallthrough
CT: control target
= control target key end

     0   :  { %s3960_s0 = inlined_call_operand.hbm [shape: f32[40,2,128], index: 0, kind: input, shape index: {}]   ;;  %s3961_s1 = inlined_call_operand.hbm [shape: f32[2,40,128], index: 1, kind: input, shape index: {}]   ;;  %s3962_s2 = inlined_call_operand.hbm [shape: f32[2,40,128], index: 2, kind: input, shape index: {}]   ;;  %s3963_s3 = inlined_call_operand.hbm [shape: f32[128,128], index: 3, kind: input, shape index: {}]   ;;  %s3964_s4 = inlined_call_operand.hbm [shape: f32[1,128], index: 4, kind: input, shape index: {}]   ;;  %s3965_s5 = inlined_call_operand.hbm [shape: f32[128,128], index: 5, kind: input, shape index: {}]   ;;  %s3966_s6 = inlined_call_operand.hbm [shape: f32[128,128], index: 6, kind: input, shape index: {}]   ;;  %s3967_s7 = inlined_call_operand.hbm [shape: f32[1,128], index: 7, kind: input, shape index: {}]   ;;  %s3968_s8 = inlined_call_operand.hbm [shape: f32[128,384], index: 8, kind: input, shape index: {}]   ;;  %s3969_s9 = inlined_call_operand.hbm [shape: f32[128,384], index: 9, kind: input, shape index: {}]   ;;  %s3970_s10 = inlined_call_operand.vmem [shape: f32[1,384], index: 10, kind: input, shape index: {}]   ;;  %s3971_s11 = inlined_call_operand.vmem [shape: f32[1,384], index: 11, kind: input, shape index: {}]   ;;  %s3972_s12 = inlined_call_operand.hbm [shape: f32[128,384], index: 12, kind: input, shape index: {}]   ;;  %s3973_s13 = inlined_call_operand.hbm [shape: f32[128,384], index: 13, kind: input, shape index: {}]   ;;  %s3974_s14 = inlined_call_operand.vmem [shape: f32[1,384], index: 14, kind: input, shape index: {}]   ;;  %s3975_s15 = inlined_call_operand.vmem [shape: f32[1,384], index: 15, kind: input, shape index: {}]   ;;  %s3976_s16 = inlined_call_operand.hbm [shape: f32[128,128], index: 16, kind: input, shape index: {}]   ;;  %s3977_s17 = inlined_call_operand.vmem [shape: f32[1,128], index: 17, kind: input, shape index: {}]   ;;  %s3978_s18 = inlined_call_operand.hbm [shape: f32[39,2,128], index: 18, kind: output, shape index: {}]  }
   0x1   :  { %3988 = sst [smem:[#allocation274_spill]] %s3960_s0 }
   0x2   :  { %3989 = sst [smem:[#allocation275_spill]] %s3961_s1 }
   0x3   :  { %3990 = sst [smem:[#allocation276_spill]] %s3962_s2 }
   0x4   :  { %23 = vsyncpa [#allocation3], 0 }
   0x5   :  { %24 = vsyncpa [#allocation6], 0 }
   0x6   :  { %25 = vsyncpa [#allocation9], 0 }
   0x7   :  { %26 = vsyncpa [#allocation12], 0 }
   0x8   :  { %27 = vsyncpa [#allocation15], 0 }
   0x9   :  { %28 = vsyncpa [#allocation18], 0 }
   0xa   :  { %29 = vsyncpa [#allocation21], 0 }
   0xb   :  { %30 = vsyncpa [#allocation4], 0  ;;  %s2653_s27 = smov [#allocation5]  }
   0xc   :  { %s48_s28 = sshll.u32 %s2653_s27, 4  ;;  %s49_s28 = int_to_ptr.vmem [resolvable:$true] %s48_s28 }
   0xd   :  { %s2341_s29 = scalar_lea.vmem %s49_s28, 1280  ;;  %p2346_p1 = scmp.lt.s32.totalorder %s49_s28, %s49_s28 }
   0xe   :  { %p2342_p0 = scmp.ne.s32.totalorder %s49_s28, %s2341_s29  ;;  %p2347_p2 = scmp.lt.s32.totalorder %s2341_s29, %s2341_s29 }
  0x10   :  { %p2348_p3 = por %p2347_p2, %p2346_p1 }
  0x12   :  { %p2349_p4 = pnand %p2348_p3, %p2342_p0 }
  0x14   :  { %2352 = shalt.err (!%p2349_p4)
}
  0x15   :  { %s2654_s30 = smov 128   ;;  %s2655_s0 = smov 8  }
  0x16   :  { %s3991_s20 = sld [smem:[#allocation275_spill]]  ;;  %s2656_s21 = smov [#allocation8]  }
  0x17   :  { %s72_s22 = sshll.u32 %s2656_s21, 4  ;;  %s2657_s2 = smov [#allocation11]   ;;  %s73_s22 = int_to_ptr.vmem [resolvable:$true] %s72_s22 }
  0x18   :  { %s94_s23 = sshll.u32 %s2657_s2, 4  ;;  %s2361_s24 = scalar_lea.vmem %s73_s22, 2048  ;;  %s95_s23 = int_to_ptr.vmem [resolvable:$true] %s94_s23 }
  0x19   :  { %p2362_p5 = scmp.ne.s32.totalorder %s73_s22, %s2361_s24  ;;  %p2366_p6 = scmp.lt.s32.totalorder %s73_s22, %s73_s22 }
  0x1a   :  { %p2367_p7 = scmp.lt.s32.totalorder %s2361_s24, %s2361_s24 }
  0x1c   :  { %54 = dma.hbm_to_vmem [thread:$0]  %s3991_s20, 1280, %s49_s28, [#allocation6], %s2654_s30, %s2654_s30, %s2655_s0  }
  0x1d   :  { %p2368_p8 = por %p2367_p7, %p2366_p6 }
  0x1f   :  { %p2369_p9 = pnand %p2368_p8, %p2362_p5 }
  0x21   :  { %2372 = shalt.err (!%p2369_p9)
}
  0x22   :  { %78 = dma.hbm_to_vmem [thread:$0]  %s3963_s3, 2048, %s73_s22, [#allocation9], %s2654_s30, %s2654_s30, %s2655_s0  }
  0x23   :  { %s2381_s27 = scalar_lea.vmem %s95_s23, 2048  ;;  %p2386_p11 = scmp.lt.s32.totalorder %s95_s23, %s95_s23 }
  0x24   :  { %p2382_p10 = scmp.ne.s32.totalorder %s95_s23, %s2381_s27  ;;  %p2387_p12 = scmp.lt.s32.totalorder %s2381_s27, %s2381_s27 }
  0x26   :  { %p2388_p13 = por %p2387_p12, %p2386_p11 }
  0x28   :  { %p2389_p0 = pnand %p2388_p13, %p2382_p10 }
  0x2a   :  { %2392 = shalt.err (!%p2389_p0)
}
  0x2b   :  { %100 = dma.hbm_to_vmem [thread:$0]  %s3965_s5, 2048, %s95_s23, [#allocation12], %s2654_s30, %s2654_s30, %s2655_s0  }
  0x2c   :  { %s2658_s19 = smov [#allocation14]  }
  0x2d   :  { %s119_s1 = sshll.u32 %s2658_s19, 4  ;;  %s120_s1 = int_to_ptr.vmem [resolvable:$true] %s119_s1 }
  0x2e   :  { %s2401_s20 = scalar_lea.vmem %s120_s1, 16  ;;  %s2405_s3 = scalar_lea.vmem %s120_s1, 32 }
  0x2f   :  { %p2402_p1 = scmp.ne.s32.totalorder %s120_s1, %s2401_s20  ;;  %p2406_p2 = scmp.lt.s32.totalorder %s120_s1, %s120_s1 }
  0x30   :  { %p2407_p3 = scmp.lt.s32.totalorder %s2405_s3, %s2401_s20 }
  0x32   :  { %p2408_p4 = por %p2407_p3, %p2406_p2 }
  0x34   :  { %p2409_p5 = pnand %p2408_p4, %p2402_p1 }
  0x36   :  { %2412 = shalt.err (!%p2409_p5)
}
  0x37   :  { %122 = dma.hbm_to_vmem [thread:$0]  %s3967_s7, 16, %s120_s1, [#allocation15]  }
  0x38   :  { %s2659_s2 = smov [#allocation17]   ;;  %s2660_s25 = smov [#allocation20]  }
  0x39   :  { %s140_s24 = sshll.u32 %s2659_s2, 4  ;;  %s168_s26 = sshll.u32 %s2660_s25, 4  ;;  %s141_s24 = int_to_ptr.vmem [resolvable:$true] %s140_s24  ;;  %s169_s26 = int_to_ptr.vmem [resolvable:$true] %s168_s26 }
  0x3a   :  { %s2421_s5 = scalar_lea.vmem %s141_s24, 6144  ;;  %p2426_p7 = scmp.lt.s32.totalorder %s141_s24, %s141_s24 }
  0x3b   :  { %p2422_p6 = scmp.ne.s32.totalorder %s141_s24, %s2421_s5  ;;  %p2427_p8 = scmp.lt.s32.totalorder %s2421_s5, %s2421_s5 }
  0x3d   :  { %p2428_p9 = por %p2427_p8, %p2426_p7 }
  0x3f   :  { %p2429_p10 = pnand %p2428_p9, %p2422_p6 }
  0x41   :  { %2432 = shalt.err (!%p2429_p10)
}
  0x42   :  { %s2661_s23 = smov 384   ;;  %s2662_s27 = smov 24  }
  0x43   :  { %146 = dma.hbm_to_vmem [thread:$0]  %s3969_s9, 6144, %s141_s24, [#allocation18], %s2661_s23, %s2661_s23, %s2662_s27  }
  0x44   :  { %s2441_s29 = scalar_lea.vmem %s169_s26, 6144  ;;  %p2446_p12 = scmp.lt.s32.totalorder %s169_s26, %s169_s26 }
  0x45   :  { %p2442_p11 = scmp.ne.s32.totalorder %s169_s26, %s2441_s29  ;;  %p2447_p13 = scmp.lt.s32.totalorder %s2441_s29, %s2441_s29 }
  0x47   :  { %p2448_p0 = por %p2447_p13, %p2446_p12 }
  0x49   :  { %p2449_p1 = pnand %p2448_p0, %p2442_p11 }
  0x4b   :  { %2452 = shalt.err (!%p2449_p1)
}
  0x4c   :  { %174 = dma.hbm_to_vmem [thread:$0]  %s3973_s13, 6144, %s169_s26, [#allocation21], %s2661_s23, %s2661_s23, %s2662_s27  }
  0x4d   :  { %s2663_s20 = smov [#allocation2]  }
  0x4e   :  { %s36_s3 = sshll.u32 %s2663_s20, 4  ;;  %s37_s3 = int_to_ptr.vmem [resolvable:$true] %s36_s3 }
  0x4f   :  { %s2461_s21 = scalar_lea.vmem %s37_s3, 1280  ;;  %p2466_p3 = scmp.lt.s32.totalorder %s37_s3, %s37_s3 }
  0x50   :  { %p2462_p2 = scmp.ne.s32.totalorder %s37_s3, %s2461_s21  ;;  %p2467_p4 = scmp.lt.s32.totalorder %s2461_s21, %s2461_s21 }
  0x52   :  { %p2468_p5 = por %p2467_p4, %p2466_p3 }
  0x54   :  { %p2469_p6 = pnand %p2468_p5, %p2462_p2 }
  0x56   :  { %2472 = shalt.err (!%p2469_p6)
}
  0x57   :  { %s2664_s9 = smov 32   ;;  %s2665_s22 = smov 2  }
  0x58   :  { %s3992_s25 = sld [smem:[#allocation274_spill]]  ;;  %s2666_s13 = smov [#allocation7]  }
  0x59   :  { %s60_s26 = sshll.u32 %s2666_s13, 4  ;;  %s2667_s5 = smov [#allocation10]   ;;  %s61_s26 = int_to_ptr.vmem [resolvable:$true] %s60_s26 }
  0x5a   :  { %s85_s28 = sshll.u32 %s2667_s5, 4  ;;  %s2481_s7 = scalar_lea.vmem %s61_s26, 1280  ;;  %s86_s28 = int_to_ptr.vmem [resolvable:$true] %s85_s28 }
  0x5b   :  { %p2482_p7 = scmp.ne.s32.totalorder %s61_s26, %s2481_s7  ;;  %p2486_p8 = scmp.lt.s32.totalorder %s61_s26, %s61_s26 }
  0x5c   :  { %p2487_p9 = scmp.lt.s32.totalorder %s2481_s7, %s2481_s7 }
  0x5e   :  { %42 = dma.hbm_to_vmem [thread:$0]  %s3992_s25, 1280, %s37_s3, [#allocation3], %s2664_s9, %s2664_s9, %s2665_s22  }
  0x5f   :  { %p2488_p10 = por %p2487_p9, %p2486_p8 }
  0x61   :  { %p2489_p11 = pnand %p2488_p10, %p2482_p7 }
  0x63   :  { %2492 = shalt.err (!%p2489_p11)
}
  0x64   :  { %s3993_s1 = sld [smem:[#allocation276_spill]]  ;;  %s2501_s20 = scalar_lea.vmem %s86_s28, 16 }
  0x65   :  { %p2502_p12 = scmp.ne.s32.totalorder %s86_s28, %s2501_s20  ;;  %s2505_s3 = scalar_lea.vmem %s86_s28, 32 }
  0x66   :  { %p2506_p13 = scmp.lt.s32.totalorder %s86_s28, %s86_s28  ;;  %p2507_p0 = scmp.lt.s32.totalorder %s2505_s3, %s2501_s20 }
  0x68   :  { %p2508_p1 = por %p2507_p0, %p2506_p13 }
  0x6a   :  { %66 = dma.hbm_to_vmem [thread:$0]  %s3993_s1, 1280, %s61_s26, [#allocation6], %s2654_s30, %s2654_s30, %s2655_s0  }
  0x6b   :  { %p2509_p2 = pnand %p2508_p1, %p2502_p12 }
  0x6d   :  { %2512 = shalt.err (!%p2509_p2)
}
  0x6e   :  { %88 = dma.hbm_to_vmem [thread:$0]  %s3964_s4, 16, %s86_s28, [#allocation9]  }
  0x6f   :  { %s2668_s24 = smov [#allocation13]   ;;  %s2669_s13 = smov [#allocation16]  }
  0x70   :  { %s106_s25 = sshll.u32 %s2668_s24, 4  ;;  %s128_s5 = sshll.u32 %s2669_s13, 4  ;;  %s107_s25 = int_to_ptr.vmem [resolvable:$true] %s106_s25  ;;  %s129_s5 = int_to_ptr.vmem [resolvable:$true] %s128_s5 }
  0x71   :  { %s2521_s7 = scalar_lea.vmem %s107_s25, 2048  ;;  %p2526_p4 = scmp.lt.s32.totalorder %s107_s25, %s107_s25 }
  0x72   :  { %p2522_p3 = scmp.ne.s32.totalorder %s107_s25, %s2521_s7  ;;  %p2527_p5 = scmp.lt.s32.totalorder %s2521_s7, %s2521_s7 }
  0x74   :  { %p2528_p6 = por %p2527_p5, %p2526_p4 }
  0x76   :  { %p2529_p7 = pnand %p2528_p6, %p2522_p3 }
  0x78   :  { %2532 = shalt.err (!%p2529_p7)
}
  0x79   :  { %112 = dma.hbm_to_vmem [thread:$0]  %s3966_s6, 2048, %s107_s25, [#allocation12], %s2654_s30, %s2654_s30, %s2655_s0  }
  0x7a   :  { %s2541_s4 = scalar_lea.vmem %s129_s5, 6144  ;;  %p2546_p9 = scmp.lt.s32.totalorder %s129_s5, %s129_s5 }
  0x7b   :  { %p2542_p8 = scmp.ne.s32.totalorder %s129_s5, %s2541_s4  ;;  %p2547_p10 = scmp.lt.s32.totalorder %s2541_s4, %s2541_s4 }
  0x7d   :  { %p2548_p11 = por %p2547_p10, %p2546_p9 }
  0x7f   :  { %p2549_p12 = pnand %p2548_p11, %p2542_p8 }
  0x81   :  { %2552 = shalt.err (!%p2549_p12)
}
  0x82   :  { %134 = dma.hbm_to_vmem [thread:$0]  %s3968_s8, 6144, %s129_s5, [#allocation15], %s2661_s23, %s2661_s23, %s2662_s27  }
  0x83   :  { %s2670_s1 = smov [#allocation19]   ;;  %s2671_s3 = smov [#allocation22]  }
  0x84   :  { %s156_s20 = sshll.u32 %s2670_s1, 4  ;;  %s184_s6 = sshll.u32 %s2671_s3, 4  ;;  %s157_s20 = int_to_ptr.vmem [resolvable:$true] %s156_s20  ;;  %s185_s6 = int_to_ptr.vmem [resolvable:$true] %s184_s6 }
  0x85   :  { %s2561_s21 = scalar_lea.vmem %s157_s20, 6144  ;;  %p2566_p0 = scmp.lt.s32.totalorder %s157_s20, %s157_s20 }
  0x86   :  { %p2562_p13 = scmp.ne.s32.totalorder %s157_s20, %s2561_s21  ;;  %p2567_p1 = scmp.lt.s32.totalorder %s2561_s21, %s2561_s21 }
  0x88   :  { %p2568_p2 = por %p2567_p1, %p2566_p0 }
  0x8a   :  { %p2569_p3 = pnand %p2568_p2, %p2562_p13 }
  0x8c   :  { %2572 = shalt.err (!%p2569_p3)
}
  0x8d   :  { %162 = dma.hbm_to_vmem [thread:$0]  %s3972_s12, 6144, %s157_s20, [#allocation18], %s2661_s23, %s2661_s23, %s2662_s27  }
  0x8e   :  { %s2581_s8 = scalar_lea.vmem %s185_s6, 2048  ;;  %p2586_p5 = scmp.lt.s32.totalorder %s185_s6, %s185_s6 }
  0x8f   :  { %p2582_p4 = scmp.ne.s32.totalorder %s185_s6, %s2581_s8  ;;  %p2587_p6 = scmp.lt.s32.totalorder %s2581_s8, %s2581_s8 }
  0x91   :  { %p2588_p7 = por %p2587_p6, %p2586_p5 }
  0x93   :  { %p2589_p8 = pnand %p2588_p7, %p2582_p4 }
  0x95   :  { %2592 = shalt.err (!%p2589_p8)
}
  0x96   :  { %190 = dma.hbm_to_vmem [thread:$0]  %s3976_s16, 2048, %s185_s6, [#allocation21], %s2654_s30, %s2654_s30, %s2655_s0  }
  0x97   :  { %2625 = dma.done.wait [#allocation3], 1280  }
  0x98   :  { %2626 = vsyncadd [#allocation3], 4294966016 }
  0x99   :  { %2627 = dma.done.wait [#allocation6], 2560  }
  0x9a   :  { %2628 = vsyncadd [#allocation6], 4294964736 }
  0x9b   :  { %2629 = dma.done.wait [#allocation9], 2064  }
  0x9c   :  { %2630 = vsyncadd [#allocation9], 4294965232 }
  0x9d   :  { %2631 = dma.done.wait [#allocation12], 4096  }
  0x9e   :  { %2632 = vsyncadd [#allocation12], 4294963200 }
  0x9f   :  { %2633 = dma.done.wait [#allocation15], 6160  }
  0xa0   :  { %2634 = vsyncadd [#allocation15], 4294961136 }
  0xa1   :  { %2635 = dma.done.wait [#allocation18], 12288  }
  0xa2   :  { %2636 = vsyncadd [#allocation18], 4294955008 }
  0xa3   :  { %2637 = dma.done.wait [#allocation21], 8192  }
  0xa4   :  { %2638 = vsyncadd [#allocation21], 4294959104  ;;  %v2844_v0 = vld [vmem:[#allocation7] sm:$0xff]  ;;  %v2846_v1 = vld [vmem:[#allocation7 + $0x8] sm:$0xff]  ;;  %s3397_s5 = smov 0  }
  0xa5   :  { %3994 = vst [vmem:[#allocation32_spill] sm:$0xff] %v2844_v0  ;;  %3995 = vst [vmem:[#allocation33_spill] sm:$0xff] %v2846_v1  ;;  %v2848_v2 = vld [vmem:[#allocation7 + $0x10] sm:$0xff]  ;;  %v2850_v3 = vld [vmem:[#allocation7 + $0x18] sm:$0xff] }
  0xa6   :  { %3996 = vst [vmem:[#allocation34_spill] sm:$0xff] %v2848_v2  ;;  %3997 = vst [vmem:[#allocation35_spill] sm:$0xff] %v2850_v3  ;;  %v2852_v4 = vld [vmem:[#allocation7 + $0x20] sm:$0xff]  ;;  %v2854_v5 = vld [vmem:[#allocation7 + $0x28] sm:$0xff] }
  0xa7   :  { %3998 = vst [vmem:[#allocation36_spill] sm:$0xff] %v2852_v4  ;;  %3999 = vst [vmem:[#allocation37_spill] sm:$0xff] %v2854_v5  ;;  %v2856_v6 = vld [vmem:[#allocation7 + $0x30] sm:$0xff]  ;;  %v2858_v7 = vld [vmem:[#allocation7 + $0x38] sm:$0xff] }
  0xa8   :  { %4000 = vst [vmem:[#allocation38_spill] sm:$0xff] %v2856_v6  ;;  %4001 = vst [vmem:[#allocation39_spill] sm:$0xff] %v2858_v7  ;;  %v2860_v8 = vld [vmem:[#allocation7 + $0x40] sm:$0xff]  ;;  %v2862_v9 = vld [vmem:[#allocation7 + $0x48] sm:$0xff] }
  0xa9   :  { %4002 = vst [vmem:[#allocation40_spill] sm:$0xff] %v2860_v8  ;;  %4003 = vst [vmem:[#allocation41_spill] sm:$0xff] %v2862_v9  ;;  %v2864_v10 = vld [vmem:[#allocation5] sm:$0xff]  ;;  %v2866_v11 = vld [vmem:[#allocation5 + $0x8] sm:$0xff] }
  0xaa   :  { %4004 = vst [vmem:[#allocation42_spill] sm:$0xff] %v2864_v10  ;;  %4005 = vst [vmem:[#allocation43_spill] sm:$0xff] %v2866_v11  ;;  %v2868_v12 = vld [vmem:[#allocation5 + $0x10] sm:$0xff]  ;;  %v2870_v13 = vld [vmem:[#allocation5 + $0x18] sm:$0xff] }
  0xab   :  { %4006 = vst [vmem:[#allocation44_spill] sm:$0xff] %v2868_v12  ;;  %4007 = vst [vmem:[#allocation45_spill] sm:$0xff] %v2870_v13  ;;  %v2872_v14 = vld [vmem:[#allocation5 + $0x20] sm:$0xff]  ;;  %v2874_v15 = vld [vmem:[#allocation5 + $0x28] sm:$0xff] }
  0xac   :  { %4008 = vst [vmem:[#allocation46_spill] sm:$0xff] %v2872_v14  ;;  %4009 = vst [vmem:[#allocation47_spill] sm:$0xff] %v2874_v15  ;;  %v2876_v16 = vld [vmem:[#allocation5 + $0x30] sm:$0xff]  ;;  %v2878_v17 = vld [vmem:[#allocation5 + $0x38] sm:$0xff] }
  0xad   :  { %4010 = vst [vmem:[#allocation48_spill] sm:$0xff] %v2876_v16  ;;  %4011 = vst [vmem:[#allocation49_spill] sm:$0xff] %v2878_v17  ;;  %v2880_v18 = vld [vmem:[#allocation5 + $0x40] sm:$0xff]  ;;  %v2882_v19 = vld [vmem:[#allocation5 + $0x48] sm:$0xff] }
  0xae   :  { %4012 = vst [vmem:[#allocation50_spill] sm:$0xff] %v2880_v18  ;;  %4013 = vst [vmem:[#allocation51_spill] sm:$0xff] %v2882_v19  ;;  %v2884_v20 = vld [vmem:[#allocation8] sm:$0xff]  ;;  %v2886_v21 = vld [vmem:[#allocation8 + $0x8] sm:$0xff] }
  0xaf   :  { %4014 = vst [vmem:[#allocation52_spill] sm:$0xff] %v2884_v20  ;;  %4015 = vst [vmem:[#allocation53_spill] sm:$0xff] %v2886_v21  ;;  %v2888_v22 = vld [vmem:[#allocation8 + $0x10] sm:$0xff]  ;;  %v2890_v23 = vld [vmem:[#allocation8 + $0x18] sm:$0xff] }
  0xb0   :  { %4016 = vst [vmem:[#allocation54_spill] sm:$0xff] %v2888_v22  ;;  %4017 = vst [vmem:[#allocation55_spill] sm:$0xff] %v2890_v23  ;;  %v2892_v24 = vld [vmem:[#allocation8 + $0x20] sm:$0xff]  ;;  %v2894_v25 = vld [vmem:[#allocation8 + $0x28] sm:$0xff] }
  0xb1   :  { %4018 = vst [vmem:[#allocation56_spill] sm:$0xff] %v2892_v24  ;;  %4019 = vst [vmem:[#allocation57_spill] sm:$0xff] %v2894_v25  ;;  %v2896_v26 = vld [vmem:[#allocation8 + $0x30] sm:$0xff]  ;;  %v2898_v27 = vld [vmem:[#allocation8 + $0x38] sm:$0xff] }
  0xb2   :  { %4020 = vst [vmem:[#allocation58_spill] sm:$0xff] %v2896_v26  ;;  %4021 = vst [vmem:[#allocation59_spill] sm:$0xff] %v2898_v27  ;;  %v2900_v28 = vld [vmem:[#allocation8 + $0x40] sm:$0xff]  ;;  %v2902_v29 = vld [vmem:[#allocation8 + $0x48] sm:$0xff] }
  0xb3   :  { %4022 = vst [vmem:[#allocation60_spill] sm:$0xff] %v2900_v28  ;;  %4023 = vst [vmem:[#allocation61_spill] sm:$0xff] %v2902_v29  ;;  %v2904_v30 = vld [vmem:[#allocation8 + $0x50] sm:$0xff]  ;;  %v2906_v31 = vld [vmem:[#allocation8 + $0x58] sm:$0xff] }
  0xb4   :  { %4024 = vst [vmem:[#allocation62_spill] sm:$0xff] %v2904_v30  ;;  %4025 = vst [vmem:[#allocation63_spill] sm:$0xff] %v2906_v31  ;;  %v2908_v32 = vld [vmem:[#allocation8 + $0x60] sm:$0xff]  ;;  %v2910_v33 = vld [vmem:[#allocation8 + $0x68] sm:$0xff] }
  0xb5   :  { %4026 = vst [vmem:[#allocation64_spill] sm:$0xff] %v2908_v32  ;;  %4027 = vst [vmem:[#allocation65_spill] sm:$0xff] %v2910_v33  ;;  %v2912_v34 = vld [vmem:[#allocation8 + $0x70] sm:$0xff]  ;;  %v2914_v35 = vld [vmem:[#allocation8 + $0x78] sm:$0xff] }
  0xb6   :  { %4028 = vst [vmem:[#allocation66_spill] sm:$0xff] %v2912_v34  ;;  %4029 = vst [vmem:[#allocation67_spill] sm:$0xff] %v2914_v35  ;;  %v2916_v36 = vld [vmem:[#allocation10] ss:$0 sm:$0xff]  ;;  %v2918_v37 = vld [vmem:[#allocation13] sm:$0xff] }
  0xb7   :  { %4030 = vst [vmem:[#allocation68_spill] sm:$0xff] %v2916_v36  ;;  %4031 = vst [vmem:[#allocation69_spill] sm:$0xff] %v2918_v37  ;;  %v2920_v38 = vld [vmem:[#allocation13 + $0x8] sm:$0xff]  ;;  %v2922_v39 = vld [vmem:[#allocation13 + $0x10] sm:$0xff] }
  0xb8   :  { %4032 = vst [vmem:[#allocation70_spill] sm:$0xff] %v2920_v38  ;;  %4033 = vst [vmem:[#allocation71_spill] sm:$0xff] %v2922_v39  ;;  %v2924_v40 = vld [vmem:[#allocation13 + $0x18] sm:$0xff]  ;;  %v2926_v41 = vld [vmem:[#allocation13 + $0x20] sm:$0xff] }
  0xb9   :  { %v2928_v42 = vld [vmem:[#allocation13 + $0x28] sm:$0xff]  ;;  %v2930_v43 = vld [vmem:[#allocation13 + $0x30] sm:$0xff]  ;;  %v2932_v44 = vld [vmem:[#allocation13 + $0x38] sm:$0xff] }
  0xba   :  { %v2934_v45 = vld [vmem:[#allocation13 + $0x40] sm:$0xff]  ;;  %v2936_v46 = vld [vmem:[#allocation13 + $0x48] sm:$0xff]  ;;  %v2938_v47 = vld [vmem:[#allocation13 + $0x50] sm:$0xff] }
  0xbb   :  { %v2940_v48 = vld [vmem:[#allocation13 + $0x58] sm:$0xff]  ;;  %v2942_v49 = vld [vmem:[#allocation13 + $0x60] sm:$0xff]  ;;  %v2944_v50 = vld [vmem:[#allocation13 + $0x68] sm:$0xff] }
  0xbc   :  { %v2946_v51 = vld [vmem:[#allocation13 + $0x70] sm:$0xff]  ;;  %v2948_v52 = vld [vmem:[#allocation13 + $0x78] sm:$0xff]  ;;  %v2950_v53 = vld [vmem:[#allocation14] ss:$0 sm:$0xff] }
  0xbd   :  { %4034 = vst [vmem:[#allocation72_spill] sm:$0xff] %v2950_v53  ;;  %v2952_v54 = vld [vmem:[#allocation16] sm:$0xff]  ;;  %v2954_v55 = vld [vmem:[#allocation16 + $0x8] sm:$0xff]  ;;  %v2956_v56 = vld [vmem:[#allocation16 + $0x10] sm:$0xff] }
  0xbe   :  { %4035 = vst [vmem:[#allocation73_spill] sm:$0xff] %v2952_v54  ;;  %4036 = vst [vmem:[#allocation74_spill] sm:$0xff] %v2954_v55  ;;  %v2958_v57 = vld [vmem:[#allocation16 + $0x18] sm:$0xff]  ;;  %v2960_v58 = vld [vmem:[#allocation16 + $0x20] sm:$0xff] }
  0xbf   :  { %4037 = vst [vmem:[#allocation75_spill] sm:$0xff] %v2956_v56  ;;  %4038 = vst [vmem:[#allocation76_spill] sm:$0xff] %v2958_v57  ;;  %v2962_v59 = vld [vmem:[#allocation16 + $0x28] sm:$0xff]  ;;  %v2964_v60 = vld [vmem:[#allocation16 + $0x30] sm:$0xff] }
  0xc0   :  { %4039 = vst [vmem:[#allocation77_spill] sm:$0xff] %v2960_v58  ;;  %4040 = vst [vmem:[#allocation78_spill] sm:$0xff] %v2962_v59  ;;  %v2966_v61 = vld [vmem:[#allocation16 + $0x38] sm:$0xff]  ;;  %v2968_v62 = vld [vmem:[#allocation16 + $0x40] sm:$0xff] }
  0xc1   :  { %4041 = vst [vmem:[#allocation79_spill] sm:$0xff] %v2964_v60  ;;  %4042 = vst [vmem:[#allocation80_spill] sm:$0xff] %v2966_v61  ;;  %v2970_v63 = vld [vmem:[#allocation16 + $0x48] sm:$0xff]  ;;  %v2972_v53 = vld [vmem:[#allocation16 + $0x50] sm:$0xff] }
  0xc2   :  { %4043 = vst [vmem:[#allocation81_spill] sm:$0xff] %v2968_v62  ;;  %4044 = vst [vmem:[#allocation82_spill] sm:$0xff] %v2970_v63  ;;  %v2974_v9 = vld [vmem:[#allocation16 + $0x58] sm:$0xff]  ;;  %v2976_v8 = vld [vmem:[#allocation16 + $0x60] sm:$0xff] }
  0xc3   :  { %4045 = vst [vmem:[#allocation83_spill] sm:$0xff] %v2972_v53  ;;  %4046 = vst [vmem:[#allocation84_spill] sm:$0xff] %v2974_v9  ;;  %v2978_v56 = vld [vmem:[#allocation16 + $0x68] sm:$0xff]  ;;  %v2980_v7 = vld [vmem:[#allocation16 + $0x70] sm:$0xff] }
  0xc4   :  { %4047 = vst [vmem:[#allocation85_spill] sm:$0xff] %v2976_v8  ;;  %4048 = vst [vmem:[#allocation86_spill] sm:$0xff] %v2978_v56  ;;  %v2982_v5 = vld [vmem:[#allocation16 + $0x78] sm:$0xff]  ;;  %v2984_v59 = vld [vmem:[#allocation16 + $0x80] sm:$0xff] }
  0xc5   :  { %4049 = vst [vmem:[#allocation87_spill] sm:$0xff] %v2980_v7  ;;  %4050 = vst [vmem:[#allocation88_spill] sm:$0xff] %v2982_v5  ;;  %v2986_v4 = vld [vmem:[#allocation16 + $0x88] sm:$0xff]  ;;  %v2988_v3 = vld [vmem:[#allocation16 + $0x90] sm:$0xff] }
  0xc6   :  { %4051 = vst [vmem:[#allocation89_spill] sm:$0xff] %v2986_v4  ;;  %4052 = vst [vmem:[#allocation90_spill] sm:$0xff] %v2988_v3  ;;  %v2990_v62 = vld [vmem:[#allocation16 + $0x98] sm:$0xff]  ;;  %v2992_v6 = vld [vmem:[#allocation16 + $0xa0] sm:$0xff] }
  0xc7   :  { %4053 = vst [vmem:[#allocation91_spill] sm:$0xff] %v2992_v6  ;;  %v2994_v2 = vld [vmem:[#allocation16 + $0xa8] sm:$0xff]  ;;  %v2996_v9 = vld [vmem:[#allocation16 + $0xb0] sm:$0xff]  ;;  %v2998_v0 = vld [vmem:[#allocation16 + $0xb8] sm:$0xff] }
  0xc8   :  { %4054 = vst [vmem:[#allocation92_spill] sm:$0xff] %v2994_v2  ;;  %4055 = vst [vmem:[#allocation93_spill] sm:$0xff] %v2996_v9  ;;  %v3000_v1 = vld [vmem:[#allocation16 + $0xc0] sm:$0xff]  ;;  %v3002_v7 = vld [vmem:[#allocation16 + $0xc8] sm:$0xff] }
  0xc9   :  { %4056 = vst [vmem:[#allocation94_spill] sm:$0xff] %v2998_v0  ;;  %4057 = vst [vmem:[#allocation95_spill] sm:$0xff] %v3000_v1  ;;  %v3004_v36 = vld [vmem:[#allocation16 + $0xd0] sm:$0xff]  ;;  %v3006_v19 = vld [vmem:[#allocation16 + $0xd8] sm:$0xff] }
  0xca   :  { %4058 = vst [vmem:[#allocation96_spill] sm:$0xff] %v3002_v7  ;;  %4059 = vst [vmem:[#allocation97_spill] sm:$0xff] %v3004_v36  ;;  %v3008_v4 = vld [vmem:[#allocation16 + $0xe0] sm:$0xff]  ;;  %v3010_v14 = vld [vmem:[#allocation16 + $0xe8] sm:$0xff] }
  0xcb   :  { %4060 = vst [vmem:[#allocation98_spill] sm:$0xff] %v3006_v19  ;;  %4061 = vst [vmem:[#allocation99_spill] sm:$0xff] %v3008_v4  ;;  %v3012_v18 = vld [vmem:[#allocation16 + $0xf0] sm:$0xff]  ;;  %v3014_v6 = vld [vmem:[#allocation16 + $0xf8] sm:$0xff] }
  0xcc   :  { %4062 = vst [vmem:[#allocation100_spill] sm:$0xff] %v3010_v14  ;;  %4063 = vst [vmem:[#allocation101_spill] sm:$0xff] %v3012_v18  ;;  %v3016_v13 = vld [vmem:[#allocation16 + $0x100] sm:$0xff]  ;;  %v3018_v17 = vld [vmem:[#allocation16 + $0x108] sm:$0xff] }
  0xcd   :  { %4064 = vst [vmem:[#allocation102_spill] sm:$0xff] %v3014_v6  ;;  %4065 = vst [vmem:[#allocation103_spill] sm:$0xff] %v3016_v13  ;;  %v3020_v0 = vld [vmem:[#allocation16 + $0x110] sm:$0xff]  ;;  %v3022_v12 = vld [vmem:[#allocation16 + $0x118] sm:$0xff] }
  0xce   :  { %4066 = vst [vmem:[#allocation104_spill] sm:$0xff] %v3018_v17  ;;  %4067 = vst [vmem:[#allocation105_spill] sm:$0xff] %v3020_v0  ;;  %v3024_v16 = vld [vmem:[#allocation16 + $0x120] sm:$0xff]  ;;  %v3026_v36 = vld [vmem:[#allocation16 + $0x128] sm:$0xff] }
  0xcf   :  { %4068 = vst [vmem:[#allocation106_spill] sm:$0xff] %v3022_v12  ;;  %4069 = vst [vmem:[#allocation107_spill] sm:$0xff] %v3024_v16  ;;  %v3028_v15 = vld [vmem:[#allocation16 + $0x130] sm:$0xff]  ;;  %v3030_v11 = vld [vmem:[#allocation16 + $0x138] sm:$0xff] }
  0xd0   :  { %4070 = vst [vmem:[#allocation108_spill] sm:$0xff] %v3026_v36  ;;  %4071 = vst [vmem:[#allocation109_spill] sm:$0xff] %v3028_v15  ;;  %v3032_v14 = vld [vmem:[#allocation16 + $0x140] sm:$0xff]  ;;  %v3034_v10 = vld [vmem:[#allocation16 + $0x148] sm:$0xff] }
  0xd1   :  { %4072 = vst [vmem:[#allocation110_spill] sm:$0xff] %v3030_v11  ;;  %4073 = vst [vmem:[#allocation111_spill] sm:$0xff] %v3032_v14  ;;  %v3036_v54 = vld [vmem:[#allocation16 + $0x150] sm:$0xff]  ;;  %v3038_v13 = vld [vmem:[#allocation16 + $0x158] sm:$0xff] }
  0xd2   :  { %4074 = vst [vmem:[#allocation112_spill] sm:$0xff] %v3034_v10  ;;  %4075 = vst [vmem:[#allocation113_spill] sm:$0xff] %v3038_v13  ;;  %v3040_v55 = vld [vmem:[#allocation16 + $0x160] sm:$0xff]  ;;  %v3042_v57 = vld [vmem:[#allocation16 + $0x168] sm:$0xff] }
  0xd3   :  { %4076 = vst [vmem:[#allocation114_spill] sm:$0xff] %v3040_v55  ;;  %v3044_v12 = vld [vmem:[#allocation16 + $0x170] sm:$0xff]  ;;  %v3046_v58 = vld [vmem:[#allocation16 + $0x178] sm:$0xff]  ;;  %v3048_v60 = vld [vmem:[#allocation17] sm:$0xff] }
  0xd4   :  { %4077 = vst [vmem:[#allocation115_spill] sm:$0xff] %v3044_v12  ;;  %4078 = vst [vmem:[#allocation116_spill] sm:$0xff] %v3046_v58  ;;  %v3050_v15 = vld [vmem:[#allocation17 + $0x8] sm:$0xff]  ;;  %v3052_v61 = vld [vmem:[#allocation17 + $0x10] sm:$0xff] }
  0xd5   :  { %4079 = vst [vmem:[#allocation117_spill] sm:$0xff] %v3048_v60  ;;  %4080 = vst [vmem:[#allocation118_spill] sm:$0xff] %v3050_v15  ;;  %v3054_v63 = vld [vmem:[#allocation17 + $0x18] sm:$0xff]  ;;  %v3056_v10 = vld [vmem:[#allocation17 + $0x20] sm:$0xff] }
  0xd6   :  { %4081 = vst [vmem:[#allocation119_spill] sm:$0xff] %v3052_v61  ;;  %4082 = vst [vmem:[#allocation120_spill] sm:$0xff] %v3054_v63  ;;  %v3058_v53 = vld [vmem:[#allocation17 + $0x28] sm:$0xff]  ;;  %v3060_v8 = vld [vmem:[#allocation17 + $0x30] sm:$0xff] }
  0xd7   :  { %4083 = vst [vmem:[#allocation121_spill] sm:$0xff] %v3056_v10  ;;  %4084 = vst [vmem:[#allocation122_spill] sm:$0xff] %v3058_v53  ;;  %v3062_v55 = vld [vmem:[#allocation17 + $0x38] sm:$0xff]  ;;  %v3064_v56 = vld [vmem:[#allocation17 + $0x40] sm:$0xff] }
  0xd8   :  { %4085 = vst [vmem:[#allocation123_spill] sm:$0xff] %v3060_v8  ;;  %4086 = vst [vmem:[#allocation124_spill] sm:$0xff] %v3062_v55  ;;  %v3066_v5 = vld [vmem:[#allocation17 + $0x48] sm:$0xff]  ;;  %v3068_v58 = vld [vmem:[#allocation17 + $0x50] sm:$0xff] }
  0xd9   :  { %4087 = vst [vmem:[#allocation125_spill] sm:$0xff] %v3064_v56  ;;  %4088 = vst [vmem:[#allocation126_spill] sm:$0xff] %v3066_v5  ;;  %v3070_v60 = vld [vmem:[#allocation17 + $0x58] sm:$0xff]  ;;  %v3072_v15 = vld [vmem:[#allocation17 + $0x60] sm:$0xff] }
  0xda   :  { %4089 = vst [vmem:[#allocation127_spill] sm:$0xff] %v3068_v58  ;;  %4090 = vst [vmem:[#allocation128_spill] sm:$0xff] %v3070_v60  ;;  %v3074_v61 = vld [vmem:[#allocation17 + $0x68] sm:$0xff]  ;;  %v3076_v63 = vld [vmem:[#allocation17 + $0x70] sm:$0xff] }
  0xdb   :  { %4091 = vst [vmem:[#allocation129_spill] sm:$0xff] %v3072_v15  ;;  %4092 = vst [vmem:[#allocation130_spill] sm:$0xff] %v3074_v61  ;;  %v3078_v10 = vld [vmem:[#allocation17 + $0x78] sm:$0xff]  ;;  %v3080_v53 = vld [vmem:[#allocation17 + $0x80] sm:$0xff] }
  0xdc   :  { %4093 = vst [vmem:[#allocation131_spill] sm:$0xff] %v3076_v63  ;;  %4094 = vst [vmem:[#allocation132_spill] sm:$0xff] %v3078_v10  ;;  %v3082_v8 = vld [vmem:[#allocation17 + $0x88] sm:$0xff]  ;;  %v3084_v55 = vld [vmem:[#allocation17 + $0x90] sm:$0xff] }
  0xdd   :  { %4095 = vst [vmem:[#allocation133_spill] sm:$0xff] %v3080_v53  ;;  %4096 = vst [vmem:[#allocation134_spill] sm:$0xff] %v3082_v8  ;;  %v3086_v56 = vld [vmem:[#allocation17 + $0x98] sm:$0xff]  ;;  %v3088_v5 = vld [vmem:[#allocation17 + $0xa0] sm:$0xff] }
  0xde   :  { %4097 = vst [vmem:[#allocation135_spill] sm:$0xff] %v3084_v55  ;;  %4098 = vst [vmem:[#allocation136_spill] sm:$0xff] %v3086_v56  ;;  %v3090_v58 = vld [vmem:[#allocation17 + $0xa8] sm:$0xff]  ;;  %v3092_v60 = vld [vmem:[#allocation17 + $0xb0] sm:$0xff] }
  0xdf   :  { %4099 = vst [vmem:[#allocation137_spill] sm:$0xff] %v3088_v5  ;;  %4100 = vst [vmem:[#allocation138_spill] sm:$0xff] %v3090_v58  ;;  %v3094_v15 = vld [vmem:[#allocation17 + $0xb8] sm:$0xff]  ;;  %v3096_v61 = vld [vmem:[#allocation17 + $0xc0] sm:$0xff] }
  0xe0   :  { %4101 = vst [vmem:[#allocation139_spill] sm:$0xff] %v3092_v60  ;;  %4102 = vst [vmem:[#allocation140_spill] sm:$0xff] %v3094_v15  ;;  %v3098_v63 = vld [vmem:[#allocation17 + $0xc8] sm:$0xff]  ;;  %v3100_v10 = vld [vmem:[#allocation17 + $0xd0] sm:$0xff] }
  0xe1   :  { %4103 = vst [vmem:[#allocation141_spill] sm:$0xff] %v3096_v61  ;;  %4104 = vst [vmem:[#allocation142_spill] sm:$0xff] %v3098_v63  ;;  %v3102_v53 = vld [vmem:[#allocation17 + $0xd8] sm:$0xff]  ;;  %v3104_v8 = vld [vmem:[#allocation17 + $0xe0] sm:$0xff] }
  0xe2   :  { %4105 = vst [vmem:[#allocation143_spill] sm:$0xff] %v3100_v10  ;;  %4106 = vst [vmem:[#allocation144_spill] sm:$0xff] %v3102_v53  ;;  %v3106_v55 = vld [vmem:[#allocation17 + $0xe8] sm:$0xff]  ;;  %v3108_v56 = vld [vmem:[#allocation17 + $0xf0] sm:$0xff] }
  0xe3   :  { %4107 = vst [vmem:[#allocation145_spill] sm:$0xff] %v3104_v8  ;;  %4108 = vst [vmem:[#allocation146_spill] sm:$0xff] %v3106_v55  ;;  %v3110_v5 = vld [vmem:[#allocation17 + $0xf8] sm:$0xff]  ;;  %v3112_v58 = vld [vmem:[#allocation17 + $0x100] sm:$0xff] }
  0xe4   :  { %4109 = vst [vmem:[#allocation147_spill] sm:$0xff] %v3108_v56  ;;  %4110 = vst [vmem:[#allocation148_spill] sm:$0xff] %v3110_v5  ;;  %v3114_v60 = vld [vmem:[#allocation17 + $0x108] sm:$0xff]  ;;  %v3116_v15 = vld [vmem:[#allocation17 + $0x110] sm:$0xff] }
  0xe5   :  { %4111 = vst [vmem:[#allocation149_spill] sm:$0xff] %v3112_v58  ;;  %4112 = vst [vmem:[#allocation150_spill] sm:$0xff] %v3114_v60  ;;  %v3118_v61 = vld [vmem:[#allocation17 + $0x118] sm:$0xff]  ;;  %v3120_v63 = vld [vmem:[#allocation17 + $0x120] sm:$0xff] }
  0xe6   :  { %4113 = vst [vmem:[#allocation151_spill] sm:$0xff] %v3116_v15  ;;  %4114 = vst [vmem:[#allocation152_spill] sm:$0xff] %v3118_v61  ;;  %v3122_v10 = vld [vmem:[#allocation17 + $0x128] sm:$0xff]  ;;  %v3124_v53 = vld [vmem:[#allocation17 + $0x130] sm:$0xff] }
  0xe7   :  { %4115 = vst [vmem:[#allocation153_spill] sm:$0xff] %v3120_v63  ;;  %4116 = vst [vmem:[#allocation154_spill] sm:$0xff] %v3122_v10  ;;  %v3126_v8 = vld [vmem:[#allocation17 + $0x138] sm:$0xff]  ;;  %v3128_v55 = vld [vmem:[#allocation17 + $0x140] sm:$0xff] }
  0xe8   :  { %4117 = vst [vmem:[#allocation155_spill] sm:$0xff] %v3124_v53  ;;  %4118 = vst [vmem:[#allocation156_spill] sm:$0xff] %v3126_v8  ;;  %v3130_v56 = vld [vmem:[#allocation17 + $0x148] sm:$0xff]  ;;  %v3132_v5 = vld [vmem:[#allocation17 + $0x150] sm:$0xff] }
  0xe9   :  { %4119 = vst [vmem:[#allocation157_spill] sm:$0xff] %v3128_v55  ;;  %4120 = vst [vmem:[#allocation158_spill] sm:$0xff] %v3130_v56  ;;  %v3134_v58 = vld [vmem:[#allocation17 + $0x158] sm:$0xff]  ;;  %v3136_v60 = vld [vmem:[#allocation17 + $0x160] sm:$0xff] }
  0xea   :  { %4121 = vst [vmem:[#allocation159_spill] sm:$0xff] %v3132_v5  ;;  %4122 = vst [vmem:[#allocation160_spill] sm:$0xff] %v3134_v58  ;;  %v3138_v15 = vld [vmem:[#allocation17 + $0x168] sm:$0xff]  ;;  %v3140_v61 = vld [vmem:[#allocation17 + $0x170] sm:$0xff] }
  0xeb   :  { %4123 = vst [vmem:[#allocation161_spill] sm:$0xff] %v3136_v60  ;;  %4124 = vst [vmem:[#allocation162_spill] sm:$0xff] %v3138_v15  ;;  %v3142_v63 = vld [vmem:[#allocation17 + $0x178] sm:$0xff]  ;;  %v3147_v53 = vld [vmem:[%s3970_s10] sm:$0x7] }
  0xec   :  { %4125 = vst [vmem:[#allocation163_spill] sm:$0xff] %v3140_v61  ;;  %4126 = vst [vmem:[#allocation164_spill] sm:$0xff] %v3142_v63  ;;  %v3152_v56 = vld [vmem:[%s3971_s11] sm:$0x7]  ;;  %v3154_v10 = vld [vmem:[#allocation19] sm:$0xff] }
  0xed   :  { %4127 = vst [vmem:[#allocation165_spill] sm:$0xff] %v3147_v53  ;;  %4128 = vst [vmem:[#allocation166_spill] sm:$0xff] %v3152_v56  ;;  %v3156_v8 = vld [vmem:[#allocation19 + $0x8] sm:$0xff]  ;;  %v3158_v60 = vld [vmem:[#allocation19 + $0x10] sm:$0xff] }
  0xee   :  { %4129 = vst [vmem:[#allocation167_spill] sm:$0xff] %v3154_v10  ;;  %4130 = vst [vmem:[#allocation168_spill] sm:$0xff] %v3156_v8  ;;  %v3160_v55 = vld [vmem:[#allocation19 + $0x18] sm:$0xff]  ;;  %v3162_v5 = vld [vmem:[#allocation19 + $0x20] sm:$0xff] }
  0xef   :  { %4131 = vst [vmem:[#allocation169_spill] sm:$0xff] %v3158_v60  ;;  %4132 = vst [vmem:[#allocation170_spill] sm:$0xff] %v3160_v55  ;;  %v3164_v63 = vld [vmem:[#allocation19 + $0x28] sm:$0xff]  ;;  %v3166_v58 = vld [vmem:[#allocation19 + $0x30] sm:$0xff] }
  0xf0   :  { %4133 = vst [vmem:[#allocation171_spill] sm:$0xff] %v3162_v5  ;;  %4134 = vst [vmem:[#allocation172_spill] sm:$0xff] %v3164_v63  ;;  %v3168_v53 = vld [vmem:[#allocation19 + $0x38] sm:$0xff]  ;;  %v3170_v15 = vld [vmem:[#allocation19 + $0x40] sm:$0xff] }
  0xf1   :  { %4135 = vst [vmem:[#allocation173_spill] sm:$0xff] %v3166_v58  ;;  %4136 = vst [vmem:[#allocation174_spill] sm:$0xff] %v3168_v53  ;;  %v3172_v61 = vld [vmem:[#allocation19 + $0x48] sm:$0xff]  ;;  %v3174_v56 = vld [vmem:[#allocation19 + $0x50] sm:$0xff] }
  0xf2   :  { %4137 = vst [vmem:[#allocation175_spill] sm:$0xff] %v3170_v15  ;;  %4138 = vst [vmem:[#allocation176_spill] sm:$0xff] %v3172_v61  ;;  %v3176_v10 = vld [vmem:[#allocation19 + $0x58] sm:$0xff]  ;;  %v3178_v8 = vld [vmem:[#allocation19 + $0x60] sm:$0xff] }
  0xf3   :  { %4139 = vst [vmem:[#allocation177_spill] sm:$0xff] %v3174_v56  ;;  %4140 = vst [vmem:[#allocation178_spill] sm:$0xff] %v3176_v10  ;;  %v3180_v60 = vld [vmem:[#allocation19 + $0x68] sm:$0xff]  ;;  %v3182_v55 = vld [vmem:[#allocation19 + $0x70] sm:$0xff] }
  0xf4   :  { %4141 = vst [vmem:[#allocation179_spill] sm:$0xff] %v3178_v8  ;;  %4142 = vst [vmem:[#allocation180_spill] sm:$0xff] %v3180_v60  ;;  %v3184_v5 = vld [vmem:[#allocation19 + $0x78] sm:$0xff]  ;;  %v3186_v63 = vld [vmem:[#allocation19 + $0x80] sm:$0xff] }
  0xf5   :  { %4143 = vst [vmem:[#allocation181_spill] sm:$0xff] %v3182_v55  ;;  %4144 = vst [vmem:[#allocation182_spill] sm:$0xff] %v3184_v5  ;;  %v3188_v58 = vld [vmem:[#allocation19 + $0x88] sm:$0xff]  ;;  %v3190_v53 = vld [vmem:[#allocation19 + $0x90] sm:$0xff] }
  0xf6   :  { %4145 = vst [vmem:[#allocation183_spill] sm:$0xff] %v3186_v63  ;;  %4146 = vst [vmem:[#allocation184_spill] sm:$0xff] %v3188_v58  ;;  %v3192_v15 = vld [vmem:[#allocation19 + $0x98] sm:$0xff]  ;;  %v3194_v61 = vld [vmem:[#allocation19 + $0xa0] sm:$0xff] }
  0xf7   :  { %4147 = vst [vmem:[#allocation185_spill] sm:$0xff] %v3190_v53  ;;  %4148 = vst [vmem:[#allocation186_spill] sm:$0xff] %v3192_v15  ;;  %v3196_v56 = vld [vmem:[#allocation19 + $0xa8] sm:$0xff]  ;;  %v3198_v10 = vld [vmem:[#allocation19 + $0xb0] sm:$0xff] }
  0xf8   :  { %4149 = vst [vmem:[#allocation187_spill] sm:$0xff] %v3194_v61  ;;  %4150 = vst [vmem:[#allocation188_spill] sm:$0xff] %v3196_v56  ;;  %v3200_v8 = vld [vmem:[#allocation19 + $0xb8] sm:$0xff]  ;;  %v3202_v60 = vld [vmem:[#allocation19 + $0xc0] sm:$0xff] }
  0xf9   :  { %4151 = vst [vmem:[#allocation189_spill] sm:$0xff] %v3198_v10  ;;  %4152 = vst [vmem:[#allocation190_spill] sm:$0xff] %v3200_v8  ;;  %v3204_v55 = vld [vmem:[#allocation19 + $0xc8] sm:$0xff]  ;;  %v3206_v5 = vld [vmem:[#allocation19 + $0xd0] sm:$0xff] }
  0xfa   :  { %4153 = vst [vmem:[#allocation191_spill] sm:$0xff] %v3202_v60  ;;  %4154 = vst [vmem:[#allocation192_spill] sm:$0xff] %v3204_v55  ;;  %v3208_v63 = vld [vmem:[#allocation19 + $0xd8] sm:$0xff]  ;;  %v3210_v58 = vld [vmem:[#allocation19 + $0xe0] sm:$0xff] }
  0xfb   :  { %4155 = vst [vmem:[#allocation193_spill] sm:$0xff] %v3206_v5  ;;  %4156 = vst [vmem:[#allocation194_spill] sm:$0xff] %v3208_v63  ;;  %v3212_v53 = vld [vmem:[#allocation19 + $0xe8] sm:$0xff]  ;;  %v3214_v15 = vld [vmem:[#allocation19 + $0xf0] sm:$0xff] }
  0xfc   :  { %4157 = vst [vmem:[#allocation195_spill] sm:$0xff] %v3210_v58  ;;  %4158 = vst [vmem:[#allocation196_spill] sm:$0xff] %v3212_v53  ;;  %v3216_v61 = vld [vmem:[#allocation19 + $0xf8] sm:$0xff]  ;;  %v3218_v56 = vld [vmem:[#allocation19 + $0x100] sm:$0xff] }
  0xfd   :  { %4159 = vst [vmem:[#allocation197_spill] sm:$0xff] %v3214_v15  ;;  %4160 = vst [vmem:[#allocation198_spill] sm:$0xff] %v3216_v61  ;;  %v3220_v10 = vld [vmem:[#allocation19 + $0x108] sm:$0xff]  ;;  %v3222_v8 = vld [vmem:[#allocation19 + $0x110] sm:$0xff] }
  0xfe   :  { %4161 = vst [vmem:[#allocation199_spill] sm:$0xff] %v3218_v56  ;;  %4162 = vst [vmem:[#allocation200_spill] sm:$0xff] %v3220_v10  ;;  %v3224_v60 = vld [vmem:[#allocation19 + $0x118] sm:$0xff]  ;;  %v3226_v55 = vld [vmem:[#allocation19 + $0x120] sm:$0xff] }
  0xff   :  { %4163 = vst [vmem:[#allocation201_spill] sm:$0xff] %v3222_v8  ;;  %4164 = vst [vmem:[#allocation202_spill] sm:$0xff] %v3224_v60  ;;  %v3228_v5 = vld [vmem:[#allocation19 + $0x128] sm:$0xff]  ;;  %v3230_v63 = vld [vmem:[#allocation19 + $0x130] sm:$0xff] }
 0x100   :  { %4165 = vst [vmem:[#allocation203_spill] sm:$0xff] %v3226_v55  ;;  %4166 = vst [vmem:[#allocation204_spill] sm:$0xff] %v3228_v5  ;;  %v3232_v58 = vld [vmem:[#allocation19 + $0x138] sm:$0xff]  ;;  %v3234_v53 = vld [vmem:[#allocation19 + $0x140] sm:$0xff] }
 0x101   :  { %4167 = vst [vmem:[#allocation205_spill] sm:$0xff] %v3230_v63  ;;  %4168 = vst [vmem:[#allocation206_spill] sm:$0xff] %v3232_v58  ;;  %v3236_v15 = vld [vmem:[#allocation19 + $0x148] sm:$0xff]  ;;  %v3238_v61 = vld [vmem:[#allocation19 + $0x150] sm:$0xff] }
 0x102   :  { %4169 = vst [vmem:[#allocation207_spill] sm:$0xff] %v3234_v53  ;;  %4170 = vst [vmem:[#allocation208_spill] sm:$0xff] %v3236_v15  ;;  %v3240_v56 = vld [vmem:[#allocation19 + $0x158] sm:$0xff]  ;;  %v3242_v10 = vld [vmem:[#allocation19 + $0x160] sm:$0xff] }
 0x103   :  { %4171 = vst [vmem:[#allocation209_spill] sm:$0xff] %v3238_v61  ;;  %4172 = vst [vmem:[#allocation210_spill] sm:$0xff] %v3240_v56  ;;  %v3244_v8 = vld [vmem:[#allocation19 + $0x168] sm:$0xff]  ;;  %v3246_v60 = vld [vmem:[#allocation19 + $0x170] sm:$0xff] }
 0x104   :  { %4173 = vst [vmem:[#allocation211_spill] sm:$0xff] %v3242_v10  ;;  %4174 = vst [vmem:[#allocation212_spill] sm:$0xff] %v3244_v8  ;;  %v3248_v55 = vld [vmem:[#allocation19 + $0x178] sm:$0xff]  ;;  %v3250_v5 = vld [vmem:[#allocation20] sm:$0xff] }
 0x105   :  { %4175 = vst [vmem:[#allocation213_spill] sm:$0xff] %v3246_v60  ;;  %4176 = vst [vmem:[#allocation214_spill] sm:$0xff] %v3248_v55  ;;  %v3252_v63 = vld [vmem:[#allocation20 + $0x8] sm:$0xff]  ;;  %v3254_v58 = vld [vmem:[#allocation20 + $0x10] sm:$0xff] }
 0x106   :  { %4177 = vst [vmem:[#allocation215_spill] sm:$0xff] %v3250_v5  ;;  %4178 = vst [vmem:[#allocation216_spill] sm:$0xff] %v3252_v63  ;;  %v3256_v53 = vld [vmem:[#allocation20 + $0x18] sm:$0xff]  ;;  %v3258_v15 = vld [vmem:[#allocation20 + $0x20] sm:$0xff] }
 0x107   :  { %4179 = vst [vmem:[#allocation217_spill] sm:$0xff] %v3254_v58  ;;  %4180 = vst [vmem:[#allocation218_spill] sm:$0xff] %v3256_v53  ;;  %v3260_v61 = vld [vmem:[#allocation20 + $0x28] sm:$0xff]  ;;  %v3262_v56 = vld [vmem:[#allocation20 + $0x30] sm:$0xff] }
 0x108   :  { %4181 = vst [vmem:[#allocation219_spill] sm:$0xff] %v3258_v15  ;;  %4182 = vst [vmem:[#allocation220_spill] sm:$0xff] %v3260_v61  ;;  %v3264_v10 = vld [vmem:[#allocation20 + $0x38] sm:$0xff]  ;;  %v3266_v8 = vld [vmem:[#allocation20 + $0x40] sm:$0xff] }
 0x109   :  { %4183 = vst [vmem:[#allocation221_spill] sm:$0xff] %v3262_v56  ;;  %4184 = vst [vmem:[#allocation222_spill] sm:$0xff] %v3264_v10  ;;  %v3268_v60 = vld [vmem:[#allocation20 + $0x48] sm:$0xff]  ;;  %v3270_v55 = vld [vmem:[#allocation20 + $0x50] sm:$0xff] }
 0x10a   :  { %4185 = vst [vmem:[#allocation223_spill] sm:$0xff] %v3266_v8  ;;  %4186 = vst [vmem:[#allocation224_spill] sm:$0xff] %v3268_v60  ;;  %v3272_v5 = vld [vmem:[#allocation20 + $0x58] sm:$0xff]  ;;  %v3274_v63 = vld [vmem:[#allocation20 + $0x60] sm:$0xff] }
 0x10b   :  { %4187 = vst [vmem:[#allocation225_spill] sm:$0xff] %v3270_v55  ;;  %4188 = vst [vmem:[#allocation226_spill] sm:$0xff] %v3272_v5  ;;  %v3276_v58 = vld [vmem:[#allocation20 + $0x68] sm:$0xff]  ;;  %v3278_v53 = vld [vmem:[#allocation20 + $0x70] sm:$0xff] }
 0x10c   :  { %4189 = vst [vmem:[#allocation227_spill] sm:$0xff] %v3274_v63  ;;  %4190 = vst [vmem:[#allocation228_spill] sm:$0xff] %v3276_v58  ;;  %v3280_v15 = vld [vmem:[#allocation20 + $0x78] sm:$0xff]  ;;  %v3282_v61 = vld [vmem:[#allocation20 + $0x80] sm:$0xff] }
 0x10d   :  { %4191 = vst [vmem:[#allocation229_spill] sm:$0xff] %v3278_v53  ;;  %4192 = vst [vmem:[#allocation230_spill] sm:$0xff] %v3280_v15  ;;  %v3284_v56 = vld [vmem:[#allocation20 + $0x88] sm:$0xff]  ;;  %v3286_v10 = vld [vmem:[#allocation20 + $0x90] sm:$0xff] }
 0x10e   :  { %4193 = vst [vmem:[#allocation231_spill] sm:$0xff] %v3282_v61  ;;  %4194 = vst [vmem:[#allocation232_spill] sm:$0xff] %v3284_v56  ;;  %v3288_v8 = vld [vmem:[#allocation20 + $0x98] sm:$0xff]  ;;  %v3290_v60 = vld [vmem:[#allocation20 + $0xa0] sm:$0xff] }
 0x10f   :  { %4195 = vst [vmem:[#allocation233_spill] sm:$0xff] %v3286_v10  ;;  %4196 = vst [vmem:[#allocation234_spill] sm:$0xff] %v3288_v8  ;;  %v3292_v55 = vld [vmem:[#allocation20 + $0xa8] sm:$0xff]  ;;  %v3294_v5 = vld [vmem:[#allocation20 + $0xb0] sm:$0xff] }
 0x110   :  { %4197 = vst [vmem:[#allocation235_spill] sm:$0xff] %v3290_v60  ;;  %4198 = vst [vmem:[#allocation236_spill] sm:$0xff] %v3292_v55  ;;  %v3296_v63 = vld [vmem:[#allocation20 + $0xb8] sm:$0xff]  ;;  %v3298_v58 = vld [vmem:[#allocation20 + $0xc0] sm:$0xff] }
 0x111   :  { %4199 = vst [vmem:[#allocation237_spill] sm:$0xff] %v3294_v5  ;;  %4200 = vst [vmem:[#allocation238_spill] sm:$0xff] %v3296_v63  ;;  %v3300_v53 = vld [vmem:[#allocation20 + $0xc8] sm:$0xff]  ;;  %v3302_v15 = vld [vmem:[#allocation20 + $0xd0] sm:$0xff] }
 0x112   :  { %4201 = vst [vmem:[#allocation239_spill] sm:$0xff] %v3298_v58  ;;  %4202 = vst [vmem:[#allocation240_spill] sm:$0xff] %v3300_v53  ;;  %v3304_v61 = vld [vmem:[#allocation20 + $0xd8] sm:$0xff]  ;;  %v3306_v56 = vld [vmem:[#allocation20 + $0xe0] sm:$0xff] }
 0x113   :  { %4203 = vst [vmem:[#allocation241_spill] sm:$0xff] %v3302_v15  ;;  %4204 = vst [vmem:[#allocation242_spill] sm:$0xff] %v3304_v61  ;;  %v3308_v10 = vld [vmem:[#allocation20 + $0xe8] sm:$0xff]  ;;  %v3310_v8 = vld [vmem:[#allocation20 + $0xf0] sm:$0xff] }
 0x114   :  { %4205 = vst [vmem:[#allocation243_spill] sm:$0xff] %v3306_v56  ;;  %4206 = vst [vmem:[#allocation244_spill] sm:$0xff] %v3308_v10  ;;  %v3312_v60 = vld [vmem:[#allocation20 + $0xf8] sm:$0xff]  ;;  %v3314_v55 = vld [vmem:[#allocation20 + $0x100] sm:$0xff] }
 0x115   :  { %4207 = vst [vmem:[#allocation245_spill] sm:$0xff] %v3310_v8  ;;  %4208 = vst [vmem:[#allocation246_spill] sm:$0xff] %v3312_v60  ;;  %v3316_v5 = vld [vmem:[#allocation20 + $0x108] sm:$0xff]  ;;  %v3318_v63 = vld [vmem:[#allocation20 + $0x110] sm:$0xff] }
 0x116   :  { %4209 = vst [vmem:[#allocation247_spill] sm:$0xff] %v3314_v55  ;;  %4210 = vst [vmem:[#allocation248_spill] sm:$0xff] %v3316_v5  ;;  %v3320_v58 = vld [vmem:[#allocation20 + $0x118] sm:$0xff]  ;;  %v3322_v53 = vld [vmem:[#allocation20 + $0x120] sm:$0xff] }
 0x117   :  { %4211 = vst [vmem:[#allocation249_spill] sm:$0xff] %v3318_v63  ;;  %4212 = vst [vmem:[#allocation250_spill] sm:$0xff] %v3320_v58  ;;  %v3324_v15 = vld [vmem:[#allocation20 + $0x128] sm:$0xff]  ;;  %v3326_v61 = vld [vmem:[#allocation20 + $0x130] sm:$0xff] }
 0x118   :  { %4213 = vst [vmem:[#allocation251_spill] sm:$0xff] %v3322_v53  ;;  %4214 = vst [vmem:[#allocation252_spill] sm:$0xff] %v3324_v15  ;;  %v3328_v56 = vld [vmem:[#allocation20 + $0x138] sm:$0xff]  ;;  %v3330_v10 = vld [vmem:[#allocation20 + $0x140] sm:$0xff] }
 0x119   :  { %4215 = vst [vmem:[#allocation253_spill] sm:$0xff] %v3326_v61  ;;  %4216 = vst [vmem:[#allocation254_spill] sm:$0xff] %v3328_v56  ;;  %v3332_v8 = vld [vmem:[#allocation20 + $0x148] sm:$0xff]  ;;  %v3334_v60 = vld [vmem:[#allocation20 + $0x150] sm:$0xff] }
 0x11a   :  { %4217 = vst [vmem:[#allocation255_spill] sm:$0xff] %v3330_v10  ;;  %4218 = vst [vmem:[#allocation256_spill] sm:$0xff] %v3332_v8  ;;  %v3336_v55 = vld [vmem:[#allocation20 + $0x158] sm:$0xff]  ;;  %v3338_v5 = vld [vmem:[#allocation20 + $0x160] sm:$0xff] }
 0x11b   :  { %4219 = vst [vmem:[#allocation257_spill] sm:$0xff] %v3334_v60  ;;  %4220 = vst [vmem:[#allocation258_spill] sm:$0xff] %v3336_v55  ;;  %v3340_v63 = vld [vmem:[#allocation20 + $0x168] sm:$0xff]  ;;  %v3342_v58 = vld [vmem:[#allocation20 + $0x170] sm:$0xff] }
 0x11c   :  { %4221 = vst [vmem:[#allocation259_spill] sm:$0xff] %v3338_v5  ;;  %4222 = vst [vmem:[#allocation260_spill] sm:$0xff] %v3340_v63  ;;  %v3344_v53 = vld [vmem:[#allocation20 + $0x178] sm:$0xff]  ;;  %v3349_v61 = vld [vmem:[%s3974_s14] sm:$0x7] }
 0x11d   :  { %4223 = vst [vmem:[#allocation261_spill] sm:$0xff] %v3342_v58  ;;  %4224 = vst [vmem:[#allocation262_spill] sm:$0xff] %v3344_v53  ;;  %v3354_v8 = vld [vmem:[%s3975_s15] sm:$0x7]  ;;  %v3356_v15 = vld [vmem:[#allocation22] sm:$0xff] }
 0x11e   :  { %4225 = vst [vmem:[#allocation263_spill] sm:$0xff] %v3349_v61  ;;  %4226 = vst [vmem:[#allocation264_spill] sm:$0xff] %v3354_v8  ;;  %v3358_v56 = vld [vmem:[#allocation22 + $0x8] sm:$0xff]  ;;  %v3360_v5 = vld [vmem:[#allocation22 + $0x10] sm:$0xff] }
 0x11f   :  { %4227 = vst [vmem:[#allocation265_spill] sm:$0xff] %v3356_v15  ;;  %4228 = vst [vmem:[#allocation266_spill] sm:$0xff] %v3358_v56  ;;  %v3362_v10 = vld [vmem:[#allocation22 + $0x18] sm:$0xff]  ;;  %v3364_v60 = vld [vmem:[#allocation22 + $0x20] sm:$0xff] }
 0x120   :  { %4229 = vst [vmem:[#allocation267_spill] sm:$0xff] %v3360_v5  ;;  %4230 = vst [vmem:[#allocation268_spill] sm:$0xff] %v3362_v10  ;;  %v3366_v53 = vld [vmem:[#allocation22 + $0x28] sm:$0xff]  ;;  %v3368_v55 = vld [vmem:[#allocation22 + $0x30] sm:$0xff] }
 0x121   :  { %4231 = vst [vmem:[#allocation269_spill] sm:$0xff] %v3364_v60  ;;  %4232 = vst [vmem:[#allocation270_spill] sm:$0xff] %v3366_v53  ;;  %v3370_v61 = vld [vmem:[#allocation22 + $0x38] sm:$0xff]  ;;  %v3372_v63 = vld [vmem:[#allocation22 + $0x40] sm:$0xff] }
 0x122   :  { %4233 = vst [vmem:[#allocation271_spill] sm:$0xff] %v3368_v55  ;;  %4234 = vst [vmem:[#allocation272_spill] sm:$0xff] %v3370_v61  ;;  %v3374_v58 = vld [vmem:[#allocation22 + $0x48] sm:$0xff]  ;;  %v3376_v8 = vld [vmem:[#allocation22 + $0x50] sm:$0xff]  ;;  %v3393_v55 = vmov 0.0   ;;  %v3395_v61 = vmov 0.0  }
 0x123   :  { %4235 = vst [vmem:[#allocation273_spill] sm:$0xff] %v3372_v63  ;;  %v3378_v15 = vld [vmem:[#allocation22 + $0x58] sm:$0xff]  ;;  %v3380_v56 = vld [vmem:[#allocation22 + $0x60] sm:$0xff]  ;;  %v3382_v5 = vld [vmem:[#allocation22 + $0x68] sm:$0xff] }
 0x124   :  { %v3384_v10 = vld [vmem:[#allocation22 + $0x70] sm:$0xff]  ;;  %v3386_v60 = vld [vmem:[#allocation22 + $0x78] sm:$0xff]  ;;  %v3391_v53 = vld [vmem:[%s3977_s17] ss:$0 sm:$0xff] }
 0x125 LB: > { %v3984_v63 = vmov 0.0   ;;  %vm2673_vm0 = vmmov 0   ;;  %v4236_v35 = vld [vmem:[#allocation67_spill] sm:$0xff]  ;;  %v4237_v34 = vld [vmem:[#allocation66_spill] sm:$0xff]  ;;  %v4238_v33 = vld [vmem:[#allocation65_spill] sm:$0xff]  ;;  %vm690_vm1 = vcmask 130112   ;;  %s2651_s5 = sphi %s3397_s5, %s504_s5   ;;  %v2647_v61 = vphi %v3395_v61, %v3825_v61   ;;  %v2643_v55 = vphi %v3393_v55, %v1732_v55  }
 0x126   : > { %1976 = vmatprep.subr.mxu0 %v3984_v63  ;;  %2008 = vmatprep.mubr.msk.f32.mxu0 %vm2673_vm0, %v3984_v63  ;;  %v4239_v32 = vld [vmem:[#allocation64_spill] sm:$0xff]  ;;  %v4240_v31 = vld [vmem:[#allocation63_spill] sm:$0xff]  ;;  %v4241_v30 = vld [vmem:[#allocation62_spill] sm:$0xff]  ;;  %vm697_vm2 = vcmask 195712   ;;  %vm704_vm3 = vcmask 261312   ;;  %vm711_vm4 = vcmask 326912  }
 0x127   : > { %1977 = vmatpush3.msra.mxu0 %v4236_v35  ;;  %2011 = vmatprep.subr.mxu1 %v3984_v63  ;;  %v4242_v29 = vld [vmem:[#allocation61_spill] sm:$0xff]  ;;  %v4243_v28 = vld [vmem:[#allocation60_spill] sm:$0xff]  ;;  %v4244_v27 = vld [vmem:[#allocation59_spill] sm:$0xff]  ;;  %vm737_vm5 = vcmask 1041409   ;;  %vm740_vm6 = vcmask 320512   ;;  %s1849_s17 = sshll.u32 %s2651_s5, 1 }
 0x128   : > { %1978 = vmatprep.subr.mxu0 %v3984_v63  ;;  %2012 = vmatpush3.msra.mxu1 %v2948_v52  ;;  %v4245_v26 = vld [vmem:[#allocation58_spill] sm:$0xff]  ;;  %v4246_v25 = vld [vmem:[#allocation57_spill] sm:$0xff]  ;;  %v4247_v24 = vld [vmem:[#allocation56_spill] sm:$0xff]  ;;  %s508_s7 = scalar_lea.vmem [#allocation2], %s1849_s17  ;;  %s1809_s26 = scalar_lea.vmem [#allocation23], %s1849_s17 }
 0x129   : > { %1979 = vmatpush3.msra.mxu0 %v4237_v34  ;;  %2013 = vmatprep.subr.mxu1 %v3984_v63  ;;  %v4248_v23 = vld [vmem:[#allocation55_spill] sm:$0xff]  ;;  %v4249_v22 = vld [vmem:[#allocation54_spill] sm:$0xff]  ;;  %v4251_v21 = vld [vmem:[#allocation53_spill] sm:$0xff]  ;;  %s504_s5 = sadd.s32 1, %s2651_s5  }
 0x12a   : > { %1980 = vmatprep.subr.mxu0 %v3984_v63  ;;  %2014 = vmatpush3.msra.mxu1 %v2946_v51  ;;  %v4250_v39 = vld [vmem:[#allocation71_spill] sm:$0xff]  ;;  %v4252_v38 = vld [vmem:[#allocation70_spill] sm:$0xff]  ;;  %v4253_v20 = vld [vmem:[#allocation52_spill] sm:$0xff]  ;;  %p501_p9 = scmp.ge.s32.totalorder %s504_s5, 39  }
 0x12b   : > { %1981 = vmatpush3.msra.mxu0 %v4238_v33  ;;  %2015 = vmatprep.subr.mxu1 %v3984_v63  ;;  %v4254_v37 = vld [vmem:[#allocation69_spill] sm:$0xff]  ;;  %v4255_v12 = vld [vmem:[#allocation115_spill] sm:$0xff]  ;;  %v4258_v11 = vld [vmem:[#allocation110_spill] sm:$0xff]  ;;  %s2676_s29 = smov (%p501_p9), [#allocation23]  }
 0x12c   : > { %1982 = vmatprep.subr.mxu0 %v3984_v63  ;;  %2016 = vmatpush3.msra.mxu1 %v2944_v50  ;;  %v4256_v13 = vld [vmem:[#allocation113_spill] sm:$0xff]  ;;  %v4257_v14 = vld [vmem:[#allocation111_spill] sm:$0xff]  ;;  %v4259_v36 = vld [vmem:[#allocation108_spill] sm:$0xff]  ;;  %s1816_s4 = sshll.u32 (%p501_p9), %s2676_s29, 4  ;;  %s1817_s4 = int_to_ptr.vmem [resolvable:$true] %s1816_s4 }
 0x12d   : > { %1983 = vmatpush3.msra.mxu0 %v4239_v32  ;;  %2017 = vmatprep.subr.mxu1 %v3984_v63  ;;  %v4260_v16 = vld [vmem:[#allocation107_spill] sm:$0xff]  ;;  %v4261_v0 = vld [vmem:[#allocation105_spill] sm:$0xff]  ;;  %v4262_v17 = vld [vmem:[#allocation104_spill] sm:$0xff]  ;;  %s2593_s28 = scalar_lea.vmem (%p501_p9), %s1817_s4, 1248  ;;  %p2598_p11 = scmp.lt.s32.totalorder (%p501_p9), %s1817_s4, %s1817_s4 }
 0x12e   : > { %1984 = vmatprep.subr.mxu0 %v3984_v63  ;;  %2018 = vmatpush3.msra.mxu1 %v2942_v49  ;;  %v4263_v6 = vld [vmem:[#allocation102_spill] sm:$0xff]  ;;  %v4264_v18 = vld [vmem:[#allocation101_spill] sm:$0xff]  ;;  %v4265_v4 = vld [vmem:[#allocation99_spill] sm:$0xff]  ;;  %p2594_p10 = scmp.ne.s32.totalorder (%p501_p9), %s1817_s4, %s2593_s28  ;;  %p2599_p12 = scmp.lt.s32.totalorder (%p501_p9), %s2593_s28, %s2593_s28 }
 0x12f   : > { %1985 = vmatpush3.msra.mxu0 %v4240_v31  ;;  %2019 = vmatprep.subr.mxu1 %v3984_v63  ;;  %v4266_v19 = vld [vmem:[#allocation98_spill] sm:$0xff]  ;;  %v4267_v7 = vld [vmem:[#allocation96_spill] sm:$0xff]  ;;  %v4268_v1 = vld [vmem:[#allocation95_spill] sm:$0xff] }
 0x130   : > { %1986 = vmatprep.subr.mxu0 %v3984_v63  ;;  %2020 = vmatpush3.msra.mxu1 %v2940_v48  ;;  %v4269_v9 = vld [vmem:[#allocation93_spill] sm:$0xff]  ;;  %v4270_v2 = vld [vmem:[#allocation92_spill] sm:$0xff]  ;;  %v4271_v3 = vld [vmem:[#allocation90_spill] sm:$0xff]  ;;  %p2600_p13 = por (%p501_p9), %p2599_p12, %p2598_p11 }
 0x131   : > { %1987 = vmatpush3.msra.mxu0 %v4241_v30  ;;  %2021 = vmatprep.subr.mxu1 %v3984_v63 }
 0x132   : > { %1988 = vmatprep.subr.mxu0 %v3984_v63  ;;  %2022 = vmatpush3.msra.mxu1 %v2938_v47  ;;  %p2601_p0 = pnand (%p501_p9), %p2600_p13, %p2594_p10 }
 0x133   : > { %1989 = vmatpush3.msra.mxu0 %v4242_v29  ;;  %2023 = vmatprep.subr.mxu1 %v3984_v63 }
 0x134   : > { %1990 = vmatprep.subr.mxu0 %v3984_v63  ;;  %2024 = vmatpush3.msra.mxu1 %v2936_v46 }
 0x135   : > { %1991 = vmatpush3.msra.mxu0 %v4243_v28  ;;  %2025 = vmatprep.subr.mxu1 %v3984_v63 }
 0x136   : > { %1992 = vmatprep.subr.mxu0 %v3984_v63  ;;  %2026 = vmatpush3.msra.mxu1 %v2934_v45 }
 0x137   : > { %1993 = vmatpush3.msra.mxu0 %v4244_v27  ;;  %2027 = vmatprep.subr.mxu1 %v3984_v63 }
 0x138   : > { %1994 = vmatprep.subr.mxu0 %v3984_v63  ;;  %2028 = vmatpush3.msra.mxu1 %v2932_v44 }
 0x139   : > { %1995 = vmatpush3.msra.mxu0 %v4245_v26  ;;  %2029 = vmatprep.subr.mxu1 %v3984_v63 }
 0x13a   : > { %1996 = vmatprep.subr.mxu0 %v3984_v63  ;;  %2030 = vmatpush3.msra.mxu1 %v2930_v43 }
 0x13b   : > { %1997 = vmatpush3.msra.mxu0 %v4246_v25  ;;  %2031 = vmatprep.subr.mxu1 %v3984_v63 }
 0x13c   : > { %1998 = vmatprep.subr.mxu0 %v3984_v63  ;;  %2032 = vmatpush3.msra.mxu1 %v2928_v42 }
 0x13d   : > { %1999 = vmatpush3.msra.mxu0 %v4247_v24  ;;  %2033 = vmatprep.subr.mxu1 %v3984_v63 }
 0x13e   : > { %2000 = vmatprep.subr.mxu0 %v3984_v63  ;;  %2034 = vmatpush3.msra.mxu1 %v2926_v41 }
 0x13f   : > { %2001 = vmatpush3.msra.mxu0 %v4248_v23  ;;  %2035 = vmatprep.subr.mxu1 %v3984_v63 }
 0x140   : > { %2002 = vmatprep.subr.mxu0 %v3984_v63  ;;  %2036 = vmatpush3.msra.mxu1 %v2924_v40 }
 0x141   : > { %2003 = vmatpush3.msra.mxu0 %v4249_v22  ;;  %2037 = vmatprep.subr.mxu1 %v3984_v63 }
 0x142   : > { %2004 = vmatprep.subr.mxu0 %v3984_v63  ;;  %2038 = vmatpush3.msra.mxu1 %v4250_v39 }
 0x143   : > { %2005 = vmatpush3.msra.mxu0 %v4251_v21  ;;  %2039 = vmatprep.subr.mxu1 %v3984_v63  ;;  %v4288_v21 = vld [vmem:[#allocation44_spill] sm:$0xff] }
 0x144   : > { %2006 = vmatprep.subr.mxu0 %v3984_v63  ;;  %2040 = vmatpush3.msra.mxu1 %v4252_v38 }
 0x145   : > { %2007 = vmatpush3.msra.mxu0 %v4253_v20  ;;  %2041 = vmatprep.subr.mxu1 %v3984_v63  ;;  %v4287_v20 = vld [vmem:[#allocation48_spill] sm:$0xff] }
 0x146   : > { %2009 = vmatmul.mubr.f32.vlgmr.msra.gmra.mxu0 %v2643_v55  ;;  %2042 = vmatpush3.msra.mxu1 %v4254_v37 }
 0x147   : > { %2043 = vmatprep.mubr.msk.f32.mxu1 %vm2673_vm0, %v3984_v63  ;;  %1079 = vmatprep.subr.mxu0 %v4255_v12  ;;  %v4282_v12 = vld [vmem:[#allocation73_spill] sm:$0xff] }
 0x148   : > { %1080 = vmatpush1.msra.mxu0 %v3042_v57  ;;  %2046 = vmatprep.subr.mxu1 %v3984_v63 }
 0x149   : > { %1081 = vmatprep.subr.mxu0 %v4256_v13  ;;  %1143 = vmatprep.mubr.f32.mxu0 %v3984_v63  ;;  %v4272_v63 = vld [vmem:[#allocation88_spill] sm:$0xff]  ;;  %v3986_v13 = vlaneseq }
 0x14a   : > { %1082 = vmatpush1.msra.mxu0 %v3036_v54 }
 0x14b   : > { %1083 = vmatprep.subr.mxu0 %v4257_v14 }
 0x14c   : > { %1084 = vmatpush1.msra.mxu0 %v4258_v11  ;;  %v4280_v11 = vld [vmem:[#allocation76_spill] sm:$0xff] }
 0x14d   : > { %1085 = vmatprep.subr.mxu0 %v4259_v36 }
 0x14e   : > { %1086 = vmatpush1.msra.mxu0 %v4260_v16 }
 0x14f   : > { %1087 = vmatprep.subr.mxu0 %v4261_v0  ;;  %v4273_v0 = vld [vmem:[#allocation86_spill] sm:$0xff] }
 0x150   : > { %1088 = vmatpush1.msra.mxu0 %v4262_v17  ;;  %v4284_v17 = vld [vmem:[#allocation42_spill] sm:$0xff] }
 0x151   : > { %1089 = vmatprep.subr.mxu0 %v4263_v6  ;;  %v4275_v6 = vld [vmem:[#allocation83_spill] sm:$0xff] }
 0x152   : > { %1090 = vmatpush1.msra.mxu0 %v4264_v18  ;;  %v4285_v18 = vld [vmem:[#allocation43_spill] sm:$0xff] }
 0x153   : > { %1091 = vmatprep.subr.mxu0 %v4265_v4  ;;  %v4274_v4 = vld [vmem:[#allocation85_spill] sm:$0xff] }
 0x154   : > { %1092 = vmatpush1.msra.mxu0 %v4266_v19  ;;  %v4286_v19 = vld [vmem:[#allocation47_spill] sm:$0xff] }
 0x155   : > { %1093 = vmatprep.subr.mxu0 %v4267_v7  ;;  %v4276_v7 = vld [vmem:[#allocation82_spill] sm:$0xff] }
 0x156   : > { %1094 = vmatpush1.msra.mxu0 %v4268_v1  ;;  %v4277_v1 = vld [vmem:[#allocation80_spill] sm:$0xff] }
 0x157   : > { %1095 = vmatprep.subr.mxu0 %v4269_v9  ;;  %v4278_v9 = vld [vmem:[#allocation79_spill] sm:$0xff] }
 0x158   : > { %1096 = vmatpush1.msra.mxu0 %v4270_v2  ;;  %v4279_v2 = vld [vmem:[#allocation77_spill] sm:$0xff] }
 0x159   : > { %1097 = vmatprep.subr.mxu0 %v2990_v62 }
 0x15a   : > { %1098 = vmatpush1.msra.mxu0 %v4271_v3  ;;  %v4281_v3 = vld [vmem:[#allocation74_spill] sm:$0xff] }
 0x15b   : > { %1099 = vmatprep.subr.mxu0 %v2984_v59 }
 0x15c   : > { %1100 = vmatpush1.msra.mxu0 %v4272_v63  ;;  %v4283_v63 = vld [vmem:[#allocation163_spill] sm:$0xff] }
 0x15d   : > { %1101 = vmatprep.subr.mxu0 %v4273_v0  ;;  %v2674_v0 = vmov 1966171168  }
 0x15e   : > { %1102 = vmatpush1.msra.mxu0 %v4274_v4  ;;  %v582_v4 = vunpack.c.l.s4 %v2674_v0 }
 0x15f   : > { %1103 = vmatprep.subr.mxu0 %v4275_v6 }
 0x160   : > { %1104 = vmatpush1.msra.mxu0 %v4276_v7  ;;  %v583_v6 = vunpack.c.0.s8 %v582_v4  ;;  %v3513_v7 = vshrl.u32 %v3986_v13, 7 }
 0x161   : > { %1105 = vmatprep.subr.mxu0 %v4277_v1 }
 0x162   : > { %1106 = vmatpush1.msra.mxu0 %v4278_v9  ;;  %v586_v1 = vsub.s32 %v583_v6, %v3513_v7 }
 0x163   : > { %1107 = vmatprep.subr.mxu0 %v4279_v2  ;;  %v3517_v2 = vsub.s32 0, %v3513_v7 }
 0x164   : > { %1108 = vmatpush1.msra.mxu0 %v4280_v11 }
 0x165   : > { %1109 = vmatprep.subr.mxu0 %v4281_v3 }
 0x166   : > { %1110 = vmatpush1.msra.mxu0 %v4282_v12 }
 0x167   : > { %1236 = vmatprep.subr.mxu0 %v4283_v63 }
 0x206   : > { %v576_v9 = vpop.f32.mrf.mxu0 }
 0x207   : > { %v587_v14 = vrot.slane %v576_v9, %v586_v1 }
 0x208   : > { %v2010_v11 = vpop.f32.mrf.mxu0 }
 0x209   : > { %v588_v3 = vcombine.high %v587_v14, %v587_v14  ;;  %v595_v16 = vrot.slane %v587_v14, %v586_v1  ;;  %v4289_v14 = vld [vmem:[#allocation49_spill] sm:$0xff] }
 0x20b   : > { %v602_v12 = vrot.slane %v588_v3, %v586_v1  ;;  %v606_v63 = vrot.slane %v595_v16, %v3517_v2  ;;  %v4290_v16 = vld [vmem:[#allocation45_spill] sm:$0xff] }
 0x20d   : > { %v610_v0 = vrot.slane %v602_v12, %v3517_v2  ;;  %v613_v4 = vadd.f32 %v606_v63, %v4284_v17  ;;  %v614_v13 = vadd.f32 %v606_v63, %v4285_v18  ;;  %v615_v11 = vadd.f32 %v606_v63, %v4288_v21  ;;  %v4291_v12 = vld [vmem:[#allocation50_spill] sm:$0xff] }
 0x20e   : > { %v616_v3 = vadd.f32 %v606_v63, %v4290_v16  ;;  %v4292_v18 = vld [vmem:[#allocation46_spill] sm:$0xff] }
 0x20f   : > { %2271 = vtanh.f32 %v613_v4  ;;  %v618_v6 = vadd.f32 %v610_v0, %v4286_v19  ;;  %v619_v9 = vadd.f32 %v610_v0, %v4287_v20  ;;  %v620_v1 = vadd.f32 %v610_v0, %v4289_v14  ;;  %v4293_v19 = vld [vmem:[#allocation51_spill] sm:$0xff] }
 0x210   : > { %2273 = vtanh.f32 %v614_v13  ;;  %v621_v17 = vadd.f32 %v610_v0, %v4291_v12  ;;  %v617_v4 = vadd.f32 %v606_v63, %v4292_v18  ;;  %v622_v22 = vadd.f32 %v610_v0, %v4293_v19 }
 0x211   : > { %2275 = vtanh.f32 %v618_v6  ;;  %v4294_v6 = vld [vmem:[#allocation68_spill] sm:$0xff] }
 0x212   : > { %2277 = vtanh.f32 %v619_v9 }
 0x213   : > { %2279 = vtanh.f32 %v615_v11 }
 0x214   : > { %2281 = vtanh.f32 %v620_v1 }
 0x215   : > { %2283 = vtanh.f32 %v616_v3 }
 0x216   : > { %2285 = vtanh.f32 %v621_v17 }
 0x217   : > { %2287 = vtanh.f32 %v617_v4 }
 0x218   : > { %2289 = vtanh.f32 %v622_v22 }
 0x21c   : > { %v2272_v20 = vpop.eup %2271 }
 0x21d   : > { %v2274_v13 = vpop.eup %2273  ;;  %v639_v23 = vmul.f32 %v2272_v20, %v4294_v6 }
 0x21e   : > { %v2276_v21 = vpop.eup %2275  ;;  %v640_v14 = vmul.f32 %v2274_v13, %v4294_v6 }
 0x21f   : > { %649 = vadd.xlane.f32.xlu0 %v639_v23  ;;  %v644_v9 = vmul.f32 %v2276_v21, %v4294_v6  ;;  %v2278_v11 = vpop.eup %2277 }
 0x220   : > { %v2280_v1 = vpop.eup %2279  ;;  %v645_v63 = vmul.f32 %v2278_v11, %v4294_v6 }
 0x221   : > { %659 = vadd.xlane.f32.xlu1 %v644_v9  ;;  %v2282_v16 = vpop.eup %2281  ;;  %v641_v0 = vmul.f32 %v2280_v1, %v4294_v6  ;;  %v4295_v9 = vlaneseq }
 0x222   : > { %v2284_v3 = vpop.eup %2283  ;;  %v646_v12 = vmul.f32 %v2282_v16, %v4294_v6 }
 0x223   : > { %651 = vadd.xlane.f32.xlu0 %v640_v14  ;;  %v2286_v23 = vpop.eup %2285  ;;  %v642_v22 = vmul.f32 %v2284_v3, %v4294_v6  ;;  %v680_v11 = vand.u32 127, %v4295_v9 }
 0x224   : > { %v2288_v17 = vpop.eup %2287  ;;  %v647_v18 = vmul.f32 %v2286_v23, %v4294_v6 }
 0x225   : > { %661 = vadd.xlane.f32.xlu1 %v645_v63  ;;  %v2290_v4 = vpop.eup %2289  ;;  %v643_v19 = vmul.f32 %v2288_v17, %v4294_v6  ;;  %v685_v1 = vadd.s32 4294967288, %v680_v11  ;;  %v692_v16 = vadd.s32 4294967280, %v680_v11  ;;  %v699_v3 = vadd.s32 4294967272, %v680_v11 }
 0x226   : > { %v648_v20 = vmul.f32 %v2290_v4, %v4294_v6 }
 0x227   : > { %653 = vadd.xlane.f32.xlu0 %v641_v0  ;;  %v3543_v23 = vsub.s32 %v685_v1, %v3513_v7  ;;  %v3546_v17 = vsub.s32 %v692_v16, %v3513_v7  ;;  %v3552_v4 = vsub.s32 %v699_v3, %v3513_v7 }
 0x229   : > { %663 = vadd.xlane.f32.xlu1 %v646_v12  ;;  %v706_v12 = vadd.s32 4294967264, %v680_v11 }
 0x22b   : > { %655 = vadd.xlane.f32.xlu0 %v642_v22 }
 0x22d   : > { %665 = vadd.xlane.f32.xlu1 %v647_v18  ;;  %v3549_v18 = vsub.s32 %v680_v11, %v3513_v7 }
 0x22f   : > { %657 = vadd.xlane.f32.xlu0 %v643_v19 }
 0x231   : > { %667 = vadd.xlane.f32.xlu1 %v648_v20  ;;  %v3555_v20 = vsub.s32 %v706_v12, %v3513_v7 }
 0x2a8   : > { %v650_v13 = vpop.xlane.xlu0 %649 }
 0x2a9   : > { %v684_v24 = vrot.slane %v650_v13, %v3549_v18 }
 0x2aa   : > { %v660_v21 = vpop.xlane.xlu1 %659 }
 0x2ab   : > { %v716_v3 = vrot.slane %v660_v21, %v3549_v18 }
 0x2ac   : > { %v652_v14 = vpop.xlane.xlu0 %651 }
 0x2ad   : > { %v689_v9 = vrot.slane %v652_v14, %v3543_v23 }
 0x2ae   : > { %v662_v63 = vpop.xlane.xlu1 %661 }
 0x2af   : > { %v720_v6 = vrot.slane %v662_v63, %v3543_v23  ;;  %v691_v28 = vsel %vm690_vm1, %v689_v9, %v684_v24 }
 0x2b0   : > { %v654_v0 = vpop.xlane.xlu0 %653 }
 0x2b1   : > { %v696_v16 = vrot.slane %v654_v0, %v3546_v17  ;;  %v721_v29 = vsel %vm690_vm1, %v720_v6, %v716_v3 }
 0x2b2   : > { %v664_v22 = vpop.xlane.xlu1 %663 }
 0x2b3   : > { %v725_v11 = vrot.slane %v664_v22, %v3546_v17  ;;  %v698_v31 = vsel %vm697_vm2, %v696_v16, %v691_v28  ;;  %v2675_v28 = vmov 0  }
 0x2b4   : > { %v656_v19 = vpop.xlane.xlu0 %655  ;;  %2270 = vset.pattern.permute.xlu0 %v2675_v28  ;;  %2269 = vset.pattern.permute.xlu1 %v2675_v28 }
 0x2b5   : > { %v703_v25 = vrot.slane %v656_v19, %v3552_v4  ;;  %v726_v32 = vsel %vm697_vm2, %v725_v11, %v721_v29  ;;  %v3581_v29 = vsub.s32 1, %v3513_v7 }
 0x2b6   : > { %v3559_v1 = vpop.xlane.xlu1 %665 }
 0x2b7   : > { %v730_v12 = vrot.slane %v3559_v1, %v3552_v4  ;;  %v705_v34 = vsel %vm704_vm3, %v703_v25, %v698_v31 }
 0x2b8   : > { %v658_v26 = vpop.xlane.xlu0 %657 }
 0x2b9   : > { %v710_v27 = vrot.slane %v658_v26, %v3555_v20  ;;  %v731_v35 = vsel %vm704_vm3, %v730_v12, %v726_v32 }
 0x2ba   : > { %v668_v30 = vpop.xlane.xlu1 %667 }
 0x2bb   : > { %v735_v33 = vrot.slane %v668_v30, %v3555_v20  ;;  %v712_v36 = vsel %vm711_vm4, %v710_v27, %v705_v34 }
 0x2bd   : > { %v736_v24 = vsel %vm711_vm4, %v735_v33, %v731_v35 }
 0x2be   : > { %v738_v6 = vsel %vm737_vm5, %v736_v24, %v712_v36 }
 0x2bf   : > { %v741_v9 = vsel %vm740_vm6, %v738_v6, -inf }
 0x2c0   : > { %742 = vmax.xlane.f32.xlu0 %v741_v9 }
 0x349   : > { %v743_v16 = vpop.xlane.xlu0 %742 }
 0x34a   : > { %v748_v25 = vrot.slane %v743_v16, %v3517_v2  ;;  %v752_v31 = vrot.slane %v743_v16, %v3581_v29 }
 0x34c   : > { %v755_v32 = vsub.f32 %v650_v13, %v748_v25  ;;  %v756_v27 = vsub.f32 %v652_v14, %v748_v25  ;;  %v760_v34 = vsub.f32 %v660_v21, %v752_v31  ;;  %v761_v36 = vsub.f32 %v662_v63, %v752_v31 }
 0x34d   : > { %v757_v3 = vsub.f32 %v654_v0, %v748_v25  ;;  %v762_v24 = vsub.f32 %v664_v22, %v752_v31  ;;  %v758_v28 = vsub.f32 %v656_v19, %v748_v25  ;;  %v763_v21 = vsub.f32 %v3559_v1, %v752_v31 }
 0x34e   : > { %v765_v33 = vmul.f32 1.442695, %v755_v32  ;;  %v767_v35 = vmul.f32 1.442695, %v756_v27  ;;  %v775_v11 = vmul.f32 1.442695, %v760_v34  ;;  %v759_v0 = vsub.f32 %v658_v26, %v748_v25 }
 0x34f   : > { %v777_v12 = vmul.f32 1.442695, %v761_v36  ;;  %v769_v6 = vmul.f32 1.442695, %v757_v3  ;;  %v779_v16 = vmul.f32 1.442695, %v762_v24  ;;  %v764_v32 = vsub.f32 %v668_v30, %v752_v31 }
 0x350   : > { %2291 = vpow2.f32 %v765_v33  ;;  %v771_v14 = vmul.f32 1.442695, %v758_v28  ;;  %v781_v22 = vmul.f32 1.442695, %v763_v21  ;;  %v773_v27 = vmul.f32 1.442695, %v759_v0 }
 0x351   : > { %2293 = vpow2.f32 %v767_v35  ;;  %v783_v1 = vmul.f32 1.442695, %v764_v32 }
 0x352   : > { %2295 = vpow2.f32 %v775_v11 }
 0x353   : > { %2297 = vpow2.f32 %v777_v12 }
 0x354   : > { %2299 = vpow2.f32 %v769_v6 }
 0x355   : > { %2301 = vpow2.f32 %v779_v16 }
 0x356   : > { %2303 = vpow2.f32 %v771_v14 }
 0x357   : > { %2305 = vpow2.f32 %v781_v22 }
 0x358   : > { %2307 = vpow2.f32 %v773_v27 }
 0x359   : > { %2309 = vpow2.f32 %v783_v1 }
 0x35d   : > { %v3585_v9 = vpop.eup %2291 }
 0x35e   : > { %v3587_v13 = vpop.eup %2293  ;;  %796 = vperm.xlu1 %2269, %v3585_v9  }
 0x35f   : > { %799 = vperm.xlu0 %2270, %v3587_v13   ;;  %v3592_v63 = vpop.eup %2295 }
 0x360   : > { %v3595_v19 = vpop.eup %2297 }
 0x361   : > { %v2300_v34 = vpop.eup %2299 }
 0x362   : > { %811 = vperm.xlu1 %2269, %v3592_v63   ;;  %v2302_v33 = vpop.eup %2301 }
 0x363   : > { %v2304_v35 = vpop.eup %2303 }
 0x364   : > { %v2306_v36 = vpop.eup %2305 }
 0x365   : > { %v2308_v26 = vpop.eup %2307 }
 0x366   : > { %814 = vperm.xlu1 %2269, %v3595_v19   ;;  %v2310_v25 = vpop.eup %2309 }
 0x36a   : > { %802 = vperm.xlu1 %2269, %v2300_v34  }
 0x36e   : > { %817 = vperm.xlu1 %2269, %v2302_v33  }
 0x372   : > { %805 = vperm.xlu1 %2269, %v2304_v35  }
 0x376   : > { %820 = vperm.xlu1 %2269, %v2306_v36  }
 0x37a   : > { %808 = vperm.xlu1 %2269, %v2308_v26  }
 0x37e   : > { %823 = vperm.xlu1 %2269, %v2310_v25  }
 0x3d9   : > { %v797_v11 = vpop.permute.xlu1 %796 }
 0x3da   : > { %v800_v28 = vpop.permute.xlu0 %799  ;;  %v828_v21 = vrot.slane %v797_v11, %v3549_v18 }
 0x3db   : > { %v832_v16 = vrot.slane %v800_v28, %v3543_v23 }
 0x3dd   : > { %v812_v3 = vpop.permute.xlu1 %811  ;;  %v833_v39 = vsel %vm690_vm1, %v832_v16, %v828_v21 }
 0x3de   : > { %v852_v27 = vrot.slane %v812_v3, %v3549_v18 }
 0x3e1   : > { %v815_v30 = vpop.permute.xlu1 %814 }
 0x3e2   : > { %v856_v14 = vrot.slane %v815_v30, %v3543_v23 }
 0x3e4   : > { %v857_v28 = vsel %vm690_vm1, %v856_v14, %v852_v27 }
 0x3e5   : > { %v803_v31 = vpop.permute.xlu1 %802 }
 0x3e6   : > { %v837_v22 = vrot.slane %v803_v31, %v3546_v17 }
 0x3e8   : > { %v838_v23 = vsel %vm697_vm2, %v837_v22, %v833_v39 }
 0x3e9   : > { %v818_v12 = vpop.permute.xlu1 %817 }
 0x3ea   : > { %v861_v32 = vrot.slane %v818_v12, %v3546_v17 }
 0x3ec   : > { %v862_v30 = vsel %vm697_vm2, %v861_v32, %v857_v28 }
 0x3ed   : > { %v806_v24 = vpop.permute.xlu1 %805 }
 0x3ee   : > { %v842_v1 = vrot.slane %v806_v24, %v3552_v4 }
 0x3f0   : > { %v843_v17 = vsel %vm704_vm3, %v842_v1, %v838_v23 }
 0x3f1   : > { %v821_v6 = vpop.permute.xlu1 %820 }
 0x3f2   : > { %v866_v37 = vrot.slane %v821_v6, %v3552_v4 }
 0x3f4   : > { %v867_v18 = vsel %vm704_vm3, %v866_v37, %v862_v30 }
 0x3f5   : > { %v809_v0 = vpop.permute.xlu1 %808 }
 0x3f6   : > { %v847_v38 = vrot.slane %v809_v0, %v3555_v20 }
 0x3f8   : > { %v848_v3 = vsel %vm711_vm4, %v847_v38, %v843_v17 }
 0x3f9   : > { %v824_v11 = vpop.permute.xlu1 %823 }
 0x3fa   : > { %v871_v31 = vrot.slane %v824_v11, %v3555_v20 }
 0x3fc   : > { %v872_v4 = vsel %vm711_vm4, %v871_v31, %v867_v18 }
 0x3fd   : > { %v873_v12 = vsel %vm737_vm5, %v872_v4, %v848_v3  ;;  %v4299_v4 = vld [vmem:[#allocation38_spill] sm:$0xff] }
 0x3fe   : > { %v875_v24 = vsel %vm740_vm6, %v873_v12, 0.0 }
 0x3ff   : > { %876 = vadd.xlane.f32.xlu0 %v875_v24 }
 0x488   : > { %v877_v6 = vpop.xlane.xlu0 %876 }
 0x489   : > { %2311 = vrcp.f32 %v877_v6  ;;  %v4301_v6 = vld [vmem:[#allocation36_spill] sm:$0xff] }
 0x496   : > { %v2312_v39 = vpop.eup %2311 }
 0x497   : > { %v883_v16 = vrot.slane %v2312_v39, %v3517_v2  ;;  %v887_v37 = vrot.slane %v2312_v39, %v3581_v29 }
 0x499   : > { %v894_v21 = vmul.f32 %v2308_v26, %v883_v16  ;;  %v890_v20 = vmul.f32 %v3585_v9, %v883_v16  ;;  %v891_v38 = vmul.f32 %v3587_v13, %v883_v16  ;;  %v895_v14 = vmul.f32 %v3592_v63, %v887_v37  ;;  %v4296_v63 = vld [vmem:[#allocation33_spill] sm:$0xff] }
 0x49a   : > { %v896_v0 = vmul.f32 %v3595_v19, %v887_v37  ;;  %v892_v22 = vmul.f32 %v2300_v34, %v883_v16  ;;  %v897_v32 = vmul.f32 %v2302_v33, %v887_v37  ;;  %v893_v26 = vmul.f32 %v2304_v35, %v883_v16  ;;  %v4297_v19 = vld [vmem:[#allocation32_spill] sm:$0xff]  ;;  %v4298_v34 = vld [vmem:[#allocation34_spill] sm:$0xff]  ;;  %v4302_v16 = vld [vmem:[#allocation37_spill] sm:$0xff] }
 0x49b   : > { %922 = vperm.xlu0 %2270, %v894_v21   ;;  %902 = vperm.xlu1 %2269, %v890_v20   ;;  %v898_v9 = vmul.f32 %v2306_v36, %v887_v37  ;;  %v899_v27 = vmul.f32 %v2310_v25, %v887_v37  ;;  %v4300_v25 = vld [vmem:[#allocation35_spill] sm:$0xff] }
 0x49c   : > { %v4303_v20 = vld [vmem:[#allocation39_spill] sm:$0xff] }
 0x49f   : > { %907 = vperm.xlu1 %2269, %v891_v38  }
 0x4a3   : > { %927 = vperm.xlu1 %2269, %v895_v14  }
 0x4a7   : > { %932 = vperm.xlu1 %2269, %v896_v0  }
 0x4ab   : > { %912 = vperm.xlu1 %2269, %v892_v22  }
 0x4af   : > { %937 = vperm.xlu1 %2269, %v897_v32   ;;  %v4304_v32 = vld [vmem:[#allocation40_spill] sm:$0xff] }
 0x4b3   : > { %917 = vperm.xlu1 %2269, %v893_v26  }
 0x4b7   : > { %942 = vperm.xlu1 %2269, %v898_v9  }
 0x4bb   : > { %947 = vperm.xlu1 %2269, %v899_v27  }
 0x516   : > { %v903_v1 = vpop.permute.xlu1 %902  ;;  %v923_v3 = vpop.permute.xlu0 %922 }
 0x517   : > { %v950_v17 = vmul.f32 %v903_v1, %v4297_v19  ;;  %v954_v39 = vmul.f32 %v923_v3, %v4301_v6  ;;  %v4309_v6 = vld [vmem:[#allocation112_spill] sm:$0xff] }
 0x51a   : > { %v908_v28 = vpop.permute.xlu1 %907 }
 0x51b   : > { %v951_v30 = vmul.f32 %v908_v28, %v4296_v63 }
 0x51d   : > { %v960_v33 = vadd.f32 %v951_v30, %v950_v17 }
 0x51e   : > { %v928_v13 = vpop.permute.xlu1 %927 }
 0x51f   : > { %v955_v21 = vmul.f32 %v928_v13, %v4302_v16  ;;  %v4311_v16 = vld [vmem:[#allocation106_spill] sm:$0xff] }
 0x522   : > { %v933_v11 = vpop.permute.xlu1 %932 }
 0x523   : > { %v956_v36 = vmul.f32 %v933_v11, %v4299_v4 }
 0x525   : > { %v970_v0 = vadd.f32 %v956_v36, %v955_v21  ;;  %v4312_v21 = vld [vmem:[#allocation103_spill] sm:$0xff] }
 0x526   : > { %v913_v23 = vpop.permute.xlu1 %912 }
 0x527   : > { %v952_v18 = vmul.f32 %v913_v23, %v4298_v34  ;;  %v4305_v23 = vld [vmem:[#allocation41_spill] sm:$0xff] }
 0x529   : > { %v961_v12 = vadd.f32 %v960_v33, %v952_v18 }
 0x52a   : > { %v938_v31 = vpop.permute.xlu1 %937 }
 0x52b   : > { %v957_v37 = vmul.f32 %v938_v31, %v4303_v20  ;;  %v4313_v20 = vld [vmem:[#allocation100_spill] sm:$0xff] }
 0x52d   : > { %v971_v9 = vadd.f32 %v970_v0, %v957_v37  ;;  %v4314_v37 = vld [vmem:[#allocation97_spill] sm:$0xff] }
 0x52e   : > { %v918_v35 = vpop.permute.xlu1 %917  ;;  %v4317_v0 = vld [vmem:[#allocation89_spill] sm:$0xff] }
 0x52f   : > { %v953_v24 = vmul.f32 %v918_v35, %v4300_v25  ;;  %v4307_v25 = vmov 0.0  }
 0x531   : > { %v962_v38 = vadd.f32 %v961_v12, %v953_v24  ;;  %v4306_v12 = vld [vmem:[#allocation116_spill] sm:$0xff]  ;;  %v4308_v24 = vld [vmem:[#allocation114_spill] sm:$0xff] }
 0x532   : > { %v943_v14 = vpop.permute.xlu1 %942 }
 0x533   : > { %v963_v22 = vadd.f32 %v962_v38, %v954_v39  ;;  %v958_v26 = vmul.f32 %v943_v14, %v4304_v32  ;;  %v4310_v39 = vld [vmem:[#allocation109_spill] sm:$0xff]  ;;  %v4315_v38 = vld [vmem:[#allocation94_spill] sm:$0xff]  ;;  %v4316_v14 = vld [vmem:[#allocation91_spill] sm:$0xff] }
 0x534   : > { %v4319_v32 = vld [vmem:[#allocation84_spill] sm:$0xff] }
 0x535   : > { %v964_v27 = vrot.slane %v963_v22, 4  ;;  %v972_v11 = vadd.f32 %v971_v9, %v958_v26  ;;  %v4320_v26 = vld [vmem:[#allocation81_spill] sm:$0xff]  ;;  %v4321_v9 = vld [vmem:[#allocation78_spill] sm:$0xff] }
 0x536   : > { %v948_v1 = vpop.permute.xlu1 %947 }
 0x537   : > { %v965_v28 = vadd.f32 %v964_v27, %v963_v22  ;;  %v959_v63 = vmul.f32 %v948_v1, %v4305_v23  ;;  %v4318_v22 = vld [vmem:[#allocation87_spill] sm:$0xff] }
 0x538   : > { %v4322_v27 = vld [vmem:[#allocation75_spill] sm:$0xff] }
 0x539   : > { %v966_v30 = vrot.slane %v965_v28, 2  ;;  %v973_v19 = vadd.f32 %v972_v11, %v959_v63  ;;  %v509_v1 = vld [vmem:[%s508_s7] sm:$0x3]  ;;  %v4323_v63 = vld [vmem:[#allocation72_spill] sm:$0xff] }
 0x53b   : > { %v974_v17 = vrot.slane %v973_v19, 4  ;;  %v967_v13 = vadd.f32 %v966_v30, %v965_v28 }
 0x53d   : > { %v975_v34 = vadd.f32 %v974_v17, %v973_v19  ;;  %v968_v33 = vrot.slane %v967_v13, 1  ;;  %v4324_v17 = vld [vmem:[#allocation162_spill] sm:$0xff] }
 0x53f   : > { %v976_v18 = vrot.slane %v975_v34, 2  ;;  %v969_v35 = vadd.f32 %v968_v33, %v967_v13  ;;  %v4326_v13 = vld [vmem:[#allocation164_spill] sm:$0xff]  ;;  %v4329_v33 = vld [vmem:[#allocation161_spill] sm:$0xff] }
 0x541   : > { %v977_v31 = vadd.f32 %v976_v18, %v975_v34  ;;  %v4325_v34 = vld [vmem:[#allocation160_spill] sm:$0xff]  ;;  %v4327_v18 = vld [vmem:[#allocation159_spill] sm:$0xff] }
 0x543   : > { %v978_v3 = vrot.slane %v977_v31, 1 }
 0x545   : > { %v979_v4 = vadd.f32 %v978_v3, %v977_v31  ;;  %v4328_v31 = vld [vmem:[#allocation157_spill] sm:$0xff]  ;;  %v4330_v3 = vld [vmem:[#allocation156_spill] sm:$0xff] }
 0x547   : > { %v982_v36 = vsel %vm737_vm5, %v979_v4, %v969_v35  ;;  %v4331_v35 = vld [vmem:[#allocation154_spill] sm:$0xff] }
 0x548   : > { %2044 = vmatmul.mubr.f32.vlgmr.msra.gmra.mxu1 %v982_v36  ;;  %v4332_v4 = vld [vmem:[#allocation158_spill] sm:$0xff]  ;;  %v4333_v36 = vld [vmem:[#allocation153_spill] sm:$0xff] }
 0x549   : > { %2047 = vmatpush3.msra.mxu1 %v4306_v12  ;;  %2078 = vmatprep.mubr.msk.f32.mxu1 %vm2673_vm0, %v4307_v25  ;;  %v4334_v12 = vld [vmem:[#allocation151_spill] sm:$0xff] }
 0x54a   : > { %2048 = vmatprep.subr.mxu1 %v4307_v25 }
 0x54b   : > { %2049 = vmatpush3.msra.mxu1 %v4308_v24  ;;  %v4335_v24 = vld [vmem:[#allocation155_spill] sm:$0xff] }
 0x54c   : > { %2050 = vmatprep.subr.mxu1 %v4307_v25 }
 0x54d   : > { %2051 = vmatpush3.msra.mxu1 %v4309_v6  ;;  %v4336_v6 = vld [vmem:[#allocation150_spill] sm:$0xff] }
 0x54e   : > { %2052 = vmatprep.subr.mxu1 %v4307_v25 }
 0x54f   : > { %2053 = vmatpush3.msra.mxu1 %v4310_v39  ;;  %v4337_v39 = vld [vmem:[#allocation148_spill] sm:$0xff] }
 0x550   : > { %2054 = vmatprep.subr.mxu1 %v4307_v25 }
 0x551   : > { %2055 = vmatpush3.msra.mxu1 %v4311_v16  ;;  %v4338_v16 = vld [vmem:[#allocation152_spill] sm:$0xff] }
 0x552   : > { %2056 = vmatprep.subr.mxu1 %v4307_v25 }
 0x553   : > { %2057 = vmatpush3.msra.mxu1 %v4312_v21  ;;  %v4339_v21 = vld [vmem:[#allocation147_spill] sm:$0xff] }
 0x554   : > { %2058 = vmatprep.subr.mxu1 %v4307_v25 }
 0x555   : > { %2059 = vmatpush3.msra.mxu1 %v4313_v20  ;;  %v4340_v20 = vld [vmem:[#allocation145_spill] sm:$0xff] }
 0x556   : > { %2060 = vmatprep.subr.mxu1 %v4307_v25 }
 0x557   : > { %2061 = vmatpush3.msra.mxu1 %v4314_v37  ;;  %v4341_v37 = vld [vmem:[#allocation149_spill] sm:$0xff] }
 0x558   : > { %2062 = vmatprep.subr.mxu1 %v4307_v25 }
 0x559   : > { %2063 = vmatpush3.msra.mxu1 %v4315_v38  ;;  %v4342_v38 = vld [vmem:[#allocation144_spill] sm:$0xff] }
 0x55a   : > { %2064 = vmatprep.subr.mxu1 %v4307_v25 }
 0x55b   : > { %2065 = vmatpush3.msra.mxu1 %v4316_v14  ;;  %v4343_v14 = vld [vmem:[#allocation142_spill] sm:$0xff] }
 0x55c   : > { %2066 = vmatprep.subr.mxu1 %v4307_v25 }
 0x55d   : > { %2067 = vmatpush3.msra.mxu1 %v4317_v0  ;;  %v4344_v0 = vld [vmem:[#allocation146_spill] sm:$0xff] }
 0x55e   : > { %2068 = vmatprep.subr.mxu1 %v4307_v25 }
 0x55f   : > { %2069 = vmatpush3.msra.mxu1 %v4318_v22  ;;  %v4345_v22 = vld [vmem:[#allocation141_spill] sm:$0xff] }
 0x560   : > { %2070 = vmatprep.subr.mxu1 %v4307_v25 }
 0x561   : > { %2071 = vmatpush3.msra.mxu1 %v4319_v32  ;;  %v4346_v32 = vld [vmem:[#allocation139_spill] sm:$0xff] }
 0x562   : > { %2072 = vmatprep.subr.mxu1 %v4307_v25 }
 0x563   : > { %2073 = vmatpush3.msra.mxu1 %v4320_v26  ;;  %v4347_v26 = vld [vmem:[#allocation143_spill] sm:$0xff] }
 0x564   : > { %2074 = vmatprep.subr.mxu1 %v4307_v25 }
 0x565   : > { %2075 = vmatpush3.msra.mxu1 %v4321_v9  ;;  %v4348_v9 = vld [vmem:[#allocation138_spill] sm:$0xff] }
 0x566   : > { %2076 = vmatprep.subr.mxu1 %v4307_v25 }
 0x567   : > { %2077 = vmatpush3.msra.mxu1 %v4322_v27  ;;  %v4349_v27 = vld [vmem:[#allocation136_spill] sm:$0xff] }
 0x568   : > { %2081 = vmatprep.subr.mxu1 %v4307_v25 }
 0x608   : > { %v1050_v28 = vpop.f32.mrf.mxu1 }
 0x609   : > { %v1054_v11 = vadd.f32 %v1050_v28, %v509_v1  ;;  %v4350_v1 = vld [vmem:[#allocation140_spill] sm:$0xff]  ;;  %v4351_v28 = vld [vmem:[#allocation135_spill] sm:$0xff] }
 0x60a   : > { %v2045_v23 = vpop.f32.mrf.mxu1 }
 0x60b   : > { %v1061_v30 = vadd.f32 %v4323_v63, %v1054_v11  ;;  %v4352_v11 = vld [vmem:[#allocation133_spill] sm:$0xff]  ;;  %v4354_v63 = vld [vmem:[#allocation132_spill] sm:$0xff] }
 0x60c   : > { %v4353_v23 = vld [vmem:[#allocation137_spill] sm:$0xff] }
 0x60d   : > { %v1062_v19 = vmax.f32 %v1061_v30, 0.0  ;;  %v4355_v30 = vld [vmem:[#allocation130_spill] sm:$0xff] }
 0x60f   : > { %1144 = vmatmul.mubr.f32.vlgmr.msra.gmra.mxu0 %v1062_v19  ;;  %2079 = vmatmul.mubr.f32.vlgmr.msra.gmra.mxu1 %v1062_v19  ;;  %v4356_v19 = vld [vmem:[#allocation134_spill] sm:$0xff] }
 0x610   : > { %1237 = vmatpush1.msra.mxu0 %v4324_v17  ;;  %1300 = vmatprep.mubr.f32.mxu0 %v4307_v25  ;;  %v4357_v17 = vld [vmem:[#allocation129_spill] sm:$0xff] }
 0x611   : > { %1238 = vmatprep.subr.mxu0 %v4325_v34  ;;  %2082 = vmatpush3.msra.mxu1 %v4326_v13  ;;  %v4358_v34 = vld [vmem:[#allocation127_spill] sm:$0xff] }
 0x612   : > { %1239 = vmatpush1.msra.mxu0 %v4327_v18  ;;  %2083 = vmatprep.subr.mxu1 %v4307_v25  ;;  %v4359_v13 = vld [vmem:[#allocation131_spill] sm:$0xff]  ;;  %v4360_v18 = vld [vmem:[#allocation126_spill] sm:$0xff] }
 0x613   : > { %1240 = vmatprep.subr.mxu0 %v4328_v31  ;;  %2084 = vmatpush3.msra.mxu1 %v4329_v33  ;;  %v4361_v31 = vld [vmem:[#allocation124_spill] sm:$0xff] }
 0x614   : > { %1241 = vmatpush1.msra.mxu0 %v4330_v3  ;;  %2085 = vmatprep.subr.mxu1 %v4307_v25  ;;  %v4362_v33 = vld [vmem:[#allocation128_spill] sm:$0xff]  ;;  %v4363_v3 = vld [vmem:[#allocation123_spill] sm:$0xff] }
 0x615   : > { %1242 = vmatprep.subr.mxu0 %v4331_v35  ;;  %2086 = vmatpush3.msra.mxu1 %v4332_v4  ;;  %v4364_v35 = vld [vmem:[#allocation121_spill] sm:$0xff] }
 0x616   : > { %1243 = vmatpush1.msra.mxu0 %v4333_v36  ;;  %2087 = vmatprep.subr.mxu1 %v4307_v25  ;;  %v4365_v4 = vld [vmem:[#allocation125_spill] sm:$0xff]  ;;  %v4366_v36 = vld [vmem:[#allocation120_spill] sm:$0xff] }
 0x617   : > { %1244 = vmatprep.subr.mxu0 %v4334_v12  ;;  %2088 = vmatpush3.msra.mxu1 %v4335_v24  ;;  %v4367_v12 = vld [vmem:[#allocation118_spill] sm:$0xff] }
 0x618   : > { %1245 = vmatpush1.msra.mxu0 %v4336_v6  ;;  %2089 = vmatprep.subr.mxu1 %v4307_v25  ;;  %v4368_v24 = vld [vmem:[#allocation122_spill] sm:$0xff]  ;;  %v4369_v6 = vld [vmem:[#allocation117_spill] sm:$0xff] }
 0x619   : > { %1246 = vmatprep.subr.mxu0 %v4337_v39  ;;  %2090 = vmatpush3.msra.mxu1 %v4338_v16  ;;  %v4370_v39 = vld [vmem:[#allocation119_spill] sm:$0xff]  ;;  %v4371_v16 = vld [vmem:[#allocation213_spill] sm:$0xff] }
 0x61a   : > { %1247 = vmatpush1.msra.mxu0 %v4339_v21  ;;  %2091 = vmatprep.subr.mxu1 %v4307_v25  ;;  %v4372_v21 = vld [vmem:[#allocation212_spill] sm:$0xff] }
 0x61b   : > { %1248 = vmatprep.subr.mxu0 %v4340_v20  ;;  %2092 = vmatpush3.msra.mxu1 %v4341_v37  ;;  %v4373_v20 = vld [vmem:[#allocation210_spill] sm:$0xff] }
 0x61c   : > { %1249 = vmatpush1.msra.mxu0 %v4342_v38  ;;  %2093 = vmatprep.subr.mxu1 %v4307_v25  ;;  %v4374_v37 = vld [vmem:[#allocation214_spill] sm:$0xff]  ;;  %v4375_v38 = vld [vmem:[#allocation209_spill] sm:$0xff] }
 0x61d   : > { %1250 = vmatprep.subr.mxu0 %v4343_v14  ;;  %2094 = vmatpush3.msra.mxu1 %v4344_v0  ;;  %v4376_v14 = vld [vmem:[#allocation207_spill] sm:$0xff] }
 0x61e   : > { %1251 = vmatpush1.msra.mxu0 %v4345_v22  ;;  %2095 = vmatprep.subr.mxu1 %v4307_v25  ;;  %v4377_v0 = vld [vmem:[#allocation211_spill] sm:$0xff]  ;;  %v4378_v22 = vld [vmem:[#allocation206_spill] sm:$0xff] }
 0x61f   : > { %1252 = vmatprep.subr.mxu0 %v4346_v32  ;;  %2096 = vmatpush3.msra.mxu1 %v4347_v26  ;;  %v4379_v32 = vld [vmem:[#allocation204_spill] sm:$0xff] }
 0x620   : > { %1253 = vmatpush1.msra.mxu0 %v4348_v9  ;;  %2097 = vmatprep.subr.mxu1 %v4307_v25  ;;  %v4380_v26 = vld [vmem:[#allocation208_spill] sm:$0xff]  ;;  %v4381_v9 = vld [vmem:[#allocation203_spill] sm:$0xff] }
 0x621   : > { %1254 = vmatprep.subr.mxu0 %v4349_v27  ;;  %2098 = vmatpush3.msra.mxu1 %v4350_v1  ;;  %v4382_v27 = vld [vmem:[#allocation201_spill] sm:$0xff] }
 0x622   : > { %1255 = vmatpush1.msra.mxu0 %v4351_v28  ;;  %2099 = vmatprep.subr.mxu1 %v4307_v25  ;;  %v4383_v1 = vld [vmem:[#allocation205_spill] sm:$0xff]  ;;  %v4384_v28 = vld [vmem:[#allocation200_spill] sm:$0xff] }
 0x623   : > { %1256 = vmatprep.subr.mxu0 %v4352_v11  ;;  %2100 = vmatpush3.msra.mxu1 %v4353_v23  ;;  %v4385_v11 = vld [vmem:[#allocation198_spill] sm:$0xff] }
 0x624   : > { %1257 = vmatpush1.msra.mxu0 %v4354_v63  ;;  %2101 = vmatprep.subr.mxu1 %v4307_v25  ;;  %v4386_v23 = vld [vmem:[#allocation202_spill] sm:$0xff]  ;;  %v4387_v63 = vld [vmem:[#allocation197_spill] sm:$0xff] }
 0x625   : > { %1258 = vmatprep.subr.mxu0 %v4355_v30  ;;  %2102 = vmatpush3.msra.mxu1 %v4356_v19  ;;  %v4388_v30 = vld [vmem:[#allocation195_spill] sm:$0xff] }
 0x626   : > { %1259 = vmatpush1.msra.mxu0 %v4357_v17  ;;  %2103 = vmatprep.subr.mxu1 %v4307_v25  ;;  %v4389_v19 = vld [vmem:[#allocation199_spill] sm:$0xff]  ;;  %v4390_v17 = vld [vmem:[#allocation194_spill] sm:$0xff] }
 0x627   : > { %1260 = vmatprep.subr.mxu0 %v4358_v34  ;;  %2104 = vmatpush3.msra.mxu1 %v4359_v13  ;;  %v4391_v34 = vld [vmem:[#allocation192_spill] sm:$0xff] }
 0x628   : > { %1261 = vmatpush1.msra.mxu0 %v4360_v18  ;;  %2105 = vmatprep.subr.mxu1 %v4307_v25  ;;  %v4392_v13 = vld [vmem:[#allocation196_spill] sm:$0xff]  ;;  %v4393_v18 = vld [vmem:[#allocation191_spill] sm:$0xff] }
 0x629   : > { %1262 = vmatprep.subr.mxu0 %v4361_v31  ;;  %2106 = vmatpush3.msra.mxu1 %v4362_v33  ;;  %v4394_v31 = vld [vmem:[#allocation189_spill] sm:$0xff] }
 0x62a   : > { %1263 = vmatpush1.msra.mxu0 %v4363_v3  ;;  %2107 = vmatprep.subr.mxu1 %v4307_v25  ;;  %v4395_v33 = vld [vmem:[#allocation193_spill] sm:$0xff]  ;;  %v4396_v3 = vld [vmem:[#allocation188_spill] sm:$0xff] }
 0x62b   : > { %1264 = vmatprep.subr.mxu0 %v4364_v35  ;;  %2108 = vmatpush3.msra.mxu1 %v4365_v4  ;;  %v4397_v35 = vld [vmem:[#allocation186_spill] sm:$0xff] }
 0x62c   : > { %1265 = vmatpush1.msra.mxu0 %v4366_v36  ;;  %2109 = vmatprep.subr.mxu1 %v4307_v25  ;;  %v4398_v4 = vld [vmem:[#allocation190_spill] sm:$0xff]  ;;  %v4399_v36 = vld [vmem:[#allocation185_spill] sm:$0xff] }
 0x62d   : > { %1266 = vmatprep.subr.mxu0 %v4367_v12  ;;  %2110 = vmatpush3.msra.mxu1 %v4368_v24  ;;  %v4400_v12 = vld [vmem:[#allocation183_spill] sm:$0xff] }
 0x62e   : > { %1267 = vmatpush1.msra.mxu0 %v4369_v6  ;;  %2111 = vmatprep.subr.mxu1 %v4307_v25  ;;  %v4401_v24 = vld [vmem:[#allocation187_spill] sm:$0xff]  ;;  %v4402_v6 = vld [vmem:[#allocation182_spill] sm:$0xff] }
 0x62f   : > { %1301 = vmatmul.mubr.f32.vlgmr.msra.gmra.mxu0 %v2647_v61  ;;  %2112 = vmatpush3.msra.mxu1 %v4370_v39  ;;  %v4403_v39 = vld [vmem:[#allocation180_spill] sm:$0xff] }
 0x630   : > { %2113 = vmatprep.mubr.msk.f32.mxu1 %vm2673_vm0, %v4307_v25  ;;  %1414 = vmatprep.subr.mxu0 %v4371_v16  ;;  %v4404_v16 = vld [vmem:[#allocation184_spill] sm:$0xff] }
 0x631   : > { %2114 = vmatmul.mubr.f32.vlgmr.msra.gmra.mxu1 %v2647_v61  ;;  %1415 = vmatpush1.msra.mxu0 %v4372_v21  ;;  %v4405_v21 = vld [vmem:[#allocation179_spill] sm:$0xff] }
 0x632   : > { %2116 = vmatprep.subr.mxu1 %v4307_v25  ;;  %1416 = vmatprep.subr.mxu0 %v4373_v20  ;;  %v4406_v20 = vld [vmem:[#allocation177_spill] sm:$0xff] }
 0x633   : > { %2117 = vmatpush3.msra.mxu1 %v4374_v37  ;;  %1417 = vmatpush1.msra.mxu0 %v4375_v38  ;;  %v4407_v37 = vld [vmem:[#allocation181_spill] sm:$0xff]  ;;  %v4408_v38 = vld [vmem:[#allocation176_spill] sm:$0xff] }
 0x634   : > { %2118 = vmatprep.subr.mxu1 %v4307_v25  ;;  %1418 = vmatprep.subr.mxu0 %v4376_v14  ;;  %v4409_v14 = vld [vmem:[#allocation174_spill] sm:$0xff] }
 0x635   : > { %2119 = vmatpush3.msra.mxu1 %v4377_v0  ;;  %1419 = vmatpush1.msra.mxu0 %v4378_v22  ;;  %v4410_v0 = vld [vmem:[#allocation178_spill] sm:$0xff]  ;;  %v4411_v22 = vld [vmem:[#allocation173_spill] sm:$0xff] }
 0x636   : > { %2120 = vmatprep.subr.mxu1 %v4307_v25  ;;  %1420 = vmatprep.subr.mxu0 %v4379_v32  ;;  %v4412_v32 = vld [vmem:[#allocation171_spill] sm:$0xff] }
 0x637   : > { %2121 = vmatpush3.msra.mxu1 %v4380_v26  ;;  %1421 = vmatpush1.msra.mxu0 %v4381_v9  ;;  %v4413_v26 = vld [vmem:[#allocation175_spill] sm:$0xff]  ;;  %v4414_v9 = vld [vmem:[#allocation170_spill] sm:$0xff] }
 0x638   : > { %2122 = vmatprep.subr.mxu1 %v4307_v25  ;;  %1422 = vmatprep.subr.mxu0 %v4382_v27  ;;  %v4415_v27 = vld [vmem:[#allocation168_spill] sm:$0xff] }
 0x639   : > { %2123 = vmatpush3.msra.mxu1 %v4383_v1  ;;  %1423 = vmatpush1.msra.mxu0 %v4384_v28  ;;  %v4416_v1 = vld [vmem:[#allocation172_spill] sm:$0xff]  ;;  %v4417_v28 = vld [vmem:[#allocation167_spill] sm:$0xff] }
 0x63a   : > { %2124 = vmatprep.subr.mxu1 %v4307_v25  ;;  %1424 = vmatprep.subr.mxu0 %v4385_v11  ;;  %v4418_v11 = vld [vmem:[#allocation169_spill] sm:$0xff] }
 0x63b   : > { %2125 = vmatpush3.msra.mxu1 %v4386_v23  ;;  %1425 = vmatpush1.msra.mxu0 %v4387_v63  ;;  %v4419_v23 = vld [vmem:[#allocation261_spill] sm:$0xff] }
 0x63c   : > { %2126 = vmatprep.subr.mxu1 %v4307_v25  ;;  %1426 = vmatprep.subr.mxu0 %v4388_v30 }
 0x63d   : > { %2127 = vmatpush3.msra.mxu1 %v4389_v19  ;;  %1427 = vmatpush1.msra.mxu0 %v4390_v17  ;;  %v4420_v17 = vld [vmem:[#allocation165_spill] sm:$0xff] }
 0x63e   : > { %2128 = vmatprep.subr.mxu1 %v4307_v25  ;;  %1428 = vmatprep.subr.mxu0 %v4391_v34  ;;  %v1067_v34 = vrot.slane %v4420_v17, %v3517_v2 }
 0x63f   : > { %2129 = vmatpush3.msra.mxu1 %v4392_v13  ;;  %1429 = vmatpush1.msra.mxu0 %v4393_v18  ;;  %v4421_v13 = vld [vmem:[#allocation166_spill] sm:$0xff] }
 0x640   : > { %2130 = vmatprep.subr.mxu1 %v4307_v25  ;;  %1430 = vmatprep.subr.mxu0 %v4394_v31  ;;  %v1224_v18 = vrot.slane %v4421_v13, %v3517_v2 }
 0x641   : > { %2131 = vmatpush3.msra.mxu1 %v4395_v33  ;;  %1431 = vmatpush1.msra.mxu0 %v4396_v3 }
 0x642   : > { %2132 = vmatprep.subr.mxu1 %v4307_v25  ;;  %1432 = vmatprep.subr.mxu0 %v4397_v35 }
 0x643   : > { %2133 = vmatpush3.msra.mxu1 %v4398_v4  ;;  %1433 = vmatpush1.msra.mxu0 %v4399_v36  ;;  %v1228_v4 = vrot.slane %v4421_v13, %v3581_v29 }
 0x644   : > { %2134 = vmatprep.subr.mxu1 %v4307_v25  ;;  %1434 = vmatprep.subr.mxu0 %v4400_v12 }
 0x645   : > { %2135 = vmatpush3.msra.mxu1 %v4401_v24  ;;  %1435 = vmatpush1.msra.mxu0 %v4402_v6  ;;  %v1071_v24 = vrot.slane %v4420_v17, %v3581_v29 }
 0x646   : > { %2136 = vmatprep.subr.mxu1 %v4307_v25  ;;  %1436 = vmatprep.subr.mxu0 %v4403_v39 }
 0x647   : > { %2137 = vmatpush3.msra.mxu1 %v4404_v16  ;;  %1437 = vmatpush1.msra.mxu0 %v4405_v21 }
 0x648   : > { %2138 = vmatprep.subr.mxu1 %v4307_v25  ;;  %1438 = vmatprep.subr.mxu0 %v4406_v20 }
 0x649   : > { %2139 = vmatpush3.msra.mxu1 %v4407_v37  ;;  %1439 = vmatpush1.msra.mxu0 %v4408_v38 }
 0x64a   : > { %2140 = vmatprep.subr.mxu1 %v4307_v25  ;;  %1440 = vmatprep.subr.mxu0 %v4409_v14 }
 0x64b   : > { %2141 = vmatpush3.msra.mxu1 %v4410_v0  ;;  %1441 = vmatpush1.msra.mxu0 %v4411_v22  ;;  %v3818_v22 = vsub.s32 2, %v3513_v7 }
 0x64c   : > { %2142 = vmatprep.subr.mxu1 %v4307_v25  ;;  %1442 = vmatprep.subr.mxu0 %v4412_v32 }
 0x64d   : > { %2143 = vmatpush3.msra.mxu1 %v4413_v26  ;;  %1443 = vmatpush1.msra.mxu0 %v4414_v9  ;;  %v1232_v32 = vrot.slane %v4421_v13, %v3818_v22  ;;  %v1075_v9 = vrot.slane %v4420_v17, %v3818_v22 }
 0x64e   : > { %2144 = vmatprep.subr.mxu1 %v4307_v25  ;;  %1444 = vmatprep.subr.mxu0 %v4415_v27 }
 0x64f   : > { %2145 = vmatpush3.msra.mxu1 %v4416_v1  ;;  %1445 = vmatpush1.msra.mxu0 %v4417_v28 }
 0x650   : > { %2146 = vmatprep.subr.mxu1 %v4307_v25  ;;  %1478 = vmatprep.mubr.f32.mxu0 %v4307_v25 }
 0x651   : > { %2147 = vmatpush3.msra.mxu1 %v4418_v11  ;;  %2148 = vmatprep.mubr.msk.f32.mxu1 %vm2673_vm0, %v4307_v25 }
 0x652   : > { %1571 = vmatprep.subr.mxu0 %v4419_v23  ;;  %2151 = vmatprep.subr.mxu1 %v4307_v25 }
 0x6cf   : > { %v1216_v63 = vpop.f32.mrf.mxu1  ;;  %v1145_v19 = vpop.f32.mrf.mxu0 }
 0x6d0   : > { %v1146_v3 = vadd.f32 %v1145_v19, %v1067_v34  ;;  %v1217_v11 = vadd.f32 %v1216_v63, %v1075_v9  ;;  %v4423_v63 = vld [vmem:[#allocation258_spill] sm:$0xff]  ;;  %v4441_v9 = vld [vmem:[#allocation240_spill] sm:$0xff] }
 0x6d1   : > { %v2080_v30 = vpop.f32.mrf.mxu1  ;;  %v1147_v31 = vpop.f32.mrf.mxu0 }
 0x6d2   : > { %v1148_v20 = vadd.f32 %v1147_v31, %v1071_v24  ;;  %v4429_v24 = vld [vmem:[#allocation252_spill] sm:$0xff] }
 0x6ef   : > { %v1302_v33 = vpop.f32.mrf.mxu0 }
 0x6f0   : > { %v1303_v35 = vadd.f32 %v1302_v33, %v1224_v18  ;;  %v4422_v33 = vld [vmem:[#allocation260_spill] sm:$0xff] }
 0x6f1   : > { %v1304_v36 = vpop.f32.mrf.mxu0  ;;  %v1373_v12 = vpop.f32.mrf.mxu1 }
 0x6f2   : > { %v1377_v6 = vadd.f32 %v1303_v35, %v1146_v3  ;;  %v1305_v21 = vadd.f32 %v1304_v36, %v1228_v4  ;;  %v1374_v1 = vadd.f32 %v1373_v12, %v1232_v32  ;;  %v4424_v3 = vld [vmem:[#allocation262_spill] sm:$0xff]  ;;  %v4425_v35 = vld [vmem:[#allocation257_spill] sm:$0xff]  ;;  %v4426_v4 = vld [vmem:[#allocation255_spill] sm:$0xff] }
 0x6f3   : > { %v2115_v39 = vpop.f32.mrf.mxu1  ;;  %v4427_v36 = vld [vmem:[#allocation259_spill] sm:$0xff]  ;;  %v4428_v12 = vld [vmem:[#allocation254_spill] sm:$0xff] }
 0x6f4   : > { %v1852_v16 = vmul.f32 -1.442695, %v1377_v6  ;;  %v1384_v37 = vadd.f32 %v1305_v21, %v1148_v20  ;;  %v4430_v6 = vld [vmem:[#allocation256_spill] sm:$0xff]  ;;  %v4431_v39 = vld [vmem:[#allocation251_spill] sm:$0xff]  ;;  %v4433_v21 = vld [vmem:[#allocation253_spill] sm:$0xff] }
 0x6f5   : > { %v4434_v20 = vld [vmem:[#allocation248_spill] sm:$0xff]  ;;  %v4439_v32 = vld [vmem:[#allocation247_spill] sm:$0xff] }
 0x6f6   : > { %2313 = vpow2.f32 %v1852_v16  ;;  %v1853_v38 = vmul.f32 -1.442695, %v1384_v37  ;;  %v4432_v16 = vld [vmem:[#allocation249_spill] sm:$0xff]  ;;  %v4435_v37 = vld [vmem:[#allocation246_spill] sm:$0xff] }
 0x6f8   : > { %2315 = vpow2.f32 %v1853_v38  ;;  %v4436_v38 = vld [vmem:[#allocation250_spill] sm:$0xff] }
 0x703   : > { %v2314_v14 = vpop.eup %2313 }
 0x704   : > { %v1381_v0 = vadd.f32 1.0, %v2314_v14  ;;  %v4437_v14 = vld [vmem:[#allocation245_spill] sm:$0xff] }
 0x705   : > { %v2316_v26 = vpop.eup %2315 }
 0x706   : > { %2317 = vrcp.f32 %v1381_v0  ;;  %v1388_v27 = vadd.f32 1.0, %v2316_v26  ;;  %v4438_v0 = vld [vmem:[#allocation243_spill] sm:$0xff]  ;;  %v4440_v26 = vld [vmem:[#allocation242_spill] sm:$0xff] }
 0x708   : > { %2319 = vrcp.f32 %v1388_v27  ;;  %v4442_v27 = vld [vmem:[#allocation244_spill] sm:$0xff] }
 0x713   : > { %v2318_v28 = vpop.eup %2317 }
 0x714   : > { %v1391_v23 = vmul.f32 %v2318_v28, %v1374_v1  ;;  %v4443_v1 = vld [vmem:[#allocation239_spill] sm:$0xff]  ;;  %v4444_v28 = vld [vmem:[#allocation237_spill] sm:$0xff] }
 0x715   : > { %v2320_v19 = vpop.eup %2319 }
 0x716   : > { %v1392_v30 = vadd.f32 %v1391_v23, %v1217_v11  ;;  %v1394_v34 = vsub.f32 1.0, %v2320_v19  ;;  %v1396_v31 = vmul.f32 %v2647_v61, %v2320_v19  ;;  %v4445_v11 = vld [vmem:[#allocation241_spill] sm:$0xff]  ;;  %v4446_v23 = vld [vmem:[#allocation236_spill] sm:$0xff]  ;;  %v4448_v19 = vld [vmem:[#allocation238_spill] sm:$0xff] }
 0x718   : > { %2321 = vtanh.f32 %v1392_v30  ;;  %v4447_v30 = vld [vmem:[#allocation234_spill] sm:$0xff] }
 0x725   : > { %v2322_v18 = vpop.eup %2321 }
 0x726   : > { %v1395_v7 = vmul.f32 %v2322_v18, %v1394_v34  ;;  %v4449_v34 = vld [vmem:[#allocation233_spill] sm:$0xff]  ;;  %v4450_v18 = vld [vmem:[#allocation231_spill] sm:$0xff] }
 0x728   : > { %v3825_v61 = vadd.f32 %v1396_v31, %v1395_v7   ;;  %v4451_v7 = vld [vmem:[#allocation235_spill] sm:$0xff]  ;;  %v4452_v31 = vld [vmem:[#allocation230_spill] sm:$0xff] }
 0x72a   : > { %1479 = vmatmul.mubr.f32.vlgmr.msra.gmra.mxu0 %v3825_v61  ;;  %2149 = vmatmul.mubr.f32.vlgmr.msra.gmra.mxu1 %v3825_v61 }
 0x72b   : > { %1572 = vmatpush1.msra.mxu0 %v4422_v33  ;;  %1635 = vmatprep.mubr.f32.mxu0 %v4307_v25  ;;  %v4453_v33 = vld [vmem:[#allocation228_spill] sm:$0xff] }
 0x72c   : > { %1573 = vmatprep.subr.mxu0 %v4423_v63  ;;  %2152 = vmatpush3.msra.mxu1 %v4424_v3  ;;  %v4454_v63 = vld [vmem:[#allocation232_spill] sm:$0xff]  ;;  %v4455_v3 = vld [vmem:[#allocation227_spill] sm:$0xff] }
 0x72d   : > { %1574 = vmatpush1.msra.mxu0 %v4425_v35  ;;  %2153 = vmatprep.subr.mxu1 %v4307_v25  ;;  %v4456_v35 = vld [vmem:[#allocation225_spill] sm:$0xff] }
 0x72e   : > { %1575 = vmatprep.subr.mxu0 %v4426_v4  ;;  %2154 = vmatpush3.msra.mxu1 %v4427_v36  ;;  %v4457_v4 = vld [vmem:[#allocation229_spill] sm:$0xff]  ;;  %v4458_v36 = vld [vmem:[#allocation224_spill] sm:$0xff] }
 0x72f   : > { %1576 = vmatpush1.msra.mxu0 %v4428_v12  ;;  %2155 = vmatprep.subr.mxu1 %v4307_v25  ;;  %v4459_v12 = vld [vmem:[#allocation222_spill] sm:$0xff] }
 0x730   : > { %1577 = vmatprep.subr.mxu0 %v4429_v24  ;;  %2156 = vmatpush3.msra.mxu1 %v4430_v6  ;;  %v4460_v24 = vld [vmem:[#allocation226_spill] sm:$0xff]  ;;  %v4461_v6 = vld [vmem:[#allocation221_spill] sm:$0xff] }
 0x731   : > { %1578 = vmatpush1.msra.mxu0 %v4431_v39  ;;  %2157 = vmatprep.subr.mxu1 %v4307_v25  ;;  %v4462_v39 = vld [vmem:[#allocation219_spill] sm:$0xff] }
 0x732   : > { %1579 = vmatprep.subr.mxu0 %v4432_v16  ;;  %2158 = vmatpush3.msra.mxu1 %v4433_v21  ;;  %v4463_v16 = vld [vmem:[#allocation223_spill] sm:$0xff]  ;;  %v4464_v21 = vld [vmem:[#allocation218_spill] sm:$0xff] }
 0x733   : > { %1580 = vmatpush1.msra.mxu0 %v4434_v20  ;;  %2159 = vmatprep.subr.mxu1 %v4307_v25  ;;  %v4465_v20 = vld [vmem:[#allocation216_spill] sm:$0xff] }
 0x734   : > { %1581 = vmatprep.subr.mxu0 %v4435_v37  ;;  %2160 = vmatpush3.msra.mxu1 %v4436_v38  ;;  %v4466_v37 = vld [vmem:[#allocation220_spill] sm:$0xff]  ;;  %v4467_v38 = vld [vmem:[#allocation215_spill] sm:$0xff] }
 0x735   : > { %1582 = vmatpush1.msra.mxu0 %v4437_v14  ;;  %2161 = vmatprep.subr.mxu1 %v4307_v25  ;;  %v4468_v14 = vld [vmem:[#allocation217_spill] sm:$0xff] }
 0x736   : > { %1583 = vmatprep.subr.mxu0 %v4438_v0  ;;  %2162 = vmatpush3.msra.mxu1 %v4439_v32  ;;  %v4469_v0 = vld [vmem:[#allocation273_spill] sm:$0xff]  ;;  %v4470_v32 = vld [vmem:[#allocation272_spill] sm:$0xff] }
 0x737   : > { %1584 = vmatpush1.msra.mxu0 %v4440_v26  ;;  %2163 = vmatprep.subr.mxu1 %v4307_v25  ;;  %v4471_v26 = vld [vmem:[#allocation271_spill] sm:$0xff] }
 0x738   : > { %1585 = vmatprep.subr.mxu0 %v4441_v9  ;;  %2164 = vmatpush3.msra.mxu1 %v4442_v27  ;;  %v4472_v9 = vld [vmem:[#allocation270_spill] sm:$0xff]  ;;  %v4473_v27 = vld [vmem:[#allocation269_spill] sm:$0xff] }
 0x739   : > { %1586 = vmatpush1.msra.mxu0 %v4443_v1  ;;  %2165 = vmatprep.subr.mxu1 %v4307_v25  ;;  %v4474_v1 = vld [vmem:[#allocation268_spill] sm:$0xff] }
 0x73a   : > { %1587 = vmatprep.subr.mxu0 %v4444_v28  ;;  %2166 = vmatpush3.msra.mxu1 %v4445_v11  ;;  %v4475_v28 = vld [vmem:[#allocation267_spill] sm:$0xff]  ;;  %v4476_v11 = vld [vmem:[#allocation266_spill] sm:$0xff] }
 0x73b   : > { %1588 = vmatpush1.msra.mxu0 %v4446_v23  ;;  %2167 = vmatprep.subr.mxu1 %v4307_v25  ;;  %v4477_v23 = vld [vmem:[#allocation265_spill] sm:$0xff] }
 0x73c   : > { %1589 = vmatprep.subr.mxu0 %v4447_v30  ;;  %2168 = vmatpush3.msra.mxu1 %v4448_v19 }
 0x73d   : > { %1590 = vmatpush1.msra.mxu0 %v4449_v34  ;;  %2169 = vmatprep.subr.mxu1 %v4307_v25 }
 0x73e   : > { %1591 = vmatprep.subr.mxu0 %v4450_v18  ;;  %2170 = vmatpush3.msra.mxu1 %v4451_v7  ;;  %v4478_v18 = vld [vmem:[#allocation263_spill] sm:$0xff] }
 0x73f   : > { %1592 = vmatpush1.msra.mxu0 %v4452_v31  ;;  %2171 = vmatprep.subr.mxu1 %v4307_v25  ;;  %v1402_v7 = vrot.slane %v4478_v18, %v3517_v2  ;;  %v4479_v31 = vld [vmem:[#allocation264_spill] sm:$0xff] }
 0x740   : > { %1593 = vmatprep.subr.mxu0 %v4453_v33  ;;  %2172 = vmatpush3.msra.mxu1 %v4454_v63  ;;  %v1559_v33 = vrot.slane %v4479_v31, %v3517_v2 }
 0x741   : > { %1594 = vmatpush1.msra.mxu0 %v4455_v3  ;;  %2173 = vmatprep.subr.mxu1 %v4307_v25 }
 0x742   : > { %1595 = vmatprep.subr.mxu0 %v4456_v35  ;;  %2174 = vmatpush3.msra.mxu1 %v4457_v4 }
 0x743   : > { %1596 = vmatpush1.msra.mxu0 %v4458_v36  ;;  %2175 = vmatprep.subr.mxu1 %v4307_v25  ;;  %v1563_v36 = vrot.slane %v4479_v31, %v3581_v29 }
 0x744   : > { %1597 = vmatprep.subr.mxu0 %v4459_v12  ;;  %2176 = vmatpush3.msra.mxu1 %v4460_v24  ;;  %v1406_v24 = vrot.slane %v4478_v18, %v3581_v29 }
 0x745   : > { %1598 = vmatpush1.msra.mxu0 %v4461_v6  ;;  %2177 = vmatprep.subr.mxu1 %v4307_v25 }
 0x746   : > { %1599 = vmatprep.subr.mxu0 %v4462_v39  ;;  %2178 = vmatpush3.msra.mxu1 %v4463_v16 }
 0x747   : > { %1600 = vmatpush1.msra.mxu0 %v4464_v21  ;;  %2179 = vmatprep.subr.mxu1 %v4307_v25 }
 0x748   : > { %1601 = vmatprep.subr.mxu0 %v4465_v20  ;;  %2180 = vmatpush3.msra.mxu1 %v4466_v37 }
 0x749   : > { %1602 = vmatpush1.msra.mxu0 %v4467_v38  ;;  %2181 = vmatprep.subr.mxu1 %v4307_v25 }
 0x74a   : > { %1636 = vmatmul.mubr.f32.vlgmr.msra.gmra.mxu0 %v2643_v55  ;;  %2182 = vmatpush3.msra.mxu1 %v4468_v14 }
 0x74b   : > { %2183 = vmatprep.mubr.msk.f32.mxu1 %vm2673_vm0, %v4307_v25  ;;  %2186 = vmatprep.subr.mxu0 %v4307_v25 }
 0x74c   : > { %2184 = vmatmul.mubr.f32.vlgmr.msra.gmra.mxu1 %v2643_v55  ;;  %2187 = vmatpush3.msra.mxu0 %v3386_v60 }
 0x74d   : > { %2188 = vmatprep.subr.mxu0 %v4307_v25  ;;  %2218 = vmatprep.mubr.msk.f32.mxu0 %vm2673_vm0, %v4307_v25 }
 0x74e   : > { %2189 = vmatpush3.msra.mxu0 %v3384_v10 }
 0x74f   : > { %2190 = vmatprep.subr.mxu0 %v4307_v25 }
 0x750   : > { %2191 = vmatpush3.msra.mxu0 %v3382_v5 }
 0x751   : > { %2192 = vmatprep.subr.mxu0 %v4307_v25 }
 0x752   : > { %2193 = vmatpush3.msra.mxu0 %v3380_v56 }
 0x753   : > { %2194 = vmatprep.subr.mxu0 %v4307_v25 }
 0x754   : > { %2195 = vmatpush3.msra.mxu0 %v3378_v15 }
 0x755   : > { %2196 = vmatprep.subr.mxu0 %v4307_v25 }
 0x756   : > { %2197 = vmatpush3.msra.mxu0 %v3376_v8 }
 0x757   : > { %2198 = vmatprep.subr.mxu0 %v4307_v25 }
 0x758   : > { %2199 = vmatpush3.msra.mxu0 %v3374_v58 }
 0x759   : > { %2200 = vmatprep.subr.mxu0 %v4307_v25 }
 0x75a   : > { %2201 = vmatpush3.msra.mxu0 %v4469_v0  ;;  %v1567_v0 = vrot.slane %v4479_v31, %v3818_v22 }
 0x75b   : > { %2202 = vmatprep.subr.mxu0 %v4307_v25 }
 0x75c   : > { %2203 = vmatpush3.msra.mxu0 %v4470_v32 }
 0x75d   : > { %2204 = vmatprep.subr.mxu0 %v4307_v25 }
 0x75e   : > { %2205 = vmatpush3.msra.mxu0 %v4471_v26  ;;  %v1410_v26 = vrot.slane %v4478_v18, %v3818_v22 }
 0x75f   : > { %2206 = vmatprep.subr.mxu0 %v4307_v25 }
 0x760   : > { %2207 = vmatpush3.msra.mxu0 %v4472_v9 }
 0x761   : > { %2208 = vmatprep.subr.mxu0 %v4307_v25 }
 0x762   : > { %2209 = vmatpush3.msra.mxu0 %v4473_v27 }
 0x763   : > { %2210 = vmatprep.subr.mxu0 %v4307_v25 }
 0x764   : > { %2211 = vmatpush3.msra.mxu0 %v4474_v1 }
 0x765   : > { %2212 = vmatprep.subr.mxu0 %v4307_v25 }
 0x766   : > { %2213 = vmatpush3.msra.mxu0 %v4475_v28 }
 0x767   : > { %2214 = vmatprep.subr.mxu0 %v4307_v25 }
 0x768   : > { %2215 = vmatpush3.msra.mxu0 %v4476_v11 }
 0x769   : > { %2216 = vmatprep.subr.mxu0 %v4307_v25 }
 0x76a   : > { %2217 = vmatpush3.msra.mxu0 %v4477_v23 }
 0x7ea   : > { %v1551_v30 = vpop.f32.mrf.mxu1  ;;  %v1480_v34 = vpop.f32.mrf.mxu0 }
 0x7eb   : > { %v1481_v35 = vadd.f32 %v1480_v34, %v1402_v7  ;;  %v1552_v1 = vadd.f32 %v1551_v30, %v1410_v26 }
 0x7ec   : > { %v2150_v19 = vpop.f32.mrf.mxu1  ;;  %v1482_v63 = vpop.f32.mrf.mxu0 }
 0x7ed   : > { %v1483_v20 = vadd.f32 %v1482_v63, %v1406_v24 }
 0x80a   : > { %v1637_v3 = vpop.f32.mrf.mxu0 }
 0x80b   : > { %v1638_v4 = vadd.f32 %v1637_v3, %v1559_v33 }
 0x80c   : > { %v1639_v12 = vpop.f32.mrf.mxu0  ;;  %v1708_v25 = vpop.f32.mrf.mxu1 }
 0x80d   : > { %v1712_v6 = vadd.f32 %v1638_v4, %v1481_v35  ;;  %v1640_v21 = vadd.f32 %v1639_v12, %v1563_v36  ;;  %v1709_v9 = vadd.f32 %v1708_v25, %v1567_v0 }
 0x80e   : > { %v2185_v39 = vpop.f32.mrf.mxu1 }
 0x80f   : > { %v1854_v16 = vmul.f32 -1.442695, %v1712_v6  ;;  %v1719_v37 = vadd.f32 %v1640_v21, %v1483_v20 }
 0x811   : > { %2323 = vpow2.f32 %v1854_v16  ;;  %v1855_v2 = vmul.f32 -1.442695, %v1719_v37 }
 0x813   : > { %2325 = vpow2.f32 %v1855_v2 }
 0x81e   : > { %v2324_v38 = vpop.eup %2323 }
 0x81f   : > { %v1716_v14 = vadd.f32 1.0, %v2324_v38 }
 0x820   : > { %v2326_v32 = vpop.eup %2325 }
 0x821   : > { %2327 = vrcp.f32 %v1716_v14  ;;  %v1723_v29 = vadd.f32 1.0, %v2326_v32 }
 0x823   : > { %2329 = vrcp.f32 %v1723_v29 }
 0x82e   : > { %v2328_v27 = vpop.eup %2327 }
 0x82f   : > { %v1726_v28 = vmul.f32 %v2328_v27, %v1709_v9 }
 0x830   : > { %v2330_v23 = vpop.eup %2329 }
 0x831   : > { %v1727_v11 = vadd.f32 %v1726_v28, %v1552_v1  ;;  %v1729_v19 = vsub.f32 1.0, %v2330_v23  ;;  %v1731_v33 = vmul.f32 %v2643_v55, %v2330_v23 }
 0x833   : > { %2331 = vtanh.f32 %v1727_v11 }
 0x840   : > { %v2332_v34 = vpop.eup %2331 }
 0x841   : > { %v1730_v7 = vmul.f32 %v2332_v34, %v1729_v19 }
 0x843   : > { %v1732_v55 = vadd.f32 %v1731_v33, %v1730_v7  }
 0x845   : > { %2219 = vmatmul.mubr.f32.vlgmr.msra.gmra.mxu0 %v1732_v55 }
 0x904   :  { %503 = sbr.rel (!%p501_p9) target bundleno = 293 (0x125), region = 153 }
 0x905   : > { %v1805_v63 = vpop.f32.mrf.mxu0 }
 0x906   : > { %v1806_v22 = vadd.f32 %v3391_v53, %v1805_v63 }
 0x907   : > { %v2220_v3 = vpop.f32.mrf.mxu0 }
 0x908   : > { %1810 = vst [vmem:[%s1809_s26] sm:$0x3] %v1806_v22 }
 0x909   :  { %2604 = shalt.err (!%p2601_p0)
}
 0x90a   :  { %1822 = dma.vmem_to_hbm [thread:$0]  %s1817_s4, 1248, %s3978_s18, [#allocation4], %s2664_s9, %s2664_s9, %s2665_s22  }
 0x90b   :  { %2639 = dma.done.wait [#allocation4], 1248  }
 0x90c   :  { %2640 = vsyncadd [#allocation4], 4294966048 }
 0x90d   :  { %1826 = vsyncpa [#allocation3], 1 }
 0x90e   :  { %1827 = vsyncpa [#allocation6], 1 }
 0x90f   :  { %1828 = vsyncpa [#allocation9], 1 }
 0x910   :  { %1829 = vsyncpa [#allocation12], 1 }
 0x911   :  { %1830 = vsyncpa [#allocation15], 1 }
 0x912   :  { %1831 = vsyncpa [#allocation18], 1 }
 0x913   :  { %1832 = vsyncpa [#allocation21], 1 }
 0x914   :  { %1833 = vsyncpa [#allocation4], 1 }

</bundles_post_ra>
